<compile_context>
chip_gen: v7x
topology: tpu7x:2x2x1
jax: 0.10.0
libtpu: 0.0.40
codegen_flags: <defaults>
</compile_context>

<pallas_src>
import math

import jax
import jax.numpy as jnp
from jax.experimental import pallas as pl
from jax.experimental.pallas import tpu as pltpu

# ---- small synthetic model config ----
BATCH = 2
IN_CH = 3
IMG = 16
PATCH = 8
WIDTH = 32
HEADS = 4
LAYERS = 2
MLP_DIM = 4 * WIDTH
GRID_HW = IMG // PATCH
NUM_PATCHES = GRID_HW * GRID_HW
SEQ = NUM_PATCHES + 1
HEAD_DIM = WIDTH // HEADS
EPS = 1e-5
DTYPE = jnp.float32


# ------------------------- fused Pallas kernel -------------------------

def _ln(x, g, b):
    """LayerNorm over the last dim; x (M, D) f32 value, g/b (1, D) values."""
    mu = jnp.mean(x, axis=-1, keepdims=True)
    var = jnp.mean(jnp.square(x - mu), axis=-1, keepdims=True)
    return (x - mu) * jax.lax.rsqrt(var + EPS) * g + b


def _fused_vit_kernel(
    patches_ref, conv_w_ref, cls_ref, pos_ref,
    lnpre_g_ref, lnpre_b_ref, lnpost_g_ref, lnpost_b_ref,
    ln1_g_ref, ln1_b_ref, ln2_g_ref, ln2_b_ref,
    wqkv_ref, bqkv_ref, wo_ref, bo_ref,
    w1_ref, b1_ref, w2_ref, b2_ref,
    o_ref,
):
    f32 = jnp.float32
    n_rows, width = o_ref.shape            # (B*P, D)
    seq = pos_ref.shape[0]                 # S = P + 1
    n_patches = seq - 1
    batch = n_rows // n_patches
    layers = wqkv_ref.shape[0]
    dh = width // HEADS
    scale = 1.0 / math.sqrt(dh)

    # ---- patch embedding (conv1 as matmul), CLS token, positional embedding ----
    tok = jnp.dot(patches_ref[...].astype(f32), conv_w_ref[...].astype(f32),
                  preferred_element_type=f32)                       # (B*P, D)
    pos = pos_ref[...].astype(f32)                                  # (S, D)
    cls_row = cls_ref[...].astype(f32)                              # (1, D)

    pieces = []
    for b in range(batch):
        pieces.append(cls_row)
        pieces.append(tok[b * n_patches:(b + 1) * n_patches, :])
    x = jnp.concatenate(pieces, axis=0)                             # (B*S, D), batch-major
    x = x + jnp.concatenate([pos] * batch, axis=0)                  # + positional embedding

    # ---- ln_pre ----
    x = _ln(x, lnpre_g_ref[...], lnpre_b_ref[...])

    # ---- transformer (residual attention blocks), statically unrolled ----
    for l in range(layers):
        # --- attention branch: x + out_proj(attn(ln_1(x))) ---
        y = _ln(x, ln1_g_ref[l], ln1_b_ref[l])
        qkv = jnp.dot(y, wqkv_ref[l], preferred_element_type=f32) + bqkv_ref[l]   # (B*S, 3D)
        q = qkv[:, 0:width] * scale
        k = qkv[:, width:2 * width]
        v = qkv[:, 2 * width:3 * width]

        batch_rows = []
        for b in range(batch):
            r0 = b * seq
            qb = q[r0:r0 + seq, :]
            kb = k[r0:r0 + seq, :]
            vb = v[r0:r0 + seq, :]
            head_out = []
            for h in range(HEADS):
                c0 = h * dh
                qh = qb[:, c0:c0 + dh]                              # (S, dh)
                kh = kb[:, c0:c0 + dh]
                vh = vb[:, c0:c0 + dh]
                # scores via dot_general contracting last axes (no K transpose)
                s = jnp.einsum('qd,kd->qk', qh, kh,
                               preferred_element_type=f32)          # (S, S)
                m = jnp.max(s, axis=-1, keepdims=True)
                p = jnp.exp(s - m)
                denom = jnp.sum(p, axis=-1, keepdims=True)
                p = p * pl.reciprocal(denom, approx=True)
                head_out.append(jnp.einsum('qk,kd->qd', p, vh,
                                           preferred_element_type=f32))
            batch_rows.append(jnp.concatenate(head_out, axis=-1))   # (S, D)
        attn = jnp.concatenate(batch_rows, axis=0)                  # (B*S, D)

        attn = jnp.dot(attn, wo_ref[l], preferred_element_type=f32) + bo_ref[l]
        x = x + attn                                                # fused residual add

        # --- MLP branch: x + fc2(QuickGELU(fc1(ln_2(x)))) ---
        y = _ln(x, ln2_g_ref[l], ln2_b_ref[l])
        h1 = jnp.dot(y, w1_ref[l], preferred_element_type=f32) + b1_ref[l]        # (B*S, MLP)
        h1 = h1 * jax.nn.sigmoid(1.702 * h1)                        # QuickGELU (f32)
        h2 = jnp.dot(h1, w2_ref[l], preferred_element_type=f32) + b2_ref[l]
        x = x + h2                                                  # fused residual add

    # ---- ln_post on all tokens except CLS ----
    out_rows = jnp.concatenate(
        [x[b * seq + 1:(b + 1) * seq, :] for b in range(batch)], axis=0)          # (B*P, D)
    out = _ln(out_rows, lnpost_g_ref[...], lnpost_b_ref[...])
    o_ref[...] = out.astype(o_ref.dtype)


def _full_spec(shape):
    nd = len(shape)
    return pl.BlockSpec(shape, lambda i, _nd=nd: (0,) * _nd)


# ------------------------- forward wrapper -------------------------

def vit_wrapper_forward(x, params):
    """Mirrors VisionTransformerWrapper.forward.  x: (B, C, H, W) NCHW."""
    B, C, H, W_img = x.shape
    ps = PATCH
    Hg, Wg = H // ps, W_img // ps
    P = Hg * Wg

    # conv1 (kernel=stride=patch, no bias) as patch-unfold; matmul is in-kernel.
    patches = (x.reshape(B, C, Hg, ps, Wg, ps)
                .transpose(0, 2, 4, 1, 3, 5)
                .reshape(B * P, C * ps * ps))
    conv_w = params['conv1_w'].reshape(WIDTH, C * ps * ps).T        # (C*ps*ps, WIDTH)

    args = (
        patches, conv_w,
        params['class_embedding'].reshape(1, WIDTH),
        params['positional_embedding'],
        params['ln_pre_g'].reshape(1, WIDTH), params['ln_pre_b'].reshape(1, WIDTH),
        params['ln_post_g'].reshape(1, WIDTH), params['ln_post_b'].reshape(1, WIDTH),
        params['ln1_g'].reshape(LAYERS, 1, WIDTH), params['ln1_b'].reshape(LAYERS, 1, WIDTH),
        params['ln2_g'].reshape(LAYERS, 1, WIDTH), params['ln2_b'].reshape(LAYERS, 1, WIDTH),
        params['in_proj_w'], params['in_proj_b'].reshape(LAYERS, 1, 3 * WIDTH),
        params['out_proj_w'], params['out_proj_b'].reshape(LAYERS, 1, WIDTH),
        params['fc1_w'], params['fc1_b'].reshape(LAYERS, 1, MLP_DIM),
        params['fc2_w'], params['fc2_b'].reshape(LAYERS, 1, WIDTH),
    )
    in_specs = [_full_spec(a.shape) for a in args]

    out = pl.pallas_call(
        _fused_vit_kernel,
        out_shape=jax.ShapeDtypeStruct((B * P, WIDTH), x.dtype),
        grid=(1,),
        in_specs=in_specs,
        out_specs=pl.BlockSpec((B * P, WIDTH), lambda i: (0, 0)),
        compiler_params=pltpu.CompilerParams(dimension_semantics=("arbitrary",)),
    )(*args)
    return out.reshape(B, P, WIDTH)


# ------------------------- deterministic params -------------------------

def init_params(key):
    keys = jax.random.split(key, 7)

    def nrm(k, shape, std=0.02):
        return (std * jax.random.normal(k, shape)).astype(DTYPE)

    return {
        'conv1_w': nrm(keys[0], (WIDTH, IN_CH, PATCH, PATCH)),
        'class_embedding': nrm(keys[1], (WIDTH,)),
        'positional_embedding': nrm(keys[2], (SEQ, WIDTH)),
        'ln_pre_g': jnp.ones((WIDTH,), DTYPE), 'ln_pre_b': jnp.zeros((WIDTH,), DTYPE),
        'ln_post_g': jnp.ones((WIDTH,), DTYPE), 'ln_post_b': jnp.zeros((WIDTH,), DTYPE),
        # per-layer params stacked along a leading LAYERS axis
        'ln1_g': jnp.ones((LAYERS, WIDTH), DTYPE), 'ln1_b': jnp.zeros((LAYERS, WIDTH), DTYPE),
        'ln2_g': jnp.ones((LAYERS, WIDTH), DTYPE), 'ln2_b': jnp.zeros((LAYERS, WIDTH), DTYPE),
        'in_proj_w': nrm(keys[3], (LAYERS, WIDTH, 3 * WIDTH)),      # stored (in, out)
        'in_proj_b': jnp.zeros((LAYERS, 3 * WIDTH), DTYPE),
        'out_proj_w': nrm(keys[4], (LAYERS, WIDTH, WIDTH)),
        'out_proj_b': jnp.zeros((LAYERS, WIDTH), DTYPE),
        'fc1_w': nrm(keys[5], (LAYERS, WIDTH, MLP_DIM)),
        'fc1_b': jnp.zeros((LAYERS, MLP_DIM), DTYPE),
        'fc2_w': nrm(keys[6], (LAYERS, MLP_DIM, WIDTH)),
        'fc2_b': jnp.zeros((LAYERS, WIDTH), DTYPE),
    }


if __name__ == "__main__":
    root = jax.random.PRNGKey(0)
    k_x, k_p = jax.random.split(root)
    x = jax.random.normal(k_x, (BATCH, IN_CH, IMG, IMG), dtype=DTYPE)   # NCHW, like PyTorch
    params = init_params(k_p)

    fwd = jax.jit(vit_wrapper_forward)
    out = fwd(x, params)
    jax.block_until_ready(out)

    assert out.shape == (BATCH, NUM_PATCHES, WIDTH), out.shape
    assert jnp.all(jnp.isfinite(out))
    print("KERNEL_OK")
</pallas_src>

<mosaic_0001>
module attributes {stable_mosaic.version = 11 : i64} {
  func.func @_fused_vit_kernel(%arg0: i32, %arg1: memref<8x192xf32, #tpu.memory_space<vmem>>, %arg2: memref<192x32xf32, #tpu.memory_space<vmem>>, %arg3: memref<1x32xf32, #tpu.memory_space<vmem>>, %arg4: memref<5x32xf32, #tpu.memory_space<vmem>>, %arg5: memref<1x32xf32, #tpu.memory_space<vmem>>, %arg6: memref<1x32xf32, #tpu.memory_space<vmem>>, %arg7: memref<1x32xf32, #tpu.memory_space<vmem>>, %arg8: memref<1x32xf32, #tpu.memory_space<vmem>>, %arg9: memref<2x1x32xf32, #tpu.memory_space<vmem>>, %arg10: memref<2x1x32xf32, #tpu.memory_space<vmem>>, %arg11: memref<2x1x32xf32, #tpu.memory_space<vmem>>, %arg12: memref<2x1x32xf32, #tpu.memory_space<vmem>>, %arg13: memref<2x32x96xf32, #tpu.memory_space<vmem>>, %arg14: memref<2x1x96xf32, #tpu.memory_space<vmem>>, %arg15: memref<2x32x32xf32, #tpu.memory_space<vmem>>, %arg16: memref<2x1x32xf32, #tpu.memory_space<vmem>>, %arg17: memref<2x32x128xf32, #tpu.memory_space<vmem>>, %arg18: memref<2x1x128xf32, #tpu.memory_space<vmem>>, %arg19: memref<2x128x32xf32, #tpu.memory_space<vmem>>, %arg20: memref<2x1x32xf32, #tpu.memory_space<vmem>>, %arg21: memref<8x32xf32, #tpu.memory_space<vmem>>) attributes {dimension_semantics = [#tpu.dimension_semantics<arbitrary>], iteration_bounds = array<i64: 1>, scalar_prefetch = 0 : i64, scratch_operands = 0 : i64, tpu.core_type = #tpu.core_type<tc>, window_params = [{pipeline_mode = #tpu.pipeline_mode<synchronous>, transform_indices = @transform_0, window_bounds = array<i64: 8, 192>}, {pipeline_mode = #tpu.pipeline_mode<synchronous>, transform_indices = @transform_1, window_bounds = array<i64: 192, 32>}, {pipeline_mode = #tpu.pipeline_mode<synchronous>, transform_indices = @transform_2, window_bounds = array<i64: 1, 32>}, {pipeline_mode = #tpu.pipeline_mode<synchronous>, transform_indices = @transform_3, window_bounds = array<i64: 5, 32>}, {pipeline_mode = #tpu.pipeline_mode<synchronous>, transform_indices = @transform_4, window_bounds = array<i64: 1, 32>}, {pipeline_mode = #tpu.pipeline_mode<synchronous>, transform_indices = @transform_5, window_bounds = array<i64: 1, 32>}, {pipeline_mode = #tpu.pipeline_mode<synchronous>, transform_indices = @transform_6, window_bounds = array<i64: 1, 32>}, {pipeline_mode = #tpu.pipeline_mode<synchronous>, transform_indices = @transform_7, window_bounds = array<i64: 1, 32>}, {pipeline_mode = #tpu.pipeline_mode<synchronous>, transform_indices = @transform_8, window_bounds = array<i64: 2, 1, 32>}, {pipeline_mode = #tpu.pipeline_mode<synchronous>, transform_indices = @transform_9, window_bounds = array<i64: 2, 1, 32>}, {pipeline_mode = #tpu.pipeline_mode<synchronous>, transform_indices = @transform_10, window_bounds = array<i64: 2, 1, 32>}, {pipeline_mode = #tpu.pipeline_mode<synchronous>, transform_indices = @transform_11, window_bounds = array<i64: 2, 1, 32>}, {pipeline_mode = #tpu.pipeline_mode<synchronous>, transform_indices = @transform_12, window_bounds = array<i64: 2, 32, 96>}, {pipeline_mode = #tpu.pipeline_mode<synchronous>, transform_indices = @transform_13, window_bounds = array<i64: 2, 1, 96>}, {pipeline_mode = #tpu.pipeline_mode<synchronous>, transform_indices = @transform_14, window_bounds = array<i64: 2, 32, 32>}, {pipeline_mode = #tpu.pipeline_mode<synchronous>, transform_indices = @transform_15, window_bounds = array<i64: 2, 1, 32>}, {pipeline_mode = #tpu.pipeline_mode<synchronous>, transform_indices = @transform_16, window_bounds = array<i64: 2, 32, 128>}, {pipeline_mode = #tpu.pipeline_mode<synchronous>, transform_indices = @transform_17, window_bounds = array<i64: 2, 1, 128>}, {pipeline_mode = #tpu.pipeline_mode<synchronous>, transform_indices = @transform_18, window_bounds = array<i64: 2, 128, 32>}, {pipeline_mode = #tpu.pipeline_mode<synchronous>, transform_indices = @transform_19, window_bounds = array<i64: 2, 1, 32>}, {pipeline_mode = #tpu.pipeline_mode<synchronous>, transform_indices = @transform_20, window_bounds = array<i64: 8, 32>}]} {
    %c0 = arith.constant 0 : index
    %c0_0 = arith.constant 0 : index
    %0 = vector.load %arg1[%c0, %c0_0] : memref<8x192xf32, #tpu.memory_space<vmem>>, vector<8x192xf32>
    %c0_1 = arith.constant 0 : index
    %c0_2 = arith.constant 0 : index
    %1 = vector.load %arg2[%c0_1, %c0_2] : memref<192x32xf32, #tpu.memory_space<vmem>>, vector<192x32xf32>
    %cst = arith.constant dense<0.000000e+00> : vector<8x32xf32>
    %2 = tpu.matmul %0, %1, %cst {dimension_numbers = #tpu.dot_dimension_numbers<[1], [0], [0], [1], [0, 0, 1, 1], [], []>} : vector<8x192xf32>, vector<192x32xf32>, vector<8x32xf32> -> vector<8x32xf32>
    %c0_3 = arith.constant 0 : index
    %c0_4 = arith.constant 0 : index
    %3 = vector.load %arg4[%c0_3, %c0_4] : memref<5x32xf32, #tpu.memory_space<vmem>>, vector<5x32xf32>
    %c0_5 = arith.constant 0 : index
    %c0_6 = arith.constant 0 : index
    %4 = vector.load %arg3[%c0_5, %c0_6] : memref<1x32xf32, #tpu.memory_space<vmem>>, vector<1x32xf32>
    %5 = vector.extract_strided_slice %2 {offsets = [0, 0], sizes = [4, 32], strides = [1, 1]} : vector<8x32xf32> to vector<4x32xf32>
    %6 = vector.extract_strided_slice %2 {offsets = [4, 0], sizes = [4, 32], strides = [1, 1]} : vector<8x32xf32> to vector<4x32xf32>
    %7 = tpu.concatenate %4, %5, %4, %6 in 0 : vector<1x32xf32>, vector<4x32xf32>, vector<1x32xf32>, vector<4x32xf32> -> vector<10x32xf32>
    %8 = tpu.concatenate %3, %3 in 0 : vector<5x32xf32>, vector<5x32xf32> -> vector<10x32xf32>
    %9 = arith.addf %7, %8 : vector<10x32xf32>
    %c0_7 = arith.constant 0 : index
    %c0_8 = arith.constant 0 : index
    %10 = vector.load %arg5[%c0_7, %c0_8] : memref<1x32xf32, #tpu.memory_space<vmem>>, vector<1x32xf32>
    %c0_9 = arith.constant 0 : index
    %c0_10 = arith.constant 0 : index
    %11 = vector.load %arg6[%c0_9, %c0_10] : memref<1x32xf32, #tpu.memory_space<vmem>>, vector<1x32xf32>
    %cst_11 = arith.constant dense<0.000000e+00> : vector<10xf32>
    %12 = vector.multi_reduction <add>, %9, %cst_11 [1] : vector<10x32xf32> to vector<10xf32>
    %13 = vector.shape_cast %12 : vector<10xf32> to vector<10x1xf32>
    %cst_12 = arith.constant 3.200000e+01 : f32
    %14 = vector.broadcast %cst_12 : f32 to vector<10x1xf32>
    %15 = arith.divf %13, %14 : vector<10x1xf32>
    %16 = vector.broadcast %15 : vector<10x1xf32> to vector<10x32xf32>
    %17 = arith.subf %9, %16 : vector<10x32xf32>
    %18 = arith.mulf %17, %17 : vector<10x32xf32>
    %cst_13 = arith.constant dense<0.000000e+00> : vector<10xf32>
    %19 = vector.multi_reduction <add>, %18, %cst_13 [1] : vector<10x32xf32> to vector<10xf32>
    %20 = vector.shape_cast %19 : vector<10xf32> to vector<10x1xf32>
    %cst_14 = arith.constant 3.200000e+01 : f32
    %21 = vector.broadcast %cst_14 : f32 to vector<10x1xf32>
    %22 = arith.divf %20, %21 : vector<10x1xf32>
    %23 = vector.broadcast %15 : vector<10x1xf32> to vector<10x32xf32>
    %24 = arith.subf %9, %23 : vector<10x32xf32>
    %cst_15 = arith.constant 9.99999974E-6 : f32
    %25 = vector.broadcast %cst_15 : f32 to vector<10x1xf32>
    %26 = arith.addf %22, %25 : vector<10x1xf32>
    %27 = math.rsqrt %26 : vector<10x1xf32>
    %28 = vector.broadcast %27 : vector<10x1xf32> to vector<10x32xf32>
    %29 = arith.mulf %24, %28 : vector<10x32xf32>
    %30 = vector.broadcast %10 : vector<1x32xf32> to vector<10x32xf32>
    %31 = arith.mulf %29, %30 : vector<10x32xf32>
    %32 = vector.broadcast %11 : vector<1x32xf32> to vector<10x32xf32>
    %33 = arith.addf %31, %32 : vector<10x32xf32>
    %c0_16 = arith.constant 0 : index
    %c0_17 = arith.constant 0 : index
    %c0_18 = arith.constant 0 : index
    %34 = vector.load %arg9[%c0_16, %c0_17, %c0_18] : memref<2x1x32xf32, #tpu.memory_space<vmem>>, vector<1x1x32xf32>
    %35 = vector.shape_cast %34 : vector<1x1x32xf32> to vector<1x32xf32>
    %c0_19 = arith.constant 0 : index
    %c0_20 = arith.constant 0 : index
    %c0_21 = arith.constant 0 : index
    %36 = vector.load %arg10[%c0_19, %c0_20, %c0_21] : memref<2x1x32xf32, #tpu.memory_space<vmem>>, vector<1x1x32xf32>
    %37 = vector.shape_cast %36 : vector<1x1x32xf32> to vector<1x32xf32>
    %cst_22 = arith.constant dense<0.000000e+00> : vector<10xf32>
    %38 = vector.multi_reduction <add>, %33, %cst_22 [1] : vector<10x32xf32> to vector<10xf32>
    %39 = vector.shape_cast %38 : vector<10xf32> to vector<10x1xf32>
    %cst_23 = arith.constant 3.200000e+01 : f32
    %40 = vector.broadcast %cst_23 : f32 to vector<10x1xf32>
    %41 = arith.divf %39, %40 : vector<10x1xf32>
    %42 = vector.broadcast %41 : vector<10x1xf32> to vector<10x32xf32>
    %43 = arith.subf %33, %42 : vector<10x32xf32>
    %44 = arith.mulf %43, %43 : vector<10x32xf32>
    %cst_24 = arith.constant dense<0.000000e+00> : vector<10xf32>
    %45 = vector.multi_reduction <add>, %44, %cst_24 [1] : vector<10x32xf32> to vector<10xf32>
    %46 = vector.shape_cast %45 : vector<10xf32> to vector<10x1xf32>
    %cst_25 = arith.constant 3.200000e+01 : f32
    %47 = vector.broadcast %cst_25 : f32 to vector<10x1xf32>
    %48 = arith.divf %46, %47 : vector<10x1xf32>
    %49 = vector.broadcast %41 : vector<10x1xf32> to vector<10x32xf32>
    %50 = arith.subf %33, %49 : vector<10x32xf32>
    %cst_26 = arith.constant 9.99999974E-6 : f32
    %51 = vector.broadcast %cst_26 : f32 to vector<10x1xf32>
    %52 = arith.addf %48, %51 : vector<10x1xf32>
    %53 = math.rsqrt %52 : vector<10x1xf32>
    %54 = vector.broadcast %53 : vector<10x1xf32> to vector<10x32xf32>
    %55 = arith.mulf %50, %54 : vector<10x32xf32>
    %56 = vector.broadcast %35 : vector<1x32xf32> to vector<10x32xf32>
    %57 = arith.mulf %55, %56 : vector<10x32xf32>
    %58 = vector.broadcast %37 : vector<1x32xf32> to vector<10x32xf32>
    %59 = arith.addf %57, %58 : vector<10x32xf32>
    %c0_27 = arith.constant 0 : index
    %c0_28 = arith.constant 0 : index
    %c0_29 = arith.constant 0 : index
    %60 = vector.load %arg13[%c0_27, %c0_28, %c0_29] : memref<2x32x96xf32, #tpu.memory_space<vmem>>, vector<1x32x96xf32>
    %61 = vector.shape_cast %60 : vector<1x32x96xf32> to vector<32x96xf32>
    %cst_30 = arith.constant dense<0.000000e+00> : vector<10x96xf32>
    %62 = tpu.matmul %59, %61, %cst_30 {dimension_numbers = #tpu.dot_dimension_numbers<[1], [0], [0], [1], [0, 0, 1, 1], [], []>} : vector<10x32xf32>, vector<32x96xf32>, vector<10x96xf32> -> vector<10x96xf32>
    %c0_31 = arith.constant 0 : index
    %c0_32 = arith.constant 0 : index
    %c0_33 = arith.constant 0 : index
    %63 = vector.load %arg14[%c0_31, %c0_32, %c0_33] : memref<2x1x96xf32, #tpu.memory_space<vmem>>, vector<1x1x96xf32>
    %64 = vector.shape_cast %63 : vector<1x1x96xf32> to vector<1x96xf32>
    %65 = vector.broadcast %64 : vector<1x96xf32> to vector<10x96xf32>
    %66 = arith.addf %62, %65 : vector<10x96xf32>
    %67 = vector.extract_strided_slice %66 {offsets = [0, 0], sizes = [10, 32], strides = [1, 1]} : vector<10x96xf32> to vector<10x32xf32>
    %cst_34 = arith.constant 0.353553385 : f32
    %68 = vector.broadcast %cst_34 : f32 to vector<10x32xf32>
    %69 = arith.mulf %67, %68 : vector<10x32xf32>
    %70 = vector.extract_strided_slice %66 {offsets = [0, 32], sizes = [10, 32], strides = [1, 1]} : vector<10x96xf32> to vector<10x32xf32>
    %71 = vector.extract_strided_slice %66 {offsets = [0, 64], sizes = [10, 32], strides = [1, 1]} : vector<10x96xf32> to vector<10x32xf32>
    %72 = vector.extract_strided_slice %69 {offsets = [0, 0], sizes = [5, 32], strides = [1, 1]} : vector<10x32xf32> to vector<5x32xf32>
    %73 = vector.extract_strided_slice %70 {offsets = [0, 0], sizes = [5, 32], strides = [1, 1]} : vector<10x32xf32> to vector<5x32xf32>
    %74 = vector.extract_strided_slice %71 {offsets = [0, 0], sizes = [5, 32], strides = [1, 1]} : vector<10x32xf32> to vector<5x32xf32>
    %75 = vector.extract_strided_slice %72 {offsets = [0, 0], sizes = [5, 8], strides = [1, 1]} : vector<5x32xf32> to vector<5x8xf32>
    %76 = vector.extract_strided_slice %73 {offsets = [0, 0], sizes = [5, 8], strides = [1, 1]} : vector<5x32xf32> to vector<5x8xf32>
    %77 = vector.extract_strided_slice %74 {offsets = [0, 0], sizes = [5, 8], strides = [1, 1]} : vector<5x32xf32> to vector<5x8xf32>
    "tpu.trace_start"() <{level = 10 : i32, message = "qd,kd->qk"}> : () -> ()
    %cst_35 = arith.constant dense<0.000000e+00> : vector<5x5xf32>
    %78 = tpu.matmul %75, %76, %cst_35 {dimension_numbers = #tpu.dot_dimension_numbers<[1], [1], [0], [0], [0, 0, 1, 0], [], []>} : vector<5x8xf32>, vector<5x8xf32>, vector<5x5xf32> -> vector<5x5xf32>
    "tpu.trace_stop"() : () -> ()
    %cst_36 = arith.constant dense<0xFF800000> : vector<5xf32>
    %79 = vector.multi_reduction <maximumf>, %78, %cst_36 [1] : vector<5x5xf32> to vector<5xf32>
    %80 = vector.shape_cast %79 : vector<5xf32> to vector<5x1xf32>
    %81 = vector.broadcast %80 : vector<5x1xf32> to vector<5x5xf32>
    %82 = arith.subf %78, %81 : vector<5x5xf32>
    %83 = math.exp %82 : vector<5x5xf32>
    %cst_37 = arith.constant dense<0.000000e+00> : vector<5xf32>
    %84 = vector.multi_reduction <add>, %83, %cst_37 [1] : vector<5x5xf32> to vector<5xf32>
    %85 = vector.shape_cast %84 : vector<5xf32> to vector<5x1xf32>
    %86 = tpu.reciprocal %85 {approx = true} : vector<5x1xf32> -> vector<5x1xf32>
    %87 = vector.broadcast %86 : vector<5x1xf32> to vector<5x5xf32>
    %88 = arith.mulf %83, %87 : vector<5x5xf32>
    "tpu.trace_start"() <{level = 10 : i32, message = "qk,kd->qd"}> : () -> ()
    %cst_38 = arith.constant dense<0.000000e+00> : vector<5x8xf32>
    %89 = tpu.matmul %88, %77, %cst_38 {dimension_numbers = #tpu.dot_dimension_numbers<[1], [0], [0], [1], [0, 0, 1, 1], [], []>} : vector<5x5xf32>, vector<5x8xf32>, vector<5x8xf32> -> vector<5x8xf32>
    "tpu.trace_stop"() : () -> ()
    %90 = vector.extract_strided_slice %72 {offsets = [0, 8], sizes = [5, 8], strides = [1, 1]} : vector<5x32xf32> to vector<5x8xf32>
    %91 = vector.extract_strided_slice %73 {offsets = [0, 8], sizes = [5, 8], strides = [1, 1]} : vector<5x32xf32> to vector<5x8xf32>
    %92 = vector.extract_strided_slice %74 {offsets = [0, 8], sizes = [5, 8], strides = [1, 1]} : vector<5x32xf32> to vector<5x8xf32>
    "tpu.trace_start"() <{level = 10 : i32, message = "qd,kd->qk"}> : () -> ()
    %cst_39 = arith.constant dense<0.000000e+00> : vector<5x5xf32>
    %93 = tpu.matmul %90, %91, %cst_39 {dimension_numbers = #tpu.dot_dimension_numbers<[1], [1], [0], [0], [0, 0, 1, 0], [], []>} : vector<5x8xf32>, vector<5x8xf32>, vector<5x5xf32> -> vector<5x5xf32>
    "tpu.trace_stop"() : () -> ()
    %cst_40 = arith.constant dense<0xFF800000> : vector<5xf32>
    %94 = vector.multi_reduction <maximumf>, %93, %cst_40 [1] : vector<5x5xf32> to vector<5xf32>
    %95 = vector.shape_cast %94 : vector<5xf32> to vector<5x1xf32>
    %96 = vector.broadcast %95 : vector<5x1xf32> to vector<5x5xf32>
    %97 = arith.subf %93, %96 : vector<5x5xf32>
    %98 = math.exp %97 : vector<5x5xf32>
    %cst_41 = arith.constant dense<0.000000e+00> : vector<5xf32>
    %99 = vector.multi_reduction <add>, %98, %cst_41 [1] : vector<5x5xf32> to vector<5xf32>
    %100 = vector.shape_cast %99 : vector<5xf32> to vector<5x1xf32>
    %101 = tpu.reciprocal %100 {approx = true} : vector<5x1xf32> -> vector<5x1xf32>
    %102 = vector.broadcast %101 : vector<5x1xf32> to vector<5x5xf32>
    %103 = arith.mulf %98, %102 : vector<5x5xf32>
    "tpu.trace_start"() <{level = 10 : i32, message = "qk,kd->qd"}> : () -> ()
    %cst_42 = arith.constant dense<0.000000e+00> : vector<5x8xf32>
    %104 = tpu.matmul %103, %92, %cst_42 {dimension_numbers = #tpu.dot_dimension_numbers<[1], [0], [0], [1], [0, 0, 1, 1], [], []>} : vector<5x5xf32>, vector<5x8xf32>, vector<5x8xf32> -> vector<5x8xf32>
    "tpu.trace_stop"() : () -> ()
    %105 = vector.extract_strided_slice %72 {offsets = [0, 16], sizes = [5, 8], strides = [1, 1]} : vector<5x32xf32> to vector<5x8xf32>
    %106 = vector.extract_strided_slice %73 {offsets = [0, 16], sizes = [5, 8], strides = [1, 1]} : vector<5x32xf32> to vector<5x8xf32>
    %107 = vector.extract_strided_slice %74 {offsets = [0, 16], sizes = [5, 8], strides = [1, 1]} : vector<5x32xf32> to vector<5x8xf32>
    "tpu.trace_start"() <{level = 10 : i32, message = "qd,kd->qk"}> : () -> ()
    %cst_43 = arith.constant dense<0.000000e+00> : vector<5x5xf32>
    %108 = tpu.matmul %105, %106, %cst_43 {dimension_numbers = #tpu.dot_dimension_numbers<[1], [1], [0], [0], [0, 0, 1, 0], [], []>} : vector<5x8xf32>, vector<5x8xf32>, vector<5x5xf32> -> vector<5x5xf32>
    "tpu.trace_stop"() : () -> ()
    %cst_44 = arith.constant dense<0xFF800000> : vector<5xf32>
    %109 = vector.multi_reduction <maximumf>, %108, %cst_44 [1] : vector<5x5xf32> to vector<5xf32>
    %110 = vector.shape_cast %109 : vector<5xf32> to vector<5x1xf32>
    %111 = vector.broadcast %110 : vector<5x1xf32> to vector<5x5xf32>
    %112 = arith.subf %108, %111 : vector<5x5xf32>
    %113 = math.exp %112 : vector<5x5xf32>
    %cst_45 = arith.constant dense<0.000000e+00> : vector<5xf32>
    %114 = vector.multi_reduction <add>, %113, %cst_45 [1] : vector<5x5xf32> to vector<5xf32>
    %115 = vector.shape_cast %114 : vector<5xf32> to vector<5x1xf32>
    %116 = tpu.reciprocal %115 {approx = true} : vector<5x1xf32> -> vector<5x1xf32>
    %117 = vector.broadcast %116 : vector<5x1xf32> to vector<5x5xf32>
    %118 = arith.mulf %113, %117 : vector<5x5xf32>
    "tpu.trace_start"() <{level = 10 : i32, message = "qk,kd->qd"}> : () -> ()
    %cst_46 = arith.constant dense<0.000000e+00> : vector<5x8xf32>
    %119 = tpu.matmul %118, %107, %cst_46 {dimension_numbers = #tpu.dot_dimension_numbers<[1], [0], [0], [1], [0, 0, 1, 1], [], []>} : vector<5x5xf32>, vector<5x8xf32>, vector<5x8xf32> -> vector<5x8xf32>
    "tpu.trace_stop"() : () -> ()
    %120 = vector.extract_strided_slice %72 {offsets = [0, 24], sizes = [5, 8], strides = [1, 1]} : vector<5x32xf32> to vector<5x8xf32>
    %121 = vector.extract_strided_slice %73 {offsets = [0, 24], sizes = [5, 8], strides = [1, 1]} : vector<5x32xf32> to vector<5x8xf32>
    %122 = vector.extract_strided_slice %74 {offsets = [0, 24], sizes = [5, 8], strides = [1, 1]} : vector<5x32xf32> to vector<5x8xf32>
    "tpu.trace_start"() <{level = 10 : i32, message = "qd,kd->qk"}> : () -> ()
    %cst_47 = arith.constant dense<0.000000e+00> : vector<5x5xf32>
    %123 = tpu.matmul %120, %121, %cst_47 {dimension_numbers = #tpu.dot_dimension_numbers<[1], [1], [0], [0], [0, 0, 1, 0], [], []>} : vector<5x8xf32>, vector<5x8xf32>, vector<5x5xf32> -> vector<5x5xf32>
    "tpu.trace_stop"() : () -> ()
    %cst_48 = arith.constant dense<0xFF800000> : vector<5xf32>
    %124 = vector.multi_reduction <maximumf>, %123, %cst_48 [1] : vector<5x5xf32> to vector<5xf32>
    %125 = vector.shape_cast %124 : vector<5xf32> to vector<5x1xf32>
    %126 = vector.broadcast %125 : vector<5x1xf32> to vector<5x5xf32>
    %127 = arith.subf %123, %126 : vector<5x5xf32>
    %128 = math.exp %127 : vector<5x5xf32>
    %cst_49 = arith.constant dense<0.000000e+00> : vector<5xf32>
    %129 = vector.multi_reduction <add>, %128, %cst_49 [1] : vector<5x5xf32> to vector<5xf32>
    %130 = vector.shape_cast %129 : vector<5xf32> to vector<5x1xf32>
    %131 = tpu.reciprocal %130 {approx = true} : vector<5x1xf32> -> vector<5x1xf32>
    %132 = vector.broadcast %131 : vector<5x1xf32> to vector<5x5xf32>
    %133 = arith.mulf %128, %132 : vector<5x5xf32>
    "tpu.trace_start"() <{level = 10 : i32, message = "qk,kd->qd"}> : () -> ()
    %cst_50 = arith.constant dense<0.000000e+00> : vector<5x8xf32>
    %134 = tpu.matmul %133, %122, %cst_50 {dimension_numbers = #tpu.dot_dimension_numbers<[1], [0], [0], [1], [0, 0, 1, 1], [], []>} : vector<5x5xf32>, vector<5x8xf32>, vector<5x8xf32> -> vector<5x8xf32>
    "tpu.trace_stop"() : () -> ()
    %135 = tpu.concatenate %89, %104, %119, %134 in 1 : vector<5x8xf32>, vector<5x8xf32>, vector<5x8xf32>, vector<5x8xf32> -> vector<5x32xf32>
    %136 = vector.extract_strided_slice %69 {offsets = [5, 0], sizes = [5, 32], strides = [1, 1]} : vector<10x32xf32> to vector<5x32xf32>
    %137 = vector.extract_strided_slice %70 {offsets = [5, 0], sizes = [5, 32], strides = [1, 1]} : vector<10x32xf32> to vector<5x32xf32>
    %138 = vector.extract_strided_slice %71 {offsets = [5, 0], sizes = [5, 32], strides = [1, 1]} : vector<10x32xf32> to vector<5x32xf32>
    %139 = vector.extract_strided_slice %136 {offsets = [0, 0], sizes = [5, 8], strides = [1, 1]} : vector<5x32xf32> to vector<5x8xf32>
    %140 = vector.extract_strided_slice %137 {offsets = [0, 0], sizes = [5, 8], strides = [1, 1]} : vector<5x32xf32> to vector<5x8xf32>
    %141 = vector.extract_strided_slice %138 {offsets = [0, 0], sizes = [5, 8], strides = [1, 1]} : vector<5x32xf32> to vector<5x8xf32>
    "tpu.trace_start"() <{level = 10 : i32, message = "qd,kd->qk"}> : () -> ()
    %cst_51 = arith.constant dense<0.000000e+00> : vector<5x5xf32>
    %142 = tpu.matmul %139, %140, %cst_51 {dimension_numbers = #tpu.dot_dimension_numbers<[1], [1], [0], [0], [0, 0, 1, 0], [], []>} : vector<5x8xf32>, vector<5x8xf32>, vector<5x5xf32> -> vector<5x5xf32>
    "tpu.trace_stop"() : () -> ()
    %cst_52 = arith.constant dense<0xFF800000> : vector<5xf32>
    %143 = vector.multi_reduction <maximumf>, %142, %cst_52 [1] : vector<5x5xf32> to vector<5xf32>
    %144 = vector.shape_cast %143 : vector<5xf32> to vector<5x1xf32>
    %145 = vector.broadcast %144 : vector<5x1xf32> to vector<5x5xf32>
    %146 = arith.subf %142, %145 : vector<5x5xf32>
    %147 = math.exp %146 : vector<5x5xf32>
    %cst_53 = arith.constant dense<0.000000e+00> : vector<5xf32>
    %148 = vector.multi_reduction <add>, %147, %cst_53 [1] : vector<5x5xf32> to vector<5xf32>
    %149 = vector.shape_cast %148 : vector<5xf32> to vector<5x1xf32>
    %150 = tpu.reciprocal %149 {approx = true} : vector<5x1xf32> -> vector<5x1xf32>
    %151 = vector.broadcast %150 : vector<5x1xf32> to vector<5x5xf32>
    %152 = arith.mulf %147, %151 : vector<5x5xf32>
    "tpu.trace_start"() <{level = 10 : i32, message = "qk,kd->qd"}> : () -> ()
    %cst_54 = arith.constant dense<0.000000e+00> : vector<5x8xf32>
    %153 = tpu.matmul %152, %141, %cst_54 {dimension_numbers = #tpu.dot_dimension_numbers<[1], [0], [0], [1], [0, 0, 1, 1], [], []>} : vector<5x5xf32>, vector<5x8xf32>, vector<5x8xf32> -> vector<5x8xf32>
    "tpu.trace_stop"() : () -> ()
    %154 = vector.extract_strided_slice %136 {offsets = [0, 8], sizes = [5, 8], strides = [1, 1]} : vector<5x32xf32> to vector<5x8xf32>
    %155 = vector.extract_strided_slice %137 {offsets = [0, 8], sizes = [5, 8], strides = [1, 1]} : vector<5x32xf32> to vector<5x8xf32>
    %156 = vector.extract_strided_slice %138 {offsets = [0, 8], sizes = [5, 8], strides = [1, 1]} : vector<5x32xf32> to vector<5x8xf32>
    "tpu.trace_start"() <{level = 10 : i32, message = "qd,kd->qk"}> : () -> ()
    %cst_55 = arith.constant dense<0.000000e+00> : vector<5x5xf32>
    %157 = tpu.matmul %154, %155, %cst_55 {dimension_numbers = #tpu.dot_dimension_numbers<[1], [1], [0], [0], [0, 0, 1, 0], [], []>} : vector<5x8xf32>, vector<5x8xf32>, vector<5x5xf32> -> vector<5x5xf32>
    "tpu.trace_stop"() : () -> ()
    %cst_56 = arith.constant dense<0xFF800000> : vector<5xf32>
    %158 = vector.multi_reduction <maximumf>, %157, %cst_56 [1] : vector<5x5xf32> to vector<5xf32>
    %159 = vector.shape_cast %158 : vector<5xf32> to vector<5x1xf32>
    %160 = vector.broadcast %159 : vector<5x1xf32> to vector<5x5xf32>
    %161 = arith.subf %157, %160 : vector<5x5xf32>
    %162 = math.exp %161 : vector<5x5xf32>
    %cst_57 = arith.constant dense<0.000000e+00> : vector<5xf32>
    %163 = vector.multi_reduction <add>, %162, %cst_57 [1] : vector<5x5xf32> to vector<5xf32>
    %164 = vector.shape_cast %163 : vector<5xf32> to vector<5x1xf32>
    %165 = tpu.reciprocal %164 {approx = true} : vector<5x1xf32> -> vector<5x1xf32>
    %166 = vector.broadcast %165 : vector<5x1xf32> to vector<5x5xf32>
    %167 = arith.mulf %162, %166 : vector<5x5xf32>
    "tpu.trace_start"() <{level = 10 : i32, message = "qk,kd->qd"}> : () -> ()
    %cst_58 = arith.constant dense<0.000000e+00> : vector<5x8xf32>
    %168 = tpu.matmul %167, %156, %cst_58 {dimension_numbers = #tpu.dot_dimension_numbers<[1], [0], [0], [1], [0, 0, 1, 1], [], []>} : vector<5x5xf32>, vector<5x8xf32>, vector<5x8xf32> -> vector<5x8xf32>
    "tpu.trace_stop"() : () -> ()
    %169 = vector.extract_strided_slice %136 {offsets = [0, 16], sizes = [5, 8], strides = [1, 1]} : vector<5x32xf32> to vector<5x8xf32>
    %170 = vector.extract_strided_slice %137 {offsets = [0, 16], sizes = [5, 8], strides = [1, 1]} : vector<5x32xf32> to vector<5x8xf32>
    %171 = vector.extract_strided_slice %138 {offsets = [0, 16], sizes = [5, 8], strides = [1, 1]} : vector<5x32xf32> to vector<5x8xf32>
    "tpu.trace_start"() <{level = 10 : i32, message = "qd,kd->qk"}> : () -> ()
    %cst_59 = arith.constant dense<0.000000e+00> : vector<5x5xf32>
    %172 = tpu.matmul %169, %170, %cst_59 {dimension_numbers = #tpu.dot_dimension_numbers<[1], [1], [0], [0], [0, 0, 1, 0], [], []>} : vector<5x8xf32>, vector<5x8xf32>, vector<5x5xf32> -> vector<5x5xf32>
    "tpu.trace_stop"() : () -> ()
    %cst_60 = arith.constant dense<0xFF800000> : vector<5xf32>
    %173 = vector.multi_reduction <maximumf>, %172, %cst_60 [1] : vector<5x5xf32> to vector<5xf32>
    %174 = vector.shape_cast %173 : vector<5xf32> to vector<5x1xf32>
    %175 = vector.broadcast %174 : vector<5x1xf32> to vector<5x5xf32>
    %176 = arith.subf %172, %175 : vector<5x5xf32>
    %177 = math.exp %176 : vector<5x5xf32>
    %cst_61 = arith.constant dense<0.000000e+00> : vector<5xf32>
    %178 = vector.multi_reduction <add>, %177, %cst_61 [1] : vector<5x5xf32> to vector<5xf32>
    %179 = vector.shape_cast %178 : vector<5xf32> to vector<5x1xf32>
    %180 = tpu.reciprocal %179 {approx = true} : vector<5x1xf32> -> vector<5x1xf32>
    %181 = vector.broadcast %180 : vector<5x1xf32> to vector<5x5xf32>
    %182 = arith.mulf %177, %181 : vector<5x5xf32>
    "tpu.trace_start"() <{level = 10 : i32, message = "qk,kd->qd"}> : () -> ()
    %cst_62 = arith.constant dense<0.000000e+00> : vector<5x8xf32>
    %183 = tpu.matmul %182, %171, %cst_62 {dimension_numbers = #tpu.dot_dimension_numbers<[1], [0], [0], [1], [0, 0, 1, 1], [], []>} : vector<5x5xf32>, vector<5x8xf32>, vector<5x8xf32> -> vector<5x8xf32>
    "tpu.trace_stop"() : () -> ()
    %184 = vector.extract_strided_slice %136 {offsets = [0, 24], sizes = [5, 8], strides = [1, 1]} : vector<5x32xf32> to vector<5x8xf32>
    %185 = vector.extract_strided_slice %137 {offsets = [0, 24], sizes = [5, 8], strides = [1, 1]} : vector<5x32xf32> to vector<5x8xf32>
    %186 = vector.extract_strided_slice %138 {offsets = [0, 24], sizes = [5, 8], strides = [1, 1]} : vector<5x32xf32> to vector<5x8xf32>
    "tpu.trace_start"() <{level = 10 : i32, message = "qd,kd->qk"}> : () -> ()
    %cst_63 = arith.constant dense<0.000000e+00> : vector<5x5xf32>
    %187 = tpu.matmul %184, %185, %cst_63 {dimension_numbers = #tpu.dot_dimension_numbers<[1], [1], [0], [0], [0, 0, 1, 0], [], []>} : vector<5x8xf32>, vector<5x8xf32>, vector<5x5xf32> -> vector<5x5xf32>
    "tpu.trace_stop"() : () -> ()
    %cst_64 = arith.constant dense<0xFF800000> : vector<5xf32>
    %188 = vector.multi_reduction <maximumf>, %187, %cst_64 [1] : vector<5x5xf32> to vector<5xf32>
    %189 = vector.shape_cast %188 : vector<5xf32> to vector<5x1xf32>
    %190 = vector.broadcast %189 : vector<5x1xf32> to vector<5x5xf32>
    %191 = arith.subf %187, %190 : vector<5x5xf32>
    %192 = math.exp %191 : vector<5x5xf32>
    %cst_65 = arith.constant dense<0.000000e+00> : vector<5xf32>
    %193 = vector.multi_reduction <add>, %192, %cst_65 [1] : vector<5x5xf32> to vector<5xf32>
    %194 = vector.shape_cast %193 : vector<5xf32> to vector<5x1xf32>
    %195 = tpu.reciprocal %194 {approx = true} : vector<5x1xf32> -> vector<5x1xf32>
    %196 = vector.broadcast %195 : vector<5x1xf32> to vector<5x5xf32>
    %197 = arith.mulf %192, %196 : vector<5x5xf32>
    "tpu.trace_start"() <{level = 10 : i32, message = "qk,kd->qd"}> : () -> ()
    %cst_66 = arith.constant dense<0.000000e+00> : vector<5x8xf32>
    %198 = tpu.matmul %197, %186, %cst_66 {dimension_numbers = #tpu.dot_dimension_numbers<[1], [0], [0], [1], [0, 0, 1, 1], [], []>} : vector<5x5xf32>, vector<5x8xf32>, vector<5x8xf32> -> vector<5x8xf32>
    "tpu.trace_stop"() : () -> ()
    %199 = tpu.concatenate %153, %168, %183, %198 in 1 : vector<5x8xf32>, vector<5x8xf32>, vector<5x8xf32>, vector<5x8xf32> -> vector<5x32xf32>
    %200 = tpu.concatenate %135, %199 in 0 : vector<5x32xf32>, vector<5x32xf32> -> vector<10x32xf32>
    %c0_67 = arith.constant 0 : index
    %c0_68 = arith.constant 0 : index
    %c0_69 = arith.constant 0 : index
    %201 = vector.load %arg15[%c0_67, %c0_68, %c0_69] : memref<2x32x32xf32, #tpu.memory_space<vmem>>, vector<1x32x32xf32>
    %202 = vector.shape_cast %201 : vector<1x32x32xf32> to vector<32x32xf32>
    %cst_70 = arith.constant dense<0.000000e+00> : vector<10x32xf32>
    %203 = tpu.matmul %200, %202, %cst_70 {dimension_numbers = #tpu.dot_dimension_numbers<[1], [0], [0], [1], [0, 0, 1, 1], [], []>} : vector<10x32xf32>, vector<32x32xf32>, vector<10x32xf32> -> vector<10x32xf32>
    %c0_71 = arith.constant 0 : index
    %c0_72 = arith.constant 0 : index
    %c0_73 = arith.constant 0 : index
    %204 = vector.load %arg16[%c0_71, %c0_72, %c0_73] : memref<2x1x32xf32, #tpu.memory_space<vmem>>, vector<1x1x32xf32>
    %205 = vector.shape_cast %204 : vector<1x1x32xf32> to vector<1x32xf32>
    %206 = vector.broadcast %205 : vector<1x32xf32> to vector<10x32xf32>
    %207 = arith.addf %203, %206 : vector<10x32xf32>
    %208 = arith.addf %33, %207 : vector<10x32xf32>
    %c0_74 = arith.constant 0 : index
    %c0_75 = arith.constant 0 : index
    %c0_76 = arith.constant 0 : index
    %209 = vector.load %arg11[%c0_74, %c0_75, %c0_76] : memref<2x1x32xf32, #tpu.memory_space<vmem>>, vector<1x1x32xf32>
    %210 = vector.shape_cast %209 : vector<1x1x32xf32> to vector<1x32xf32>
    %c0_77 = arith.constant 0 : index
    %c0_78 = arith.constant 0 : index
    %c0_79 = arith.constant 0 : index
    %211 = vector.load %arg12[%c0_77, %c0_78, %c0_79] : memref<2x1x32xf32, #tpu.memory_space<vmem>>, vector<1x1x32xf32>
    %212 = vector.shape_cast %211 : vector<1x1x32xf32> to vector<1x32xf32>
    %cst_80 = arith.constant dense<0.000000e+00> : vector<10xf32>
    %213 = vector.multi_reduction <add>, %208, %cst_80 [1] : vector<10x32xf32> to vector<10xf32>
    %214 = vector.shape_cast %213 : vector<10xf32> to vector<10x1xf32>
    %cst_81 = arith.constant 3.200000e+01 : f32
    %215 = vector.broadcast %cst_81 : f32 to vector<10x1xf32>
    %216 = arith.divf %214, %215 : vector<10x1xf32>
    %217 = vector.broadcast %216 : vector<10x1xf32> to vector<10x32xf32>
    %218 = arith.subf %208, %217 : vector<10x32xf32>
    %219 = arith.mulf %218, %218 : vector<10x32xf32>
    %cst_82 = arith.constant dense<0.000000e+00> : vector<10xf32>
    %220 = vector.multi_reduction <add>, %219, %cst_82 [1] : vector<10x32xf32> to vector<10xf32>
    %221 = vector.shape_cast %220 : vector<10xf32> to vector<10x1xf32>
    %cst_83 = arith.constant 3.200000e+01 : f32
    %222 = vector.broadcast %cst_83 : f32 to vector<10x1xf32>
    %223 = arith.divf %221, %222 : vector<10x1xf32>
    %224 = vector.broadcast %216 : vector<10x1xf32> to vector<10x32xf32>
    %225 = arith.subf %208, %224 : vector<10x32xf32>
    %cst_84 = arith.constant 9.99999974E-6 : f32
    %226 = vector.broadcast %cst_84 : f32 to vector<10x1xf32>
    %227 = arith.addf %223, %226 : vector<10x1xf32>
    %228 = math.rsqrt %227 : vector<10x1xf32>
    %229 = vector.broadcast %228 : vector<10x1xf32> to vector<10x32xf32>
    %230 = arith.mulf %225, %229 : vector<10x32xf32>
    %231 = vector.broadcast %210 : vector<1x32xf32> to vector<10x32xf32>
    %232 = arith.mulf %230, %231 : vector<10x32xf32>
    %233 = vector.broadcast %212 : vector<1x32xf32> to vector<10x32xf32>
    %234 = arith.addf %232, %233 : vector<10x32xf32>
    %c0_85 = arith.constant 0 : index
    %c0_86 = arith.constant 0 : index
    %c0_87 = arith.constant 0 : index
    %235 = vector.load %arg17[%c0_85, %c0_86, %c0_87] : memref<2x32x128xf32, #tpu.memory_space<vmem>>, vector<1x32x128xf32>
    %236 = vector.shape_cast %235 : vector<1x32x128xf32> to vector<32x128xf32>
    %cst_88 = arith.constant dense<0.000000e+00> : vector<10x128xf32>
    %237 = tpu.matmul %234, %236, %cst_88 {dimension_numbers = #tpu.dot_dimension_numbers<[1], [0], [0], [1], [0, 0, 1, 1], [], []>} : vector<10x32xf32>, vector<32x128xf32>, vector<10x128xf32> -> vector<10x128xf32>
    %c0_89 = arith.constant 0 : index
    %c0_90 = arith.constant 0 : index
    %c0_91 = arith.constant 0 : index
    %238 = vector.load %arg18[%c0_89, %c0_90, %c0_91] : memref<2x1x128xf32, #tpu.memory_space<vmem>>, vector<1x1x128xf32>
    %239 = vector.shape_cast %238 : vector<1x1x128xf32> to vector<1x128xf32>
    %240 = vector.broadcast %239 : vector<1x128xf32> to vector<10x128xf32>
    %241 = arith.addf %237, %240 : vector<10x128xf32>
    %cst_92 = arith.constant 1.702000e+00 : f32
    %242 = vector.broadcast %cst_92 : f32 to vector<10x128xf32>
    %243 = arith.mulf %242, %241 : vector<10x128xf32>
    %244 = arith.negf %243 : vector<10x128xf32>
    %245 = math.exp %244 : vector<10x128xf32>
    %cst_93 = arith.constant 1.000000e+00 : f32
    %246 = vector.broadcast %cst_93 : f32 to vector<10x128xf32>
    %247 = arith.addf %246, %245 : vector<10x128xf32>
    %248 = arith.divf %246, %247 : vector<10x128xf32>
    %249 = arith.mulf %241, %248 : vector<10x128xf32>
    %c0_94 = arith.constant 0 : index
    %c0_95 = arith.constant 0 : index
    %c0_96 = arith.constant 0 : index
    %250 = vector.load %arg19[%c0_94, %c0_95, %c0_96] : memref<2x128x32xf32, #tpu.memory_space<vmem>>, vector<1x128x32xf32>
    %251 = vector.shape_cast %250 : vector<1x128x32xf32> to vector<128x32xf32>
    %cst_97 = arith.constant dense<0.000000e+00> : vector<10x32xf32>
    %252 = tpu.matmul %249, %251, %cst_97 {dimension_numbers = #tpu.dot_dimension_numbers<[1], [0], [0], [1], [0, 0, 1, 1], [], []>} : vector<10x128xf32>, vector<128x32xf32>, vector<10x32xf32> -> vector<10x32xf32>
    %c0_98 = arith.constant 0 : index
    %c0_99 = arith.constant 0 : index
    %c0_100 = arith.constant 0 : index
    %253 = vector.load %arg20[%c0_98, %c0_99, %c0_100] : memref<2x1x32xf32, #tpu.memory_space<vmem>>, vector<1x1x32xf32>
    %254 = vector.shape_cast %253 : vector<1x1x32xf32> to vector<1x32xf32>
    %255 = vector.broadcast %254 : vector<1x32xf32> to vector<10x32xf32>
    %256 = arith.addf %252, %255 : vector<10x32xf32>
    %257 = arith.addf %208, %256 : vector<10x32xf32>
    %c1 = arith.constant 1 : index
    %c0_101 = arith.constant 0 : index
    %c0_102 = arith.constant 0 : index
    %258 = vector.load %arg9[%c1, %c0_101, %c0_102] : memref<2x1x32xf32, #tpu.memory_space<vmem>>, vector<1x1x32xf32>
    %259 = vector.shape_cast %258 : vector<1x1x32xf32> to vector<1x32xf32>
    %c1_103 = arith.constant 1 : index
    %c0_104 = arith.constant 0 : index
    %c0_105 = arith.constant 0 : index
    %260 = vector.load %arg10[%c1_103, %c0_104, %c0_105] : memref<2x1x32xf32, #tpu.memory_space<vmem>>, vector<1x1x32xf32>
    %261 = vector.shape_cast %260 : vector<1x1x32xf32> to vector<1x32xf32>
    %cst_106 = arith.constant dense<0.000000e+00> : vector<10xf32>
    %262 = vector.multi_reduction <add>, %257, %cst_106 [1] : vector<10x32xf32> to vector<10xf32>
    %263 = vector.shape_cast %262 : vector<10xf32> to vector<10x1xf32>
    %cst_107 = arith.constant 3.200000e+01 : f32
    %264 = vector.broadcast %cst_107 : f32 to vector<10x1xf32>
    %265 = arith.divf %263, %264 : vector<10x1xf32>
    %266 = vector.broadcast %265 : vector<10x1xf32> to vector<10x32xf32>
    %267 = arith.subf %257, %266 : vector<10x32xf32>
    %268 = arith.mulf %267, %267 : vector<10x32xf32>
    %cst_108 = arith.constant dense<0.000000e+00> : vector<10xf32>
    %269 = vector.multi_reduction <add>, %268, %cst_108 [1] : vector<10x32xf32> to vector<10xf32>
    %270 = vector.shape_cast %269 : vector<10xf32> to vector<10x1xf32>
    %cst_109 = arith.constant 3.200000e+01 : f32
    %271 = vector.broadcast %cst_109 : f32 to vector<10x1xf32>
    %272 = arith.divf %270, %271 : vector<10x1xf32>
    %273 = vector.broadcast %265 : vector<10x1xf32> to vector<10x32xf32>
    %274 = arith.subf %257, %273 : vector<10x32xf32>
    %cst_110 = arith.constant 9.99999974E-6 : f32
    %275 = vector.broadcast %cst_110 : f32 to vector<10x1xf32>
    %276 = arith.addf %272, %275 : vector<10x1xf32>
    %277 = math.rsqrt %276 : vector<10x1xf32>
    %278 = vector.broadcast %277 : vector<10x1xf32> to vector<10x32xf32>
    %279 = arith.mulf %274, %278 : vector<10x32xf32>
    %280 = vector.broadcast %259 : vector<1x32xf32> to vector<10x32xf32>
    %281 = arith.mulf %279, %280 : vector<10x32xf32>
    %282 = vector.broadcast %261 : vector<1x32xf32> to vector<10x32xf32>
    %283 = arith.addf %281, %282 : vector<10x32xf32>
    %c1_111 = arith.constant 1 : index
    %c0_112 = arith.constant 0 : index
    %c0_113 = arith.constant 0 : index
    %284 = vector.load %arg13[%c1_111, %c0_112, %c0_113] : memref<2x32x96xf32, #tpu.memory_space<vmem>>, vector<1x32x96xf32>
    %285 = vector.shape_cast %284 : vector<1x32x96xf32> to vector<32x96xf32>
    %cst_114 = arith.constant dense<0.000000e+00> : vector<10x96xf32>
    %286 = tpu.matmul %283, %285, %cst_114 {dimension_numbers = #tpu.dot_dimension_numbers<[1], [0], [0], [1], [0, 0, 1, 1], [], []>} : vector<10x32xf32>, vector<32x96xf32>, vector<10x96xf32> -> vector<10x96xf32>
    %c1_115 = arith.constant 1 : index
    %c0_116 = arith.constant 0 : index
    %c0_117 = arith.constant 0 : index
    %287 = vector.load %arg14[%c1_115, %c0_116, %c0_117] : memref<2x1x96xf32, #tpu.memory_space<vmem>>, vector<1x1x96xf32>
    %288 = vector.shape_cast %287 : vector<1x1x96xf32> to vector<1x96xf32>
    %289 = vector.broadcast %288 : vector<1x96xf32> to vector<10x96xf32>
    %290 = arith.addf %286, %289 : vector<10x96xf32>
    %291 = vector.extract_strided_slice %290 {offsets = [0, 0], sizes = [10, 32], strides = [1, 1]} : vector<10x96xf32> to vector<10x32xf32>
    %cst_118 = arith.constant 0.353553385 : f32
    %292 = vector.broadcast %cst_118 : f32 to vector<10x32xf32>
    %293 = arith.mulf %291, %292 : vector<10x32xf32>
    %294 = vector.extract_strided_slice %290 {offsets = [0, 32], sizes = [10, 32], strides = [1, 1]} : vector<10x96xf32> to vector<10x32xf32>
    %295 = vector.extract_strided_slice %290 {offsets = [0, 64], sizes = [10, 32], strides = [1, 1]} : vector<10x96xf32> to vector<10x32xf32>
    %296 = vector.extract_strided_slice %293 {offsets = [0, 0], sizes = [5, 32], strides = [1, 1]} : vector<10x32xf32> to vector<5x32xf32>
    %297 = vector.extract_strided_slice %294 {offsets = [0, 0], sizes = [5, 32], strides = [1, 1]} : vector<10x32xf32> to vector<5x32xf32>
    %298 = vector.extract_strided_slice %295 {offsets = [0, 0], sizes = [5, 32], strides = [1, 1]} : vector<10x32xf32> to vector<5x32xf32>
    %299 = vector.extract_strided_slice %296 {offsets = [0, 0], sizes = [5, 8], strides = [1, 1]} : vector<5x32xf32> to vector<5x8xf32>
    %300 = vector.extract_strided_slice %297 {offsets = [0, 0], sizes = [5, 8], strides = [1, 1]} : vector<5x32xf32> to vector<5x8xf32>
    %301 = vector.extract_strided_slice %298 {offsets = [0, 0], sizes = [5, 8], strides = [1, 1]} : vector<5x32xf32> to vector<5x8xf32>
    "tpu.trace_start"() <{level = 10 : i32, message = "qd,kd->qk"}> : () -> ()
    %cst_119 = arith.constant dense<0.000000e+00> : vector<5x5xf32>
    %302 = tpu.matmul %299, %300, %cst_119 {dimension_numbers = #tpu.dot_dimension_numbers<[1], [1], [0], [0], [0, 0, 1, 0], [], []>} : vector<5x8xf32>, vector<5x8xf32>, vector<5x5xf32> -> vector<5x5xf32>
    "tpu.trace_stop"() : () -> ()
    %cst_120 = arith.constant dense<0xFF800000> : vector<5xf32>
    %303 = vector.multi_reduction <maximumf>, %302, %cst_120 [1] : vector<5x5xf32> to vector<5xf32>
    %304 = vector.shape_cast %303 : vector<5xf32> to vector<5x1xf32>
    %305 = vector.broadcast %304 : vector<5x1xf32> to vector<5x5xf32>
    %306 = arith.subf %302, %305 : vector<5x5xf32>
    %307 = math.exp %306 : vector<5x5xf32>
    %cst_121 = arith.constant dense<0.000000e+00> : vector<5xf32>
    %308 = vector.multi_reduction <add>, %307, %cst_121 [1] : vector<5x5xf32> to vector<5xf32>
    %309 = vector.shape_cast %308 : vector<5xf32> to vector<5x1xf32>
    %310 = tpu.reciprocal %309 {approx = true} : vector<5x1xf32> -> vector<5x1xf32>
    %311 = vector.broadcast %310 : vector<5x1xf32> to vector<5x5xf32>
    %312 = arith.mulf %307, %311 : vector<5x5xf32>
    "tpu.trace_start"() <{level = 10 : i32, message = "qk,kd->qd"}> : () -> ()
    %cst_122 = arith.constant dense<0.000000e+00> : vector<5x8xf32>
    %313 = tpu.matmul %312, %301, %cst_122 {dimension_numbers = #tpu.dot_dimension_numbers<[1], [0], [0], [1], [0, 0, 1, 1], [], []>} : vector<5x5xf32>, vector<5x8xf32>, vector<5x8xf32> -> vector<5x8xf32>
    "tpu.trace_stop"() : () -> ()
    %314 = vector.extract_strided_slice %296 {offsets = [0, 8], sizes = [5, 8], strides = [1, 1]} : vector<5x32xf32> to vector<5x8xf32>
    %315 = vector.extract_strided_slice %297 {offsets = [0, 8], sizes = [5, 8], strides = [1, 1]} : vector<5x32xf32> to vector<5x8xf32>
    %316 = vector.extract_strided_slice %298 {offsets = [0, 8], sizes = [5, 8], strides = [1, 1]} : vector<5x32xf32> to vector<5x8xf32>
    "tpu.trace_start"() <{level = 10 : i32, message = "qd,kd->qk"}> : () -> ()
    %cst_123 = arith.constant dense<0.000000e+00> : vector<5x5xf32>
    %317 = tpu.matmul %314, %315, %cst_123 {dimension_numbers = #tpu.dot_dimension_numbers<[1], [1], [0], [0], [0, 0, 1, 0], [], []>} : vector<5x8xf32>, vector<5x8xf32>, vector<5x5xf32> -> vector<5x5xf32>
    "tpu.trace_stop"() : () -> ()
    %cst_124 = arith.constant dense<0xFF800000> : vector<5xf32>
    %318 = vector.multi_reduction <maximumf>, %317, %cst_124 [1] : vector<5x5xf32> to vector<5xf32>
    %319 = vector.shape_cast %318 : vector<5xf32> to vector<5x1xf32>
    %320 = vector.broadcast %319 : vector<5x1xf32> to vector<5x5xf32>
    %321 = arith.subf %317, %320 : vector<5x5xf32>
    %322 = math.exp %321 : vector<5x5xf32>
    %cst_125 = arith.constant dense<0.000000e+00> : vector<5xf32>
    %323 = vector.multi_reduction <add>, %322, %cst_125 [1] : vector<5x5xf32> to vector<5xf32>
    %324 = vector.shape_cast %323 : vector<5xf32> to vector<5x1xf32>
    %325 = tpu.reciprocal %324 {approx = true} : vector<5x1xf32> -> vector<5x1xf32>
    %326 = vector.broadcast %325 : vector<5x1xf32> to vector<5x5xf32>
    %327 = arith.mulf %322, %326 : vector<5x5xf32>
    "tpu.trace_start"() <{level = 10 : i32, message = "qk,kd->qd"}> : () -> ()
    %cst_126 = arith.constant dense<0.000000e+00> : vector<5x8xf32>
    %328 = tpu.matmul %327, %316, %cst_126 {dimension_numbers = #tpu.dot_dimension_numbers<[1], [0], [0], [1], [0, 0, 1, 1], [], []>} : vector<5x5xf32>, vector<5x8xf32>, vector<5x8xf32> -> vector<5x8xf32>
    "tpu.trace_stop"() : () -> ()
    %329 = vector.extract_strided_slice %296 {offsets = [0, 16], sizes = [5, 8], strides = [1, 1]} : vector<5x32xf32> to vector<5x8xf32>
    %330 = vector.extract_strided_slice %297 {offsets = [0, 16], sizes = [5, 8], strides = [1, 1]} : vector<5x32xf32> to vector<5x8xf32>
    %331 = vector.extract_strided_slice %298 {offsets = [0, 16], sizes = [5, 8], strides = [1, 1]} : vector<5x32xf32> to vector<5x8xf32>
    "tpu.trace_start"() <{level = 10 : i32, message = "qd,kd->qk"}> : () -> ()
    %cst_127 = arith.constant dense<0.000000e+00> : vector<5x5xf32>
    %332 = tpu.matmul %329, %330, %cst_127 {dimension_numbers = #tpu.dot_dimension_numbers<[1], [1], [0], [0], [0, 0, 1, 0], [], []>} : vector<5x8xf32>, vector<5x8xf32>, vector<5x5xf32> -> vector<5x5xf32>
    "tpu.trace_stop"() : () -> ()
    %cst_128 = arith.constant dense<0xFF800000> : vector<5xf32>
    %333 = vector.multi_reduction <maximumf>, %332, %cst_128 [1] : vector<5x5xf32> to vector<5xf32>
    %334 = vector.shape_cast %333 : vector<5xf32> to vector<5x1xf32>
    %335 = vector.broadcast %334 : vector<5x1xf32> to vector<5x5xf32>
    %336 = arith.subf %332, %335 : vector<5x5xf32>
    %337 = math.exp %336 : vector<5x5xf32>
    %cst_129 = arith.constant dense<0.000000e+00> : vector<5xf32>
    %338 = vector.multi_reduction <add>, %337, %cst_129 [1] : vector<5x5xf32> to vector<5xf32>
    %339 = vector.shape_cast %338 : vector<5xf32> to vector<5x1xf32>
    %340 = tpu.reciprocal %339 {approx = true} : vector<5x1xf32> -> vector<5x1xf32>
    %341 = vector.broadcast %340 : vector<5x1xf32> to vector<5x5xf32>
    %342 = arith.mulf %337, %341 : vector<5x5xf32>
    "tpu.trace_start"() <{level = 10 : i32, message = "qk,kd->qd"}> : () -> ()
    %cst_130 = arith.constant dense<0.000000e+00> : vector<5x8xf32>
    %343 = tpu.matmul %342, %331, %cst_130 {dimension_numbers = #tpu.dot_dimension_numbers<[1], [0], [0], [1], [0, 0, 1, 1], [], []>} : vector<5x5xf32>, vector<5x8xf32>, vector<5x8xf32> -> vector<5x8xf32>
    "tpu.trace_stop"() : () -> ()
    %344 = vector.extract_strided_slice %296 {offsets = [0, 24], sizes = [5, 8], strides = [1, 1]} : vector<5x32xf32> to vector<5x8xf32>
    %345 = vector.extract_strided_slice %297 {offsets = [0, 24], sizes = [5, 8], strides = [1, 1]} : vector<5x32xf32> to vector<5x8xf32>
    %346 = vector.extract_strided_slice %298 {offsets = [0, 24], sizes = [5, 8], strides = [1, 1]} : vector<5x32xf32> to vector<5x8xf32>
    "tpu.trace_start"() <{level = 10 : i32, message = "qd,kd->qk"}> : () -> ()
    %cst_131 = arith.constant dense<0.000000e+00> : vector<5x5xf32>
    %347 = tpu.matmul %344, %345, %cst_131 {dimension_numbers = #tpu.dot_dimension_numbers<[1], [1], [0], [0], [0, 0, 1, 0], [], []>} : vector<5x8xf32>, vector<5x8xf32>, vector<5x5xf32> -> vector<5x5xf32>
    "tpu.trace_stop"() : () -> ()
    %cst_132 = arith.constant dense<0xFF800000> : vector<5xf32>
    %348 = vector.multi_reduction <maximumf>, %347, %cst_132 [1] : vector<5x5xf32> to vector<5xf32>
    %349 = vector.shape_cast %348 : vector<5xf32> to vector<5x1xf32>
    %350 = vector.broadcast %349 : vector<5x1xf32> to vector<5x5xf32>
    %351 = arith.subf %347, %350 : vector<5x5xf32>
    %352 = math.exp %351 : vector<5x5xf32>
    %cst_133 = arith.constant dense<0.000000e+00> : vector<5xf32>
    %353 = vector.multi_reduction <add>, %352, %cst_133 [1] : vector<5x5xf32> to vector<5xf32>
    %354 = vector.shape_cast %353 : vector<5xf32> to vector<5x1xf32>
    %355 = tpu.reciprocal %354 {approx = true} : vector<5x1xf32> -> vector<5x1xf32>
    %356 = vector.broadcast %355 : vector<5x1xf32> to vector<5x5xf32>
    %357 = arith.mulf %352, %356 : vector<5x5xf32>
    "tpu.trace_start"() <{level = 10 : i32, message = "qk,kd->qd"}> : () -> ()
    %cst_134 = arith.constant dense<0.000000e+00> : vector<5x8xf32>
    %358 = tpu.matmul %357, %346, %cst_134 {dimension_numbers = #tpu.dot_dimension_numbers<[1], [0], [0], [1], [0, 0, 1, 1], [], []>} : vector<5x5xf32>, vector<5x8xf32>, vector<5x8xf32> -> vector<5x8xf32>
    "tpu.trace_stop"() : () -> ()
    %359 = tpu.concatenate %313, %328, %343, %358 in 1 : vector<5x8xf32>, vector<5x8xf32>, vector<5x8xf32>, vector<5x8xf32> -> vector<5x32xf32>
    %360 = vector.extract_strided_slice %293 {offsets = [5, 0], sizes = [5, 32], strides = [1, 1]} : vector<10x32xf32> to vector<5x32xf32>
    %361 = vector.extract_strided_slice %294 {offsets = [5, 0], sizes = [5, 32], strides = [1, 1]} : vector<10x32xf32> to vector<5x32xf32>
    %362 = vector.extract_strided_slice %295 {offsets = [5, 0], sizes = [5, 32], strides = [1, 1]} : vector<10x32xf32> to vector<5x32xf32>
    %363 = vector.extract_strided_slice %360 {offsets = [0, 0], sizes = [5, 8], strides = [1, 1]} : vector<5x32xf32> to vector<5x8xf32>
    %364 = vector.extract_strided_slice %361 {offsets = [0, 0], sizes = [5, 8], strides = [1, 1]} : vector<5x32xf32> to vector<5x8xf32>
    %365 = vector.extract_strided_slice %362 {offsets = [0, 0], sizes = [5, 8], strides = [1, 1]} : vector<5x32xf32> to vector<5x8xf32>
    "tpu.trace_start"() <{level = 10 : i32, message = "qd,kd->qk"}> : () -> ()
    %cst_135 = arith.constant dense<0.000000e+00> : vector<5x5xf32>
    %366 = tpu.matmul %363, %364, %cst_135 {dimension_numbers = #tpu.dot_dimension_numbers<[1], [1], [0], [0], [0, 0, 1, 0], [], []>} : vector<5x8xf32>, vector<5x8xf32>, vector<5x5xf32> -> vector<5x5xf32>
    "tpu.trace_stop"() : () -> ()
    %cst_136 = arith.constant dense<0xFF800000> : vector<5xf32>
    %367 = vector.multi_reduction <maximumf>, %366, %cst_136 [1] : vector<5x5xf32> to vector<5xf32>
    %368 = vector.shape_cast %367 : vector<5xf32> to vector<5x1xf32>
    %369 = vector.broadcast %368 : vector<5x1xf32> to vector<5x5xf32>
    %370 = arith.subf %366, %369 : vector<5x5xf32>
    %371 = math.exp %370 : vector<5x5xf32>
    %cst_137 = arith.constant dense<0.000000e+00> : vector<5xf32>
    %372 = vector.multi_reduction <add>, %371, %cst_137 [1] : vector<5x5xf32> to vector<5xf32>
    %373 = vector.shape_cast %372 : vector<5xf32> to vector<5x1xf32>
    %374 = tpu.reciprocal %373 {approx = true} : vector<5x1xf32> -> vector<5x1xf32>
    %375 = vector.broadcast %374 : vector<5x1xf32> to vector<5x5xf32>
    %376 = arith.mulf %371, %375 : vector<5x5xf32>
    "tpu.trace_start"() <{level = 10 : i32, message = "qk,kd->qd"}> : () -> ()
    %cst_138 = arith.constant dense<0.000000e+00> : vector<5x8xf32>
    %377 = tpu.matmul %376, %365, %cst_138 {dimension_numbers = #tpu.dot_dimension_numbers<[1], [0], [0], [1], [0, 0, 1, 1], [], []>} : vector<5x5xf32>, vector<5x8xf32>, vector<5x8xf32> -> vector<5x8xf32>
    "tpu.trace_stop"() : () -> ()
    %378 = vector.extract_strided_slice %360 {offsets = [0, 8], sizes = [5, 8], strides = [1, 1]} : vector<5x32xf32> to vector<5x8xf32>
    %379 = vector.extract_strided_slice %361 {offsets = [0, 8], sizes = [5, 8], strides = [1, 1]} : vector<5x32xf32> to vector<5x8xf32>
    %380 = vector.extract_strided_slice %362 {offsets = [0, 8], sizes = [5, 8], strides = [1, 1]} : vector<5x32xf32> to vector<5x8xf32>
    "tpu.trace_start"() <{level = 10 : i32, message = "qd,kd->qk"}> : () -> ()
    %cst_139 = arith.constant dense<0.000000e+00> : vector<5x5xf32>
    %381 = tpu.matmul %378, %379, %cst_139 {dimension_numbers = #tpu.dot_dimension_numbers<[1], [1], [0], [0], [0, 0, 1, 0], [], []>} : vector<5x8xf32>, vector<5x8xf32>, vector<5x5xf32> -> vector<5x5xf32>
    "tpu.trace_stop"() : () -> ()
    %cst_140 = arith.constant dense<0xFF800000> : vector<5xf32>
    %382 = vector.multi_reduction <maximumf>, %381, %cst_140 [1] : vector<5x5xf32> to vector<5xf32>
    %383 = vector.shape_cast %382 : vector<5xf32> to vector<5x1xf32>
    %384 = vector.broadcast %383 : vector<5x1xf32> to vector<5x5xf32>
    %385 = arith.subf %381, %384 : vector<5x5xf32>
    %386 = math.exp %385 : vector<5x5xf32>
    %cst_141 = arith.constant dense<0.000000e+00> : vector<5xf32>
    %387 = vector.multi_reduction <add>, %386, %cst_141 [1] : vector<5x5xf32> to vector<5xf32>
    %388 = vector.shape_cast %387 : vector<5xf32> to vector<5x1xf32>
    %389 = tpu.reciprocal %388 {approx = true} : vector<5x1xf32> -> vector<5x1xf32>
    %390 = vector.broadcast %389 : vector<5x1xf32> to vector<5x5xf32>
    %391 = arith.mulf %386, %390 : vector<5x5xf32>
    "tpu.trace_start"() <{level = 10 : i32, message = "qk,kd->qd"}> : () -> ()
    %cst_142 = arith.constant dense<0.000000e+00> : vector<5x8xf32>
    %392 = tpu.matmul %391, %380, %cst_142 {dimension_numbers = #tpu.dot_dimension_numbers<[1], [0], [0], [1], [0, 0, 1, 1], [], []>} : vector<5x5xf32>, vector<5x8xf32>, vector<5x8xf32> -> vector<5x8xf32>
    "tpu.trace_stop"() : () -> ()
    %393 = vector.extract_strided_slice %360 {offsets = [0, 16], sizes = [5, 8], strides = [1, 1]} : vector<5x32xf32> to vector<5x8xf32>
    %394 = vector.extract_strided_slice %361 {offsets = [0, 16], sizes = [5, 8], strides = [1, 1]} : vector<5x32xf32> to vector<5x8xf32>
    %395 = vector.extract_strided_slice %362 {offsets = [0, 16], sizes = [5, 8], strides = [1, 1]} : vector<5x32xf32> to vector<5x8xf32>
    "tpu.trace_start"() <{level = 10 : i32, message = "qd,kd->qk"}> : () -> ()
    %cst_143 = arith.constant dense<0.000000e+00> : vector<5x5xf32>
    %396 = tpu.matmul %393, %394, %cst_143 {dimension_numbers = #tpu.dot_dimension_numbers<[1], [1], [0], [0], [0, 0, 1, 0], [], []>} : vector<5x8xf32>, vector<5x8xf32>, vector<5x5xf32> -> vector<5x5xf32>
    "tpu.trace_stop"() : () -> ()
    %cst_144 = arith.constant dense<0xFF800000> : vector<5xf32>
    %397 = vector.multi_reduction <maximumf>, %396, %cst_144 [1] : vector<5x5xf32> to vector<5xf32>
    %398 = vector.shape_cast %397 : vector<5xf32> to vector<5x1xf32>
    %399 = vector.broadcast %398 : vector<5x1xf32> to vector<5x5xf32>
    %400 = arith.subf %396, %399 : vector<5x5xf32>
    %401 = math.exp %400 : vector<5x5xf32>
    %cst_145 = arith.constant dense<0.000000e+00> : vector<5xf32>
    %402 = vector.multi_reduction <add>, %401, %cst_145 [1] : vector<5x5xf32> to vector<5xf32>
    %403 = vector.shape_cast %402 : vector<5xf32> to vector<5x1xf32>
    %404 = tpu.reciprocal %403 {approx = true} : vector<5x1xf32> -> vector<5x1xf32>
    %405 = vector.broadcast %404 : vector<5x1xf32> to vector<5x5xf32>
    %406 = arith.mulf %401, %405 : vector<5x5xf32>
    "tpu.trace_start"() <{level = 10 : i32, message = "qk,kd->qd"}> : () -> ()
    %cst_146 = arith.constant dense<0.000000e+00> : vector<5x8xf32>
    %407 = tpu.matmul %406, %395, %cst_146 {dimension_numbers = #tpu.dot_dimension_numbers<[1], [0], [0], [1], [0, 0, 1, 1], [], []>} : vector<5x5xf32>, vector<5x8xf32>, vector<5x8xf32> -> vector<5x8xf32>
    "tpu.trace_stop"() : () -> ()
    %408 = vector.extract_strided_slice %360 {offsets = [0, 24], sizes = [5, 8], strides = [1, 1]} : vector<5x32xf32> to vector<5x8xf32>
    %409 = vector.extract_strided_slice %361 {offsets = [0, 24], sizes = [5, 8], strides = [1, 1]} : vector<5x32xf32> to vector<5x8xf32>
    %410 = vector.extract_strided_slice %362 {offsets = [0, 24], sizes = [5, 8], strides = [1, 1]} : vector<5x32xf32> to vector<5x8xf32>
    "tpu.trace_start"() <{level = 10 : i32, message = "qd,kd->qk"}> : () -> ()
    %cst_147 = arith.constant dense<0.000000e+00> : vector<5x5xf32>
    %411 = tpu.matmul %408, %409, %cst_147 {dimension_numbers = #tpu.dot_dimension_numbers<[1], [1], [0], [0], [0, 0, 1, 0], [], []>} : vector<5x8xf32>, vector<5x8xf32>, vector<5x5xf32> -> vector<5x5xf32>
    "tpu.trace_stop"() : () -> ()
    %cst_148 = arith.constant dense<0xFF800000> : vector<5xf32>
    %412 = vector.multi_reduction <maximumf>, %411, %cst_148 [1] : vector<5x5xf32> to vector<5xf32>
    %413 = vector.shape_cast %412 : vector<5xf32> to vector<5x1xf32>
    %414 = vector.broadcast %413 : vector<5x1xf32> to vector<5x5xf32>
    %415 = arith.subf %411, %414 : vector<5x5xf32>
    %416 = math.exp %415 : vector<5x5xf32>
    %cst_149 = arith.constant dense<0.000000e+00> : vector<5xf32>
    %417 = vector.multi_reduction <add>, %416, %cst_149 [1] : vector<5x5xf32> to vector<5xf32>
    %418 = vector.shape_cast %417 : vector<5xf32> to vector<5x1xf32>
    %419 = tpu.reciprocal %418 {approx = true} : vector<5x1xf32> -> vector<5x1xf32>
    %420 = vector.broadcast %419 : vector<5x1xf32> to vector<5x5xf32>
    %421 = arith.mulf %416, %420 : vector<5x5xf32>
    "tpu.trace_start"() <{level = 10 : i32, message = "qk,kd->qd"}> : () -> ()
    %cst_150 = arith.constant dense<0.000000e+00> : vector<5x8xf32>
    %422 = tpu.matmul %421, %410, %cst_150 {dimension_numbers = #tpu.dot_dimension_numbers<[1], [0], [0], [1], [0, 0, 1, 1], [], []>} : vector<5x5xf32>, vector<5x8xf32>, vector<5x8xf32> -> vector<5x8xf32>
    "tpu.trace_stop"() : () -> ()
    %423 = tpu.concatenate %377, %392, %407, %422 in 1 : vector<5x8xf32>, vector<5x8xf32>, vector<5x8xf32>, vector<5x8xf32> -> vector<5x32xf32>
    %424 = tpu.concatenate %359, %423 in 0 : vector<5x32xf32>, vector<5x32xf32> -> vector<10x32xf32>
    %c1_151 = arith.constant 1 : index
    %c0_152 = arith.constant 0 : index
    %c0_153 = arith.constant 0 : index
    %425 = vector.load %arg15[%c1_151, %c0_152, %c0_153] : memref<2x32x32xf32, #tpu.memory_space<vmem>>, vector<1x32x32xf32>
    %426 = vector.shape_cast %425 : vector<1x32x32xf32> to vector<32x32xf32>
    %cst_154 = arith.constant dense<0.000000e+00> : vector<10x32xf32>
    %427 = tpu.matmul %424, %426, %cst_154 {dimension_numbers = #tpu.dot_dimension_numbers<[1], [0], [0], [1], [0, 0, 1, 1], [], []>} : vector<10x32xf32>, vector<32x32xf32>, vector<10x32xf32> -> vector<10x32xf32>
    %c1_155 = arith.constant 1 : index
    %c0_156 = arith.constant 0 : index
    %c0_157 = arith.constant 0 : index
    %428 = vector.load %arg16[%c1_155, %c0_156, %c0_157] : memref<2x1x32xf32, #tpu.memory_space<vmem>>, vector<1x1x32xf32>
    %429 = vector.shape_cast %428 : vector<1x1x32xf32> to vector<1x32xf32>
    %430 = vector.broadcast %429 : vector<1x32xf32> to vector<10x32xf32>
    %431 = arith.addf %427, %430 : vector<10x32xf32>
    %432 = arith.addf %257, %431 : vector<10x32xf32>
    %c1_158 = arith.constant 1 : index
    %c0_159 = arith.constant 0 : index
    %c0_160 = arith.constant 0 : index
    %433 = vector.load %arg11[%c1_158, %c0_159, %c0_160] : memref<2x1x32xf32, #tpu.memory_space<vmem>>, vector<1x1x32xf32>
    %434 = vector.shape_cast %433 : vector<1x1x32xf32> to vector<1x32xf32>
    %c1_161 = arith.constant 1 : index
    %c0_162 = arith.constant 0 : index
    %c0_163 = arith.constant 0 : index
    %435 = vector.load %arg12[%c1_161, %c0_162, %c0_163] : memref<2x1x32xf32, #tpu.memory_space<vmem>>, vector<1x1x32xf32>
    %436 = vector.shape_cast %435 : vector<1x1x32xf32> to vector<1x32xf32>
    %cst_164 = arith.constant dense<0.000000e+00> : vector<10xf32>
    %437 = vector.multi_reduction <add>, %432, %cst_164 [1] : vector<10x32xf32> to vector<10xf32>
    %438 = vector.shape_cast %437 : vector<10xf32> to vector<10x1xf32>
    %cst_165 = arith.constant 3.200000e+01 : f32
    %439 = vector.broadcast %cst_165 : f32 to vector<10x1xf32>
    %440 = arith.divf %438, %439 : vector<10x1xf32>
    %441 = vector.broadcast %440 : vector<10x1xf32> to vector<10x32xf32>
    %442 = arith.subf %432, %441 : vector<10x32xf32>
    %443 = arith.mulf %442, %442 : vector<10x32xf32>
    %cst_166 = arith.constant dense<0.000000e+00> : vector<10xf32>
    %444 = vector.multi_reduction <add>, %443, %cst_166 [1] : vector<10x32xf32> to vector<10xf32>
    %445 = vector.shape_cast %444 : vector<10xf32> to vector<10x1xf32>
    %cst_167 = arith.constant 3.200000e+01 : f32
    %446 = vector.broadcast %cst_167 : f32 to vector<10x1xf32>
    %447 = arith.divf %445, %446 : vector<10x1xf32>
    %448 = vector.broadcast %440 : vector<10x1xf32> to vector<10x32xf32>
    %449 = arith.subf %432, %448 : vector<10x32xf32>
    %cst_168 = arith.constant 9.99999974E-6 : f32
    %450 = vector.broadcast %cst_168 : f32 to vector<10x1xf32>
    %451 = arith.addf %447, %450 : vector<10x1xf32>
    %452 = math.rsqrt %451 : vector<10x1xf32>
    %453 = vector.broadcast %452 : vector<10x1xf32> to vector<10x32xf32>
    %454 = arith.mulf %449, %453 : vector<10x32xf32>
    %455 = vector.broadcast %434 : vector<1x32xf32> to vector<10x32xf32>
    %456 = arith.mulf %454, %455 : vector<10x32xf32>
    %457 = vector.broadcast %436 : vector<1x32xf32> to vector<10x32xf32>
    %458 = arith.addf %456, %457 : vector<10x32xf32>
    %c1_169 = arith.constant 1 : index
    %c0_170 = arith.constant 0 : index
    %c0_171 = arith.constant 0 : index
    %459 = vector.load %arg17[%c1_169, %c0_170, %c0_171] : memref<2x32x128xf32, #tpu.memory_space<vmem>>, vector<1x32x128xf32>
    %460 = vector.shape_cast %459 : vector<1x32x128xf32> to vector<32x128xf32>
    %cst_172 = arith.constant dense<0.000000e+00> : vector<10x128xf32>
    %461 = tpu.matmul %458, %460, %cst_172 {dimension_numbers = #tpu.dot_dimension_numbers<[1], [0], [0], [1], [0, 0, 1, 1], [], []>} : vector<10x32xf32>, vector<32x128xf32>, vector<10x128xf32> -> vector<10x128xf32>
    %c1_173 = arith.constant 1 : index
    %c0_174 = arith.constant 0 : index
    %c0_175 = arith.constant 0 : index
    %462 = vector.load %arg18[%c1_173, %c0_174, %c0_175] : memref<2x1x128xf32, #tpu.memory_space<vmem>>, vector<1x1x128xf32>
    %463 = vector.shape_cast %462 : vector<1x1x128xf32> to vector<1x128xf32>
    %464 = vector.broadcast %463 : vector<1x128xf32> to vector<10x128xf32>
    %465 = arith.addf %461, %464 : vector<10x128xf32>
    %cst_176 = arith.constant 1.702000e+00 : f32
    %466 = vector.broadcast %cst_176 : f32 to vector<10x128xf32>
    %467 = arith.mulf %466, %465 : vector<10x128xf32>
    %468 = arith.negf %467 : vector<10x128xf32>
    %469 = math.exp %468 : vector<10x128xf32>
    %cst_177 = arith.constant 1.000000e+00 : f32
    %470 = vector.broadcast %cst_177 : f32 to vector<10x128xf32>
    %471 = arith.addf %470, %469 : vector<10x128xf32>
    %472 = arith.divf %470, %471 : vector<10x128xf32>
    %473 = arith.mulf %465, %472 : vector<10x128xf32>
    %c1_178 = arith.constant 1 : index
    %c0_179 = arith.constant 0 : index
    %c0_180 = arith.constant 0 : index
    %474 = vector.load %arg19[%c1_178, %c0_179, %c0_180] : memref<2x128x32xf32, #tpu.memory_space<vmem>>, vector<1x128x32xf32>
    %475 = vector.shape_cast %474 : vector<1x128x32xf32> to vector<128x32xf32>
    %cst_181 = arith.constant dense<0.000000e+00> : vector<10x32xf32>
    %476 = tpu.matmul %473, %475, %cst_181 {dimension_numbers = #tpu.dot_dimension_numbers<[1], [0], [0], [1], [0, 0, 1, 1], [], []>} : vector<10x128xf32>, vector<128x32xf32>, vector<10x32xf32> -> vector<10x32xf32>
    %c1_182 = arith.constant 1 : index
    %c0_183 = arith.constant 0 : index
    %c0_184 = arith.constant 0 : index
    %477 = vector.load %arg20[%c1_182, %c0_183, %c0_184] : memref<2x1x32xf32, #tpu.memory_space<vmem>>, vector<1x1x32xf32>
    %478 = vector.shape_cast %477 : vector<1x1x32xf32> to vector<1x32xf32>
    %479 = vector.broadcast %478 : vector<1x32xf32> to vector<10x32xf32>
    %480 = arith.addf %476, %479 : vector<10x32xf32>
    %481 = arith.addf %432, %480 : vector<10x32xf32>
    %482 = vector.extract_strided_slice %481 {offsets = [1, 0], sizes = [4, 32], strides = [1, 1]} : vector<10x32xf32> to vector<4x32xf32>
    %483 = vector.extract_strided_slice %481 {offsets = [6, 0], sizes = [4, 32], strides = [1, 1]} : vector<10x32xf32> to vector<4x32xf32>
    %484 = tpu.concatenate %482, %483 in 0 : vector<4x32xf32>, vector<4x32xf32> -> vector<8x32xf32>
    %c0_185 = arith.constant 0 : index
    %c0_186 = arith.constant 0 : index
    %485 = vector.load %arg7[%c0_185, %c0_186] : memref<1x32xf32, #tpu.memory_space<vmem>>, vector<1x32xf32>
    %c0_187 = arith.constant 0 : index
    %c0_188 = arith.constant 0 : index
    %486 = vector.load %arg8[%c0_187, %c0_188] : memref<1x32xf32, #tpu.memory_space<vmem>>, vector<1x32xf32>
    %cst_189 = arith.constant dense<0.000000e+00> : vector<8xf32>
    %487 = vector.multi_reduction <add>, %484, %cst_189 [1] : vector<8x32xf32> to vector<8xf32>
    %488 = vector.shape_cast %487 : vector<8xf32> to vector<8x1xf32>
    %cst_190 = arith.constant 3.200000e+01 : f32
    %489 = vector.broadcast %cst_190 : f32 to vector<8x1xf32>
    %490 = arith.divf %488, %489 : vector<8x1xf32>
    %491 = vector.broadcast %490 : vector<8x1xf32> to vector<8x32xf32>
    %492 = arith.subf %484, %491 : vector<8x32xf32>
    %493 = arith.mulf %492, %492 : vector<8x32xf32>
    %cst_191 = arith.constant dense<0.000000e+00> : vector<8xf32>
    %494 = vector.multi_reduction <add>, %493, %cst_191 [1] : vector<8x32xf32> to vector<8xf32>
    %495 = vector.shape_cast %494 : vector<8xf32> to vector<8x1xf32>
    %cst_192 = arith.constant 3.200000e+01 : f32
    %496 = vector.broadcast %cst_192 : f32 to vector<8x1xf32>
    %497 = arith.divf %495, %496 : vector<8x1xf32>
    %498 = vector.broadcast %490 : vector<8x1xf32> to vector<8x32xf32>
    %499 = arith.subf %484, %498 : vector<8x32xf32>
    %cst_193 = arith.constant 9.99999974E-6 : f32
    %500 = vector.broadcast %cst_193 : f32 to vector<8x1xf32>
    %501 = arith.addf %497, %500 : vector<8x1xf32>
    %502 = math.rsqrt %501 : vector<8x1xf32>
    %503 = vector.broadcast %502 : vector<8x1xf32> to vector<8x32xf32>
    %504 = arith.mulf %499, %503 : vector<8x32xf32>
    %505 = vector.broadcast %485 : vector<1x32xf32> to vector<8x32xf32>
    %506 = arith.mulf %504, %505 : vector<8x32xf32>
    %507 = vector.broadcast %486 : vector<1x32xf32> to vector<8x32xf32>
    %508 = arith.addf %506, %507 : vector<8x32xf32>
    %c0_194 = arith.constant 0 : index
    %c0_195 = arith.constant 0 : index
    %509 = vector.load %arg21[%c0_194, %c0_195] : memref<8x32xf32, #tpu.memory_space<vmem>>, vector<8x32xf32>
    tpu.vector_store %arg21[%c0_194, %c0_195], %508 {strides = array<i32>} : memref<8x32xf32, #tpu.memory_space<vmem>>, vector<8x32xf32>,
    return
  }
  func.func @transform_0(%arg0: i32) -> (i32, i32) {
    %c0_i32 = arith.constant 0 : i32
    %c0_i32_0 = arith.constant 0 : i32
    %c0_i32_1 = arith.constant 0 : i32
    return %c0_i32, %c0_i32_0 : i32, i32
  }
  func.func @transform_1(%arg0: i32) -> (i32, i32) {
    %c0_i32 = arith.constant 0 : i32
    %c0_i32_0 = arith.constant 0 : i32
    %c0_i32_1 = arith.constant 0 : i32
    return %c0_i32, %c0_i32_0 : i32, i32
  }
  func.func @transform_2(%arg0: i32) -> (i32, i32) {
    %c0_i32 = arith.constant 0 : i32
    %c0_i32_0 = arith.constant 0 : i32
    %c0_i32_1 = arith.constant 0 : i32
    return %c0_i32, %c0_i32_0 : i32, i32
  }
  func.func @transform_3(%arg0: i32) -> (i32, i32) {
    %c0_i32 = arith.constant 0 : i32
    %c0_i32_0 = arith.constant 0 : i32
    %c0_i32_1 = arith.constant 0 : i32
    return %c0_i32, %c0_i32_0 : i32, i32
  }
  func.func @transform_4(%arg0: i32) -> (i32, i32) {
    %c0_i32 = arith.constant 0 : i32
    %c0_i32_0 = arith.constant 0 : i32
    %c0_i32_1 = arith.constant 0 : i32
    return %c0_i32, %c0_i32_0 : i32, i32
  }
  func.func @transform_5(%arg0: i32) -> (i32, i32) {
    %c0_i32 = arith.constant 0 : i32
    %c0_i32_0 = arith.constant 0 : i32
    %c0_i32_1 = arith.constant 0 : i32
    return %c0_i32, %c0_i32_0 : i32, i32
  }
  func.func @transform_6(%arg0: i32) -> (i32, i32) {
    %c0_i32 = arith.constant 0 : i32
    %c0_i32_0 = arith.constant 0 : i32
    %c0_i32_1 = arith.constant 0 : i32
    return %c0_i32, %c0_i32_0 : i32, i32
  }
  func.func @transform_7(%arg0: i32) -> (i32, i32) {
    %c0_i32 = arith.constant 0 : i32
    %c0_i32_0 = arith.constant 0 : i32
    %c0_i32_1 = arith.constant 0 : i32
    return %c0_i32, %c0_i32_0 : i32, i32
  }
  func.func @transform_8(%arg0: i32) -> (i32, i32, i32) {
    %c0_i32 = arith.constant 0 : i32
    %c0_i32_0 = arith.constant 0 : i32
    %c0_i32_1 = arith.constant 0 : i32
    %c0_i32_2 = arith.constant 0 : i32
    return %c0_i32, %c0_i32_0, %c0_i32_1 : i32, i32, i32
  }
  func.func @transform_9(%arg0: i32) -> (i32, i32, i32) {
    %c0_i32 = arith.constant 0 : i32
    %c0_i32_0 = arith.constant 0 : i32
    %c0_i32_1 = arith.constant 0 : i32
    %c0_i32_2 = arith.constant 0 : i32
    return %c0_i32, %c0_i32_0, %c0_i32_1 : i32, i32, i32
  }
  func.func @transform_10(%arg0: i32) -> (i32, i32, i32) {
    %c0_i32 = arith.constant 0 : i32
    %c0_i32_0 = arith.constant 0 : i32
    %c0_i32_1 = arith.constant 0 : i32
    %c0_i32_2 = arith.constant 0 : i32
    return %c0_i32, %c0_i32_0, %c0_i32_1 : i32, i32, i32
  }
  func.func @transform_11(%arg0: i32) -> (i32, i32, i32) {
    %c0_i32 = arith.constant 0 : i32
    %c0_i32_0 = arith.constant 0 : i32
    %c0_i32_1 = arith.constant 0 : i32
    %c0_i32_2 = arith.constant 0 : i32
    return %c0_i32, %c0_i32_0, %c0_i32_1 : i32, i32, i32
  }
  func.func @transform_12(%arg0: i32) -> (i32, i32, i32) {
    %c0_i32 = arith.constant 0 : i32
    %c0_i32_0 = arith.constant 0 : i32
    %c0_i32_1 = arith.constant 0 : i32
    %c0_i32_2 = arith.constant 0 : i32
    return %c0_i32, %c0_i32_0, %c0_i32_1 : i32, i32, i32
  }
  func.func @transform_13(%arg0: i32) -> (i32, i32, i32) {
    %c0_i32 = arith.constant 0 : i32
    %c0_i32_0 = arith.constant 0 : i32
    %c0_i32_1 = arith.constant 0 : i32
    %c0_i32_2 = arith.constant 0 : i32
    return %c0_i32, %c0_i32_0, %c0_i32_1 : i32, i32, i32
  }
  func.func @transform_14(%arg0: i32) -> (i32, i32, i32) {
    %c0_i32 = arith.constant 0 : i32
    %c0_i32_0 = arith.constant 0 : i32
    %c0_i32_1 = arith.constant 0 : i32
    %c0_i32_2 = arith.constant 0 : i32
    return %c0_i32, %c0_i32_0, %c0_i32_1 : i32, i32, i32
  }
  func.func @transform_15(%arg0: i32) -> (i32, i32, i32) {
    %c0_i32 = arith.constant 0 : i32
    %c0_i32_0 = arith.constant 0 : i32
    %c0_i32_1 = arith.constant 0 : i32
    %c0_i32_2 = arith.constant 0 : i32
    return %c0_i32, %c0_i32_0, %c0_i32_1 : i32, i32, i32
  }
  func.func @transform_16(%arg0: i32) -> (i32, i32, i32) {
    %c0_i32 = arith.constant 0 : i32
    %c0_i32_0 = arith.constant 0 : i32
    %c0_i32_1 = arith.constant 0 : i32
    %c0_i32_2 = arith.constant 0 : i32
    return %c0_i32, %c0_i32_0, %c0_i32_1 : i32, i32, i32
  }
  func.func @transform_17(%arg0: i32) -> (i32, i32, i32) {
    %c0_i32 = arith.constant 0 : i32
    %c0_i32_0 = arith.constant 0 : i32
    %c0_i32_1 = arith.constant 0 : i32
    %c0_i32_2 = arith.constant 0 : i32
    return %c0_i32, %c0_i32_0, %c0_i32_1 : i32, i32, i32
  }
  func.func @transform_18(%arg0: i32) -> (i32, i32, i32) {
    %c0_i32 = arith.constant 0 : i32
    %c0_i32_0 = arith.constant 0 : i32
    %c0_i32_1 = arith.constant 0 : i32
    %c0_i32_2 = arith.constant 0 : i32
    return %c0_i32, %c0_i32_0, %c0_i32_1 : i32, i32, i32
  }
  func.func @transform_19(%arg0: i32) -> (i32, i32, i32) {
    %c0_i32 = arith.constant 0 : i32
    %c0_i32_0 = arith.constant 0 : i32
    %c0_i32_1 = arith.constant 0 : i32
    %c0_i32_2 = arith.constant 0 : i32
    return %c0_i32, %c0_i32_0, %c0_i32_1 : i32, i32, i32
  }
  func.func @transform_20(%arg0: i32) -> (i32, i32) {
    %c0_i32 = arith.constant 0 : i32
    %c0_i32_0 = arith.constant 0 : i32
    %c0_i32_1 = arith.constant 0 : i32
    return %c0_i32, %c0_i32_0 : i32, i32
  }
}

</mosaic_0001>

<bundles_post_ra>
// kernel: vit_wrapper_forward.1
= control target key start
LH: loop header
LB: loop body
LE: loop exit
PB: predicated region body
PF: predicated region fallthrough
CT: control target
= control target key end

     0   :  { %s5757_s0 = inlined_call_operand.vmem [shape: f32[8,192], index: 0, kind: input, shape index: {}]   ;;  %s5758_s1 = inlined_call_operand.vmem [shape: f32[192,32], index: 1, kind: input, shape index: {}]   ;;  %s5759_s2 = inlined_call_operand.vmem [shape: f32[1,32], index: 2, kind: input, shape index: {}]   ;;  %s5760_s3 = inlined_call_operand.vmem [shape: f32[5,32], index: 3, kind: input, shape index: {}]   ;;  %s5761_s4 = inlined_call_operand.vmem [shape: f32[1,32], index: 4, kind: input, shape index: {}]   ;;  %s5762_s5 = inlined_call_operand.vmem [shape: f32[1,32], index: 5, kind: input, shape index: {}]   ;;  %s5763_s6 = inlined_call_operand.vmem [shape: f32[1,32], index: 6, kind: input, shape index: {}]   ;;  %s5764_s7 = inlined_call_operand.vmem [shape: f32[1,32], index: 7, kind: input, shape index: {}]   ;;  %s5765_s8 = inlined_call_operand.vmem [shape: f32[2,1,32], index: 8, kind: input, shape index: {}]   ;;  %s5766_s9 = inlined_call_operand.vmem [shape: f32[2,1,32], index: 9, kind: input, shape index: {}]   ;;  %s5767_s10 = inlined_call_operand.vmem [shape: f32[2,1,32], index: 10, kind: input, shape index: {}]   ;;  %s5768_s11 = inlined_call_operand.vmem [shape: f32[2,1,32], index: 11, kind: input, shape index: {}]   ;;  %s5769_s12 = inlined_call_operand.vmem [shape: f32[2,32,96], index: 12, kind: input, shape index: {}]   ;;  %s5770_s13 = inlined_call_operand.vmem [shape: f32[2,1,96], index: 13, kind: input, shape index: {}]   ;;  %s5771_s14 = inlined_call_operand.vmem [shape: f32[2,32,32], index: 14, kind: input, shape index: {}]   ;;  %s5772_s15 = inlined_call_operand.vmem [shape: f32[2,1,32], index: 15, kind: input, shape index: {}]   ;;  %s5773_s16 = inlined_call_operand.vmem [shape: f32[2,32,128], index: 16, kind: input, shape index: {}]   ;;  %s5774_s17 = inlined_call_operand.vmem [shape: f32[2,1,128], index: 17, kind: input, shape index: {}]   ;;  %s5775_s18 = inlined_call_operand.vmem [shape: f32[2,128,32], index: 18, kind: input, shape index: {}]   ;;  %s5776_s19 = inlined_call_operand.vmem [shape: f32[2,1,32], index: 19, kind: input, shape index: {}]   ;;  %s5777_s20 = inlined_call_operand.hbm [shape: f32[8,32], index: 20, kind: output, shape index: {}]  }
   0x1   :  { %5792 = sst [smem:[#allocation5_spill]] %s5757_s0 }
   0x2   :  { %5793 = sst [smem:[#allocation6_spill]] %s5758_s1 }
   0x3   :  { %5794 = sst [smem:[#allocation7_spill]] %s5759_s2 }
   0x4   :  { %5795 = sst [smem:[#allocation8_spill]] %s5760_s3 }
   0x5   :  { %5796 = sst [smem:[#allocation9_spill]] %s5761_s4 }
   0x6   :  { %s5797_s23 = sld [smem:[#allocation6_spill]]  ;;  %v4873_v3 = vmov 0.0|0.0   ;;  %vm92_vm0 = vcmask 523264   ;;  %s5798_s25 = sld [smem:[#allocation5_spill]] }
   0x7   :  { %4581 = vmatprep.subr.bf16.mxu0 %v4873_v3 }
   0xc   :  { %v68_v0 = vld [vmem:[%s5797_s23] sm:$0xff]  ;;  %v69_v1 = vld [vmem:[%s5797_s23 + $0x8] sm:$0xff]  ;;  %v70_v2 = vld [vmem:[%s5797_s23 + $0x10] sm:$0xff] }
   0xd   :  { %v4582_v4 = vpack.c.bf16 %v69_v1, %v68_v0  ;;  %v71_v5 = vld [vmem:[%s5797_s23 + $0x18] sm:$0xff]  ;;  %v72_v7 = vld [vmem:[%s5797_s23 + $0x20] sm:$0xff]  ;;  %v73_v8 = vld [vmem:[%s5797_s23 + $0x28] sm:$0xff] }
   0xe   :  { %v4585_v6 = vpack.c.bf16 %v71_v5, %v70_v2  ;;  %v4588_v9 = vpack.c.bf16 %v73_v8, %v72_v7  ;;  %v74_v10 = vld [vmem:[%s5797_s23 + $0x30] sm:$0xff]  ;;  %v75_v11 = vld [vmem:[%s5797_s23 + $0x38] sm:$0xff]  ;;  %v67_v12 = vld [vmem:[%s5798_s25 + $0x8] sm:$0xff] }
   0xf   :  { %4583 = vmatpush1.bf16.msra.mxu0 %v4582_v4 }
  0x10   :  { %4584 = vmatprep.subr.bf16.mxu0 %v4873_v3 }
  0x13   :  { %4586 = vmatpush1.bf16.msra.mxu0 %v4585_v6 }
  0x14   :  { %4587 = vmatprep.subr.bf16.mxu0 %v4873_v3 }
  0x15   :  { %25 = vsyncpa [#allocation3], 0  ;;  %4012 = vmatprep.mubr.msk.f32.mxu0 %vm92_vm0, %v67_v12  ;;  %v4591_v13 = vpack.c.bf16 %v75_v11, %v74_v10  ;;  %v76_v14 = vld [vmem:[%s5797_s23 + $0x40] sm:$0xff]  ;;  %v77_v15 = vld [vmem:[%s5797_s23 + $0x48] sm:$0xff]  ;;  %v172_v39 = vlaneseq  ;;  %s5799_s22 = sld [smem:[#allocation7_spill]]  ;;  %s5800_s3 = sld [smem:[#allocation8_spill]] }
  0x16   :  { %v4594_v16 = vpack.c.bf16 %v77_v15, %v76_v14  ;;  %v78_v17 = vld [vmem:[%s5797_s23 + $0x50] sm:$0xff]  ;;  %v79_v18 = vld [vmem:[%s5797_s23 + $0x58] sm:$0xff]  ;;  %v80_v20 = vld [vmem:[%s5797_s23 + $0x60] sm:$0xff]  ;;  %vm179_vm1 = vcmask 1040384   ;;  %vm181_vm2 = vcmask 1044480   ;;  %vm183_vm3 = vcmask 1045504  }
  0x17   :  { %4589 = vmatpush1.bf16.msra.mxu0 %v4588_v9  ;;  %v4597_v19 = vpack.c.bf16 %v79_v18, %v78_v17  ;;  %v81_v21 = vld [vmem:[%s5797_s23 + $0x68] sm:$0xff]  ;;  %v82_v23 = vld [vmem:[%s5797_s23 + $0x70] sm:$0xff]  ;;  %v83_v24 = vld [vmem:[%s5797_s23 + $0x78] sm:$0xff]  ;;  %v173_v40 = vshrl.u32 %v172_v39, 7  ;;  %vm193_vm4 = vcmask 261120   ;;  %vm197_vm5 = vcmask 254976  }
  0x18   :  { %4590 = vmatprep.subr.bf16.mxu0 %v4873_v3  ;;  %v4600_v22 = vpack.c.bf16 %v81_v21, %v80_v20  ;;  %v4603_v25 = vpack.c.bf16 %v83_v24, %v82_v23  ;;  %v84_v26 = vld [vmem:[%s5797_s23 + $0x80] sm:$0xff]  ;;  %v85_v27 = vld [vmem:[%s5797_s23 + $0x88] sm:$0xff]  ;;  %v86_v29 = vld [vmem:[%s5797_s23 + $0x90] sm:$0xff]  ;;  %s5801_s26 = sld [smem:[#allocation9_spill]]  ;;  %vm4875_vm6 = vmmov 0   ;;  %s4876_s27 = smov 96  }
  0x19   :  { %v4606_v28 = vpack.c.bf16 %v85_v27, %v84_v26  ;;  %v87_v30 = vld [vmem:[%s5797_s23 + $0x98] sm:$0xff]  ;;  %v88_v32 = vld [vmem:[%s5797_s23 + $0xa0] sm:$0xff]  ;;  %v89_v33 = vld [vmem:[%s5797_s23 + $0xa8] sm:$0xff]  ;;  %v174_v41 = vsub.s32 0, %v173_v40  ;;  %s4877_s28 = smov 88   ;;  %vm379_vm7 = vcmask 64512  }
  0x1a   :  { %v4609_v31 = vpack.c.bf16 %v87_v30, %v86_v29  ;;  %v4612_v34 = vpack.c.bf16 %v89_v33, %v88_v32  ;;  %v90_v35 = vld [vmem:[%s5797_s23 + $0xb0] sm:$0xff]  ;;  %v91_v36 = vld [vmem:[%s5797_s23 + $0xb8] sm:$0xff]  ;;  %v66_v38 = vld [vmem:[%s5798_s25] sm:$0xff]  ;;  %vm455_vm8 = vcmask 36864   ;;  %s4879_s4 = smov 120   ;;  %vm469_vm9 = vcmask 39936  }
  0x1b   :  { %4592 = vmatpush1.bf16.msra.mxu0 %v4591_v13  ;;  %v4615_v37 = vpack.c.bf16 %v91_v36, %v90_v35  ;;  %v167_v42 = vld [vmem:[%s5799_s22] sm:$0x1]  ;;  %v283_v33 = vld [vmem:[%s5769_s12 + $0x8] sm:$0xff]  ;;  %v285_v36 = vld [vmem:[%s5769_s12 + $0x18] sm:$0xff]  ;;  %s4880_s29 = smov 56   ;;  %s5786_s30 = smov 112  }
  0x1c   :  { %4593 = vmatprep.subr.bf16.mxu0 %v4873_v3  ;;  %v166_v43 = vld [vmem:[%s5800_s3] sm:$0x1f]  ;;  %v175_v45 = vrot.slane %v167_v42, %v174_v41  ;;  %s4882_s0 = smov 80   ;;  %s4883_s21 = smov 72   ;;  %vm1061_vm10 = vcmask 1042432   ;;  %vm1056_vm11 = vcmask 130048  }
  0x1d   :  { %v186_v48 = vrot.slane %v166_v43, 3  ;;  %v4014_v13 = vld [vmem:[%s5762_s5] ss:$0 sm:$0xff]  ;;  %s4878_s5 = smov 64   ;;  %s5784_s1 = smov 104   ;;  %vm1058_vm12 = vcmask 195584  }
  0x1e   :  { %v4013_v11 = vld [vmem:[%s5801_s26] ss:$0 sm:$0xff]  ;;  %s5780_s22 = smov 48   ;;  %s5782_s24 = smov 40   ;;  %vm3966_vm13 = vcmask 1043456  }
  0x1f   :  { %4595 = vmatpush1.bf16.msra.mxu0 %v4594_v16  ;;  %v188_v51 = vsel %vm181_vm2, %v166_v43, %v186_v48  ;;  %v282_v32 = vld [vmem:[%s5769_s12] sm:$0xff]  ;;  %s4887_s2 = smov 8   ;;  %s5790_s3 = smov 16  }
  0x20   :  { %4596 = vmatprep.subr.bf16.mxu0 %v4873_v3  ;;  %v4617_v35 = vpack.c.bf16 %v283_v33, %v282_v32 }
  0x22   :  { %4618 = vmatprep.subr.bf16.mxu1 %v4617_v35 }
  0x23   :  { %4598 = vmatpush1.bf16.msra.mxu0 %v4597_v19  ;;  %4620 = vmatpush3.bf16.msra.mxu1 %v4617_v35 }
  0x24   :  { %4599 = vmatprep.subr.bf16.mxu0 %v4873_v3 }
  0x27   :  { %4601 = vmatpush1.bf16.msra.mxu0 %v4600_v22 }
  0x28   :  { %4602 = vmatprep.subr.bf16.mxu0 %v4873_v3 }
  0x2b   :  { %4604 = vmatpush1.bf16.msra.mxu0 %v4603_v25 }
  0x2c   :  { %4605 = vmatprep.subr.bf16.mxu0 %v4873_v3 }
  0x2f   :  { %4607 = vmatpush1.bf16.msra.mxu0 %v4606_v28 }
  0x30   :  { %4608 = vmatprep.subr.bf16.mxu0 %v4873_v3 }
  0x33   :  { %4610 = vmatpush1.bf16.msra.mxu0 %v4609_v31 }
  0x34   :  { %4611 = vmatprep.subr.bf16.mxu0 %v4873_v3 }
  0x37   :  { %4613 = vmatpush1.bf16.msra.mxu0 %v4612_v34  ;;  %v284_v34 = vld [vmem:[%s5769_s12 + $0x10] sm:$0xff] }
  0x38   :  { %4614 = vmatprep.subr.bf16.mxu0 %v4873_v3 }
  0x3b   :  { %4616 = vmatpush1.bf16.msra.mxu0 %v4615_v37  ;;  %v4621_v37 = vpack.c.bf16 %v285_v36, %v284_v34 }
  0x3d   :  { %4622 = vmatprep.subr.bf16.mxu1 %v4621_v37 }
  0x3e   :  { %161 = vmatmul.mubr.f32.vlgmr.msra.gmra.mrb[0].mxu0 %v66_v38  ;;  %4624 = vmatpush3.bf16.msra.mxu1 %v4621_v37 }
 0x111   :  { %v162_v44 = vpop.f32.mrb[0].mxu0 }
 0x112   :  { %v169_v46 = vrot.slane %v162_v44, 7  ;;  %v164_v47 = vpop.f32.mrb[1].mxu0  ;;  %v177_v49 = vrot.slane %v162_v44, 6 }
 0x113   :  { %v4016_v47 = vld [vmem:[%s5766_s9] ss:$0 sm:$0xff] }
 0x114   :  { %v180_v50 = vsel %vm179_vm1, %v167_v42, %v169_v46  ;;  %v190_v56 = vadd.f32 %v186_v48, %v177_v49 }
 0x115   :  { %v182_v52 = vsel %vm181_vm2, %v180_v50, %v175_v45  ;;  %v4015_v45 = vld [vmem:[%s5765_s8] ss:$0 sm:$0xff] }
 0x116   :  { %v184_v53 = vsel %vm183_vm3, %v182_v52, %v177_v49  ;;  %v198_v57 = vsel %vm197_vm5, %v190_v56, 0.0 }
 0x117   :  { %v189_v54 = vadd.f32 %v188_v51, %v184_v53 }
 0x119   :  { %v194_v55 = vsel %vm193_vm4, %v189_v54, 0.0 }
 0x11a   :  { %195 = vadd.xlane.f32.xlu0 %v194_v55  ;;  %v4017_v55 = vld [vmem:[%s5770_s13] ss:$0 sm:$0xff] }
 0x11e   :  { %199 = vadd.xlane.f32.xlu0 %v198_v57 }
 0x1a7   :  { %v196_v58 = vpop.xlane.xlu0 %195 }
 0x1a8   :  { %v202_v59 = vmul.f32 0.03125, %v196_v58 }
 0x1aa   :  { %v204_v60 = vsub.f32 %v189_v54, %v202_v59  ;;  %v4874_v54 = vmov 0.0  }
 0x1ab   :  { %v200_v61 = vpop.xlane.xlu0 %199  ;;  %4296 = vmatprep.subr.mxu1 %v4874_v54  ;;  %4346 = vmatprep.subr.mxu0 %v4874_v54 }
 0x1ac   :  { %v203_v62 = vmul.f32 0.03125, %v200_v61  ;;  %v206_v63 = vmul.f32 %v204_v60, %v204_v60  ;;  %4348 = vmatprep.mubr.msk.f32.mxu0 %vm4875_vm6, %v4874_v54 }
 0x1ae   :  { %v205_v0 = vsub.f32 %v190_v56, %v203_v62  ;;  %v208_v1 = vsel %vm193_vm4, %v206_v63, 0.0 }
 0x1af   :  { %209 = vadd.xlane.f32.xlu1 %v208_v1 }
 0x1b0   :  { %v207_v2 = vmul.f32 %v205_v0, %v205_v0 }
 0x1b2   :  { %v211_v3 = vsel %vm197_vm5, %v207_v2, 0.0 }
 0x1b3   :  { %212 = vadd.xlane.f32.xlu1 %v211_v3 }
 0x23c   :  { %v210_v4 = vpop.xlane.xlu1 %209 }
 0x23d   :  { %v214_v5 = vmul.f32 0.03125, %v210_v4 }
 0x23f   :  { %v216_v6 = vadd.f32 1e-05, %v214_v5 }
 0x240   :  { %v213_v7 = vpop.xlane.xlu1 %212 }
 0x241   :  { %4747 = vrsqrt.f32 %v216_v6  ;;  %v215_v8 = vmul.f32 0.03125, %v213_v7 }
 0x243   :  { %v217_v9 = vadd.f32 1e-05, %v215_v8 }
 0x245   :  { %4749 = vrsqrt.f32 %v217_v9 }
 0x24b   :  { %v4748_v10 = vpop.eup %4747 }
 0x24c   :  { %v220_v12 = vmul.f32 %v4748_v10, %v204_v60 }
 0x24e   :  { %v228_v14 = vmul.f32 %v4013_v11, %v220_v12 }
 0x24f   :  { %v4750_v15 = vpop.eup %4749 }
 0x250   :  { %v5093_v16 = vadd.f32 %v4014_v13, %v228_v14  ;;  %v221_v17 = vmul.f32 %v4750_v15, %v205_v0 }
 0x252   :  { %v240_v18 = vsel %vm193_vm4, %v5093_v16, 0.0  ;;  %v229_v19 = vmul.f32 %v4013_v11, %v221_v17 }
 0x253   :  { %241 = vadd.xlane.f32.xlu0 %v240_v18 }
 0x254   :  { %v5097_v20 = vadd.f32 %v4014_v13, %v229_v19 }
 0x256   :  { %v243_v21 = vsel %vm197_vm5, %v5097_v20, 0.0 }
 0x257   :  { %244 = vadd.xlane.f32.xlu1 %v243_v21 }
 0x2e0   :  { %v242_v22 = vpop.xlane.xlu0 %241 }
 0x2e1   :  { %v246_v23 = vmul.f32 0.03125, %v242_v22 }
 0x2e3   :  { %v248_v24 = vsub.f32 %v5093_v16, %v246_v23 }
 0x2e4   :  { %v245_v25 = vpop.xlane.xlu1 %244 }
 0x2e5   :  { %v247_v26 = vmul.f32 0.03125, %v245_v25  ;;  %v250_v27 = vmul.f32 %v248_v24, %v248_v24 }
 0x2e7   :  { %v249_v28 = vsub.f32 %v5097_v20, %v247_v26  ;;  %v252_v29 = vsel %vm193_vm4, %v250_v27, 0.0 }
 0x2e8   :  { %253 = vadd.xlane.f32.xlu0 %v252_v29 }
 0x2e9   :  { %v251_v30 = vmul.f32 %v249_v28, %v249_v28 }
 0x2eb   :  { %v255_v31 = vsel %vm197_vm5, %v251_v30, 0.0 }
 0x2ec   :  { %256 = vadd.xlane.f32.xlu1 %v255_v31 }
 0x375   :  { %v254_v38 = vpop.xlane.xlu0 %253 }
 0x376   :  { %v258_v39 = vmul.f32 0.03125, %v254_v38 }
 0x378   :  { %v260_v40 = vadd.f32 1e-05, %v258_v39 }
 0x379   :  { %v257_v41 = vpop.xlane.xlu1 %256 }
 0x37a   :  { %4751 = vrsqrt.f32 %v260_v40  ;;  %v259_v42 = vmul.f32 0.03125, %v257_v41 }
 0x37c   :  { %v261_v43 = vadd.f32 1e-05, %v259_v42 }
 0x37e   :  { %4753 = vrsqrt.f32 %v261_v43 }
 0x384   :  { %v4752_v44 = vpop.eup %4751 }
 0x385   :  { %v264_v46 = vmul.f32 %v4752_v44, %v248_v24 }
 0x387   :  { %v272_v48 = vmul.f32 %v4015_v45, %v264_v46 }
 0x388   :  { %v4754_v49 = vpop.eup %4753 }
 0x389   :  { %v265_v50 = vmul.f32 %v4754_v49, %v249_v28  ;;  %v280_v51 = vadd.f32 %v4016_v47, %v272_v48 }
 0x38b   :  { %v273_v52 = vmul.f32 %v4015_v45, %v265_v50  ;;  %4293 = vmatprep.mubr.msk.f32.mxu1 %vm193_vm4, %v280_v51 }
 0x38d   :  { %v281_v53 = vadd.f32 %v4016_v47, %v273_v52 }
 0x38f   :  { %4294 = vmatmul.mubr.msk.f32.vlgmr.msra.gmra.mrb[0].mxu1 %vm193_vm4, %v281_v53 }
 0x390   :  { %4298 = vmatprep.mubr.msk.f32.mxu1 %vm4875_vm6, %v4874_v54 }
 0x462   :  { %v4295_v56 = vpop.f32.mrb[0].mxu1 }
 0x463   :  { %v5134_v57 = vadd.f32 %v4295_v56, %v4017_v55  ;;  %v365_v58 = vpop.f32.mrb[1].mxu1 }
 0x464   :  { %v5136_v59 = vadd.f32 %v4017_v55, %v365_v58 }
 0x465   :  { %v1067_v35 = vrot.slane %v5134_v57, 5 }
 0x466   :  { %377 = vrot.lane.b32.xlu0 %v5136_v59, %s4876_s27  ;;  %v5144_v61 = vmul.f32 0.35355338, %v5136_v59  ;;  %v1066_v36 = vrot.slane %v5136_v59, 5 }
 0x468   :  { %v5197_v37 = vsel %vm1061_vm10, %v1066_v36, %v1067_v35 }
 0x46a   :  { %547 = vrot.lane.b32.xlu0 %v5136_v59, %s4877_s28 }
 0x4d8   :  { %v378_v60 = vpop.permute.xlu0 %377 }
 0x4d9   :  { %4297 = vmatpush3.xpose.msk.msra.mxu1 %vm379_vm7, %v378_v60 }
 0x4da   :  { %4301 = vmatprep.subr.mxu1 %v4874_v54 }
 0x4dc   :  { %4299 = vmatmul.mubr.msk.f32.vlgmr.msra.gmra.mrb[2].mxu1 %vm379_vm7, %v5144_v61  ;;  %v548_v10 = vpop.permute.xlu0 %547 }
 0x4dd   :  { %4303 = vmatprep.mubr.msk.f32.mxu1 %vm4875_vm6, %v4874_v54 }
 0x5af   :  { %v451_v62 = vpop.f32.mrb[2].mxu1 }
 0x5b0   :  { %v4300_v63 = vpop.f32.mrb[3].mxu1  ;;  %v456_v0 = vsel %vm455_vm8, %v451_v62, -inf }
 0x5b1   :  { %457 = vmax.xlane.f32.xlu1 %v456_v0  ;;  %v375_v0 = vmul.f32 0.35355338, %v5134_v57 }
 0x5c2   :  { %467 = vrot.lane.b32.xlu1 %v5136_v59, %s4878_s5 }
 0x63e   :  { %v458_v1 = vpop.xlane.xlu1 %457 }
 0x63f   :  { %v459_v2 = vsub.f32 %v451_v62, %v458_v1  ;;  %v1063_v1 = vrot.slane %v375_v0, 5 }
 0x641   :  { %v460_v3 = vmul.f32 1.442695, %v459_v2  ;;  %v1062_v2 = vrot.slane %v5144_v61, 5 }
 0x642   :  { %v468_v4 = vpop.permute.xlu1 %467 }
 0x643   :  { %4755 = vpow2.f32 %v460_v3  ;;  %4302 = vmatpush3.msk.msra.mxu1 %vm181_vm2, %v468_v4  ;;  %v1064_v3 = vsel %vm1061_vm10, %v1062_v2, %v1063_v1 }
 0x644   :  { %4306 = vmatprep.subr.mxu1 %v4874_v54 }
 0x64d   :  { %v4756_v5 = vpop.eup %4755 }
 0x64e   :  { %v462_v6 = vsel %vm455_vm8, %v4756_v5, 0.0 }
 0x64f   :  { %463 = vadd.xlane.f32.xlu1 %v462_v6 }
 0x660   :  { %545 = vrot.lane.b32.xlu1 %v5144_v61, %s4879_s4 }
 0x6dc   :  { %v464_v7 = vpop.xlane.xlu1 %463 }
 0x6dd   :  { %4757 = vrcp.f32 %v464_v7 }
 0x6e0   :  { %v546_v11 = vpop.permute.xlu1 %545 }
 0x6e7   :  { %v4758_v8 = vpop.eup %4757 }
 0x6e8   :  { %v466_v9 = vmul.f32 %v4758_v8, %v4756_v5 }
 0x6ea   :  { %4304 = vmatmul.mubr.msk.f32.vlgmr.msra.gmra.mrb[4].mxu1 %vm469_vm9, %v466_v9 }
 0x6eb   :  { %4307 = vmatpush3.xpose.msk.msra.mxu1 %vm379_vm7, %v548_v10  ;;  %4308 = vmatprep.mubr.msk.f32.mxu1 %vm4875_vm6, %v4874_v54 }
 0x6ec   :  { %4311 = vmatprep.subr.mxu1 %v4874_v54 }
 0x6ee   :  { %4309 = vmatmul.mubr.msk.f32.vlgmr.msra.gmra.mrb[6].mxu1 %vm379_vm7, %v546_v11 }
 0x6ef   :  { %4313 = vmatprep.mubr.msk.f32.mxu1 %vm4875_vm6, %v4874_v54 }
 0x7bd   :  { %v5167_v12 = vpop.f32.mrb[4].mxu1 }
 0x7be   :  { %v4305_v13 = vpop.f32.mrb[5].mxu1 }
 0x7c1   :  { %v619_v14 = vpop.f32.mrb[6].mxu1 }
 0x7c2   :  { %v4310_v15 = vpop.f32.mrb[7].mxu1  ;;  %v623_v17 = vsel %vm455_vm8, %v619_v14, -inf }
 0x7c3   :  { %624 = vmax.xlane.f32.xlu0 %v623_v17 }
 0x7d9   :  { %634 = vrot.lane.b32.xlu0 %v5136_v59, %s4880_s29 }
 0x7dd   :  { %711 = vrot.lane.b32.xlu0 %v5144_v61, %s5786_s30 }
 0x850   :  { %v625_v18 = vpop.xlane.xlu0 %624 }
 0x851   :  { %v626_v19 = vsub.f32 %v619_v14, %v625_v18 }
 0x853   :  { %v627_v21 = vmul.f32 1.442695, %v626_v19 }
 0x854   :  { %v635_v22 = vpop.permute.xlu0 %634 }
 0x855   :  { %4759 = vpow2.f32 %v627_v21  ;;  %4312 = vmatpush3.msk.msra.mxu1 %vm181_vm2, %v635_v22 }
 0x856   :  { %4316 = vmatprep.subr.mxu1 %v4874_v54 }
 0x858   :  { %v712_v29 = vpop.permute.xlu0 %711 }
 0x85f   :  { %v4760_v23 = vpop.eup %4759 }
 0x860   :  { %v629_v24 = vsel %vm455_vm8, %v4760_v23, 0.0 }
 0x861   :  { %630 = vadd.xlane.f32.xlu1 %v629_v24 }
 0x872   :  { %713 = vrot.lane.b32.xlu1 %v5136_v59, %s4882_s0 }
 0x8ee   :  { %v631_v25 = vpop.xlane.xlu1 %630 }
 0x8ef   :  { %4761 = vrcp.f32 %v631_v25 }
 0x8f2   :  { %v714_v28 = vpop.permute.xlu1 %713 }
 0x8f9   :  { %v4762_v26 = vpop.eup %4761 }
 0x8fa   :  { %v633_v27 = vmul.f32 %v4762_v26, %v4760_v23 }
 0x8fc   :  { %4314 = vmatmul.mubr.msk.f32.vlgmr.msra.gmra.mrb[8].mxu1 %vm469_vm9, %v633_v27 }
 0x8fd   :  { %4317 = vmatpush3.xpose.msk.msra.mxu1 %vm379_vm7, %v714_v28  ;;  %4318 = vmatprep.mubr.msk.f32.mxu1 %vm4875_vm6, %v4874_v54 }
 0x8fe   :  { %4321 = vmatprep.subr.mxu1 %v4874_v54 }
 0x900   :  { %4319 = vmatmul.mubr.msk.f32.vlgmr.msra.gmra.mrb[10].mxu1 %vm379_vm7, %v712_v29 }
 0x901   :  { %4323 = vmatprep.mubr.msk.f32.mxu1 %vm4875_vm6, %v4874_v54 }
 0x9cf   :  { %v5187_v30 = vpop.f32.mrb[8].mxu1 }
 0x9d0   :  { %v4315_v31 = vpop.f32.mrb[9].mxu1 }
 0x9d3   :  { %v785_v32 = vpop.f32.mrb[10].mxu1 }
 0x9d4   :  { %v4320_v33 = vpop.f32.mrb[11].mxu1  ;;  %v789_v34 = vsel %vm455_vm8, %v785_v32, -inf }
 0x9d5   :  { %790 = vmax.xlane.f32.xlu1 %v789_v34 }
 0x9e6   :  { %879 = vrot.lane.b32.xlu1 %v5136_v59, %s4883_s21 }
 0x9ea   :  { %877 = vrot.lane.b32.xlu1 %v5144_v61, %s5784_s1 }
 0x9ee   :  { %1069 = vrot.lane.b32.xlu1 %v5197_v37, %s4876_s27 }
 0xa62   :  { %v791_v38 = vpop.xlane.xlu1 %790 }
 0xa63   :  { %v792_v39 = vsub.f32 %v785_v32, %v791_v38 }
 0xa65   :  { %v793_v40 = vmul.f32 1.442695, %v792_v39 }
 0xa66   :  { %v880_v46 = vpop.permute.xlu1 %879 }
 0xa67   :  { %4763 = vpow2.f32 %v793_v40 }
 0xa6a   :  { %v878_v48 = vpop.permute.xlu1 %877 }
 0xa6e   :  { %v1070_v4 = vpop.permute.xlu1 %1069 }
 0xa71   :  { %v4764_v41 = vpop.eup %4763 }
 0xa72   :  { %v795_v42 = vsel %vm455_vm8, %v4764_v41, 0.0 }
 0xa73   :  { %796 = vadd.xlane.f32.xlu0 %v795_v42 }
 0xa89   :  { %800 = vrot.lane.b32.xlu0 %v5136_v59, %s5780_s22 }
 0xb00   :  { %v797_v43 = vpop.xlane.xlu0 %796 }
 0xb01   :  { %4765 = vrcp.f32 %v797_v43 }
 0xb04   :  { %v801_v44 = vpop.permute.xlu0 %800 }
 0xb05   :  { %4322 = vmatpush3.msk.msra.mxu1 %vm181_vm2, %v801_v44 }
 0xb06   :  { %4326 = vmatprep.subr.mxu1 %v4874_v54 }
 0xb0b   :  { %v4766_v45 = vpop.eup %4765 }
 0xb0c   :  { %v799_v47 = vmul.f32 %v4766_v45, %v4764_v41 }
 0xb0e   :  { %4324 = vmatmul.mubr.msk.f32.vlgmr.msra.gmra.mrb[12].mxu1 %vm469_vm9, %v799_v47 }
 0xb0f   :  { %4327 = vmatpush3.xpose.msk.msra.mxu1 %vm379_vm7, %v880_v46  ;;  %4328 = vmatprep.mubr.msk.f32.mxu1 %vm4875_vm6, %v4874_v54 }
 0xb10   :  { %4331 = vmatprep.subr.mxu1 %v4874_v54 }
 0xb12   :  { %4329 = vmatmul.mubr.msk.f32.vlgmr.msra.gmra.mrb[14].mxu1 %vm379_vm7, %v878_v48 }
 0xb13   :  { %4333 = vmatprep.mubr.msk.f32.mxu1 %vm4875_vm6, %v4874_v54 }
 0xbe1   :  { %v5214_v49 = vpop.f32.mrb[12].mxu1 }
 0xbe2   :  { %v4325_v50 = vpop.f32.mrb[13].mxu1 }
 0xbe5   :  { %v951_v51 = vpop.f32.mrb[14].mxu1 }
 0xbe6   :  { %v4330_v52 = vpop.f32.mrb[15].mxu1  ;;  %v955_v53 = vsel %vm455_vm8, %v951_v51, -inf }
 0xbe7   :  { %956 = vmax.xlane.f32.xlu0 %v955_v53 }
 0xbfd   :  { %966 = vrot.lane.b32.xlu0 %v5136_v59, %s5782_s24 }
 0xc01   :  { %1235 = vrot.lane.b32.xlu0 %v5197_v37, %s4877_s28 }
 0xc05   :  { %1401 = vrot.lane.b32.xlu0 %v5197_v37, %s4882_s0 }
 0xc09   :  { %1567 = vrot.lane.b32.xlu0 %v5197_v37, %s4883_s21 }
 0xc74   :  { %v957_v55 = vpop.xlane.xlu0 %956 }
 0xc75   :  { %v958_v56 = vsub.f32 %v951_v51, %v957_v55 }
 0xc77   :  { %v959_v58 = vmul.f32 1.442695, %v958_v56 }
 0xc78   :  { %v967_v60 = vpop.permute.xlu0 %966 }
 0xc79   :  { %4767 = vpow2.f32 %v959_v58  ;;  %4332 = vmatpush3.msk.msra.mxu1 %vm181_vm2, %v967_v60 }
 0xc7a   :  { %4336 = vmatprep.subr.mxu1 %v4874_v54 }
 0xc7c   :  { %v1236_v62 = vpop.permute.xlu0 %1235 }
 0xc7d   :  { %4347 = vmatpush3.xpose.msk.msra.mxu0 %vm379_vm7, %v1236_v62 }
 0xc7e   :  { %4356 = vmatprep.subr.mxu0 %v4874_v54 }
 0xc80   :  { %v1402_v6 = vpop.permute.xlu0 %1401 }
 0xc83   :  { %v4768_v59 = vpop.eup %4767 }
 0xc84   :  { %v961_v63 = vsel %vm455_vm8, %v4768_v59, 0.0  ;;  %v1568_v61 = vpop.permute.xlu0 %1567 }
 0xc85   :  { %962 = vadd.xlane.f32.xlu1 %v961_v63 }
 0xc96   :  { %1233 = vrot.lane.b32.xlu1 %v1064_v3, %s4879_s4 }
 0xc9a   :  { %1399 = vrot.lane.b32.xlu1 %v1064_v3, %s5786_s30 }
 0xc9e   :  { %1565 = vrot.lane.b32.xlu1 %v1064_v3, %s5784_s1  ;;  %s5806_s1 = smov 16  }
 0xd12   :  { %v963_v5 = vpop.xlane.xlu1 %962 }
 0xd13   :  { %4769 = vrcp.f32 %v963_v5  ;;  %v1751_v5 = vld [vmem:[%s5771_s14 + $0x8] sm:$0xff] }
 0xd16   :  { %v1234_v7 = vpop.permute.xlu1 %1233 }
 0xd17   :  { %4349 = vmatmul.mubr.msk.f32.vlgmr.msra.gmra.mrb[2].mxu0 %vm379_vm7, %v1234_v7 }
 0xd18   :  { %4357 = vmatpush3.xpose.msk.msra.mxu0 %vm379_vm7, %v1402_v6  ;;  %4358 = vmatprep.mubr.msk.f32.mxu0 %vm4875_vm6, %v4874_v54 }
 0xd19   :  { %4366 = vmatprep.subr.mxu0 %v4874_v54 }
 0xd1a   :  { %v1400_v57 = vpop.permute.xlu1 %1399 }
 0xd1b   :  { %4359 = vmatmul.mubr.msk.f32.vlgmr.msra.gmra.mrb[4].mxu0 %vm379_vm7, %v1400_v57 }
 0xd1c   :  { %4367 = vmatpush3.xpose.msk.msra.mxu0 %vm379_vm7, %v1568_v61  ;;  %4368 = vmatprep.mubr.msk.f32.mxu0 %vm4875_vm6, %v4874_v54  ;;  %v1752_v61 = vld [vmem:[%s5771_s14 + $0x10] sm:$0xff] }
 0xd1d   :  { %v4770_v8 = vpop.eup %4769 }
 0xd1e   :  { %v965_v9 = vmul.f32 %v4770_v8, %v4768_v59  ;;  %v1566_v10 = vpop.permute.xlu1 %1565  ;;  %v1753_v8 = vld [vmem:[%s5771_s14 + $0x18] sm:$0xff] }
 0xd1f   :  { %4369 = vmatmul.mubr.msk.f32.vlgmr.msra.gmra.mrb[6].mxu0 %vm379_vm7, %v1566_v10 }
 0xd20   :  { %4334 = vmatmul.mubr.msk.f32.vlgmr.msra.gmra.mrb[16].mxu1 %vm469_vm9, %v965_v9  ;;  %v4629_v9 = vpack.c.bf16 %v1753_v8, %v1752_v61  ;;  %v1995_v8 = vld [vmem:[%s5775_s18] sm:$0xff] }
 0xd21   :  { %4337 = vmatpush3.xpose.msk.msra.mxu1 %vm379_vm7, %v1070_v4  ;;  %4338 = vmatprep.mubr.msk.f32.mxu1 %vm4875_vm6, %v4874_v54  ;;  %v1750_v4 = vld [vmem:[%s5771_s14] sm:$0xff] }
 0xd22   :  { %4341 = vmatprep.subr.mxu1 %v4874_v54  ;;  %v4625_v6 = vpack.c.bf16 %v1751_v5, %v1750_v4 }
 0xd24   :  { %4339 = vmatmul.mubr.msk.f32.vlgmr.msra.gmra.mrb[18].mxu1 %vm379_vm7, %v1064_v3 }
 0xd25   :  { %4343 = vmatprep.mubr.msk.f32.mxu1 %vm4875_vm6, %v4874_v54 }
 0xdea   :  { %v1307_v11 = vpop.f32.mrb[2].mxu0 }
 0xdeb   :  { %v4350_v13 = vpop.f32.mrb[3].mxu0  ;;  %v1311_v14 = vsel %vm455_vm8, %v1307_v11, -inf }
 0xdec   :  { %1312 = vmax.xlane.f32.xlu1 %v1311_v14 }
 0xdee   :  { %v1473_v15 = vpop.f32.mrb[4].mxu0 }
 0xdef   :  { %v4360_v17 = vpop.f32.mrb[5].mxu0  ;;  %v1477_v26 = vsel %vm455_vm8, %v1473_v15, -inf }
 0xdf2   :  { %v1639_v18 = vpop.f32.mrb[6].mxu0 }
 0xdf3   :  { %v5255_v19 = vpop.f32.mrb[16].mxu1  ;;  %v4370_v21 = vpop.f32.mrb[7].mxu0  ;;  %v1643_v27 = vsel %vm455_vm8, %v1639_v18, -inf }
 0xdf4   :  { %v4335_v22 = vpop.f32.mrb[17].mxu1 }
 0xdf7   :  { %v1141_v23 = vpop.f32.mrb[18].mxu1 }
 0xdf8   :  { %v4340_v24 = vpop.f32.mrb[19].mxu1  ;;  %v1145_v25 = vsel %vm455_vm8, %v1141_v23, -inf }
 0xdf9   :  { %1146 = vmax.xlane.f32.xlu0 %v1145_v25 }
 0xdfd   :  { %1478 = vmax.xlane.f32.xlu0 %v1477_v26 }
 0xe01   :  { %1644 = vmax.xlane.f32.xlu0 %v1643_v27 }
 0xe79   :  { %v1313_v28 = vpop.xlane.xlu1 %1312 }
 0xe7a   :  { %v1314_v29 = vsub.f32 %v1307_v11, %v1313_v28 }
 0xe7c   :  { %v1315_v31 = vmul.f32 1.442695, %v1314_v29 }
 0xe7e   :  { %4771 = vpow2.f32 %v1315_v31 }
 0xe86   :  { %v1147_v32 = vpop.xlane.xlu0 %1146 }
 0xe87   :  { %v1148_v34 = vsub.f32 %v1141_v23, %v1147_v32 }
 0xe88   :  { %v4772_v33 = vpop.eup %4771 }
 0xe89   :  { %v1317_v35 = vsel %vm455_vm8, %v4772_v33, 0.0  ;;  %v1149_v39 = vmul.f32 1.442695, %v1148_v34 }
 0xe8a   :  { %1318 = vadd.xlane.f32.xlu1 %v1317_v35  ;;  %v1479_v36 = vpop.xlane.xlu0 %1478 }
 0xe8b   :  { %v1480_v38 = vsub.f32 %v1473_v15, %v1479_v36 }
 0xe8d   :  { %v1481_v40 = vmul.f32 1.442695, %v1480_v38 }
 0xe8e   :  { %v1645_v41 = vpop.xlane.xlu0 %1644 }
 0xe8f   :  { %4773 = vpow2.f32 %v1481_v40  ;;  %v1646_v42 = vsub.f32 %v1639_v18, %v1645_v41 }
 0xe90   :  { %4775 = vpow2.f32 %v1149_v39 }
 0xe91   :  { %v1647_v43 = vmul.f32 1.442695, %v1646_v42 }
 0xe93   :  { %4777 = vpow2.f32 %v1647_v43 }
 0xe99   :  { %v4774_v44 = vpop.eup %4773 }
 0xe9a   :  { %v1483_v45 = vsel %vm455_vm8, %v4774_v44, 0.0  ;;  %v4776_v46 = vpop.eup %4775 }
 0xe9b   :  { %1484 = vadd.xlane.f32.xlu0 %v1483_v45  ;;  %v1151_v48 = vsel %vm455_vm8, %v4776_v46, 0.0 }
 0xe9d   :  { %v4778_v47 = vpop.eup %4777 }
 0xe9e   :  { %v1649_v50 = vsel %vm455_vm8, %v4778_v47, 0.0 }
 0xe9f   :  { %1152 = vadd.xlane.f32.xlu0 %v1151_v48  ;;  %1650 = vadd.xlane.f32.xlu1 %v1649_v50 }
 0xeb0   :  { %1322 = vrot.lane.b32.xlu1 %v5197_v37, %s4880_s29 }
 0xeb4   :  { %1488 = vrot.lane.b32.xlu1 %v5197_v37, %s5780_s22  ;;  %s5788_s22 = smov 24  }
 0xeb5   :  { %1156 = vrot.lane.b32.xlu0 %v5197_v37, %s4878_s5 }
 0xeb8   :  { %1654 = vrot.lane.b32.xlu1 %v5197_v37, %s5782_s24  ;;  %s5807_s24 = smov 24  }
 0xeb9   :  { %1044 = vrot.lane.b32.xlu0 %v5187_v30, %s4887_s2 }
 0xf17   :  { %v1319_v53 = vpop.xlane.xlu1 %1318 }
 0xf28   :  { %v1485_v51 = vpop.xlane.xlu0 %1484 }
 0xf2c   :  { %v1153_v52 = vpop.xlane.xlu0 %1152  ;;  %v1651_v56 = vpop.xlane.xlu1 %1650 }
 0xf2d   :  { %4779 = vrcp.f32 %v1153_v52  ;;  %v1888_v52 = vld [vmem:[%s5773_s16 + $0x8] sm:$0xff] }
 0xf2e   :  { %4781 = vrcp.f32 %v1319_v53 }
 0xf2f   :  { %4783 = vrcp.f32 %v1485_v51  ;;  %v1887_v51 = vld [vmem:[%s5773_s16] sm:$0xff] }
 0xf30   :  { %v1157_v55 = vpop.permute.xlu0 %1156  ;;  %v1323_v58 = vpop.permute.xlu1 %1322  ;;  %4785 = vrcp.f32 %v1651_v56  ;;  %v4633_v53 = vpack.c.bf16 %v1888_v52, %v1887_v51  ;;  %v1890_v56 = vld [vmem:[%s5773_s16 + $0x18] sm:$0xff] }
 0xf31   :  { %4342 = vmatpush3.msk.msra.mxu1 %vm181_vm2, %v1157_v55  ;;  %v1889_v55 = vld [vmem:[%s5773_s16 + $0x10] sm:$0xff] }
 0xf32   :  { %4351 = vmatprep.subr.mxu1 %v4874_v54 }
 0xf34   :  { %v1489_v59 = vpop.permute.xlu1 %1488  ;;  %v1045_v18 = vpop.permute.xlu0 %1044 }
 0xf35   :  { %v1055_v27 = vsel %vm379_vm7, %v5167_v12, %v1045_v18 }
 0xf37   :  { %v4780_v60 = vpop.eup %4779 }
 0xf38   :  { %v1155_v37 = vmul.f32 %v4780_v60, %v4776_v46  ;;  %v4782_v62 = vpop.eup %4781  ;;  %v1655_v2 = vpop.permute.xlu1 %1654 }
 0xf39   :  { %v1321_v30 = vmul.f32 %v4782_v62, %v4772_v33  ;;  %v4784_v63 = vpop.eup %4783  ;;  %v4052_v33 = vld [vmem:[%s5772_s15] ss:$0 sm:$0xff] }
 0xf3a   :  { %4344 = vmatmul.mubr.msk.f32.vlgmr.msra.gmra.mrb[20].mxu1 %vm469_vm9, %v1155_v37  ;;  %v1487_v0 = vmul.f32 %v4784_v63, %v4774_v44  ;;  %v4786_v1 = vpop.eup %4785 }
 0xf3b   :  { %4352 = vmatpush3.msk.msra.mxu1 %vm181_vm2, %v1323_v58  ;;  %4353 = vmatprep.mubr.msk.f32.mxu1 %vm4875_vm6, %v4874_v54  ;;  %v1653_v3 = vmul.f32 %v4786_v1, %v4778_v47  ;;  %v4637_v58 = vpack.c.bf16 %v1890_v56, %v1889_v55  ;;  %v4055_v1 = vld [vmem:[%s5767_s10] ss:$0 sm:$0xff] }
 0xf3c   :  { %4361 = vmatprep.subr.mxu1 %v4874_v54 }
 0xf3e   :  { %4354 = vmatmul.mubr.msk.f32.vlgmr.msra.gmra.mrb[22].mxu1 %vm469_vm9, %v1321_v30 }
 0xf3f   :  { %4362 = vmatpush3.msk.msra.mxu1 %vm181_vm2, %v1489_v59  ;;  %4363 = vmatprep.mubr.msk.f32.mxu1 %vm4875_vm6, %v4874_v54 }
 0xf40   :  { %4371 = vmatprep.subr.mxu1 %v4874_v54 }
 0xf42   :  { %4364 = vmatmul.mubr.msk.f32.vlgmr.msra.gmra.mrb[24].mxu1 %vm469_vm9, %v1487_v0 }
 0xf43   :  { %4372 = vmatpush3.msk.msra.mxu1 %vm181_vm2, %v1655_v2  ;;  %4373 = vmatprep.mubr.msk.f32.mxu1 %vm4875_vm6, %v4874_v54 }
 0xf44   :  { %4626 = vmatprep.subr.bf16.mxu1 %v4625_v6 }
 0xf46   :  { %4374 = vmatmul.mubr.msk.f32.vlgmr.msra.gmra.mrb[26].mxu1 %vm469_vm9, %v1653_v3  ;;  %v4056_v3 = vld [vmem:[%s5768_s11] ss:$0 sm:$0xff] }
 0xf47   :  { %4628 = vmatpush3.bf16.msra.mxu1 %v4625_v6 }
 0xf48   :  { %4630 = vmatprep.subr.bf16.mxu1 %v4629_v9 }
 0xf4b   :  { %4632 = vmatpush3.bf16.msra.mxu1 %v4629_v9  ;;  %v1996_v9 = vld [vmem:[%s5775_s18 + $0x8] sm:$0xff] }
 0xf4c   :  { %4634 = vmatprep.subr.bf16.mxu1 %v4633_v53 }
0x100d   :  { %v1229_v7 = vpop.f32.mrb[20].mxu1 }
0x100e   :  { %v4345_v57 = vpop.f32.mrb[21].mxu1 }
0x1011   :  { %v1395_v10 = vpop.f32.mrb[22].mxu1 }
0x1012   :  { %1732 = vrot.lane.b32.xlu0 %v1395_v10, %s4887_s2  ;;  %v4355_v11 = vpop.f32.mrb[23].mxu1  ;;  %v4641_v10 = vpack.c.bf16 %v1996_v9, %v1995_v8  ;;  %v4069_v8 = vld [vmem:[%s5769_s12 + $0x30] sm:$0xff]  ;;  %v4070_v9 = vld [vmem:[%s5769_s12 + $0x38] sm:$0xff] }
0x1013   :  { %v1997_v11 = vld [vmem:[%s5775_s18 + $0x10] sm:$0xff] }
0x1014   :  { %4642 = vmatprep.subr.bf16.mxu0 %v4641_v10 }
0x1015   :  { %v1561_v13 = vpop.f32.mrb[24].mxu1  ;;  %4644 = vmatpush3.bf16.msra.mxu0 %v4641_v10  ;;  %v4677_v10 = vpack.c.bf16 %v4070_v9, %v4069_v8 }
0x1016   :  { %1048 = vrot.lane.b32.xlu0 %v5214_v49, %s5790_s3  ;;  %1736 = vrot.lane.b32.xlu1 %v1561_v13, %s5790_s3  ;;  %v4365_v14 = vpop.f32.mrb[25].mxu1  ;;  %v1998_v13 = vld [vmem:[%s5775_s18 + $0x18] sm:$0xff] }
0x1017   :  { %v4645_v14 = vpack.c.bf16 %v1998_v13, %v1997_v11 }
0x1019   :  { %v1727_v15 = vpop.f32.mrb[26].mxu1  ;;  %4646 = vmatprep.subr.bf16.mxu0 %v4645_v14 }
0x101a   :  { %1740 = vrot.lane.b32.xlu1 %v1727_v15, %s5788_s22  ;;  %v4375_v17 = vpop.f32.mrb[27].mxu1  ;;  %4648 = vmatpush3.bf16.msra.mxu0 %v4645_v14  ;;  %v1999_v15 = vld [vmem:[%s5775_s18 + $0x20] sm:$0xff] }
0x101b   :  { %v2000_v17 = vld [vmem:[%s5775_s18 + $0x28] sm:$0xff] }
0x101c   :  { %v4649_v18 = vpack.c.bf16 %v2000_v17, %v1999_v15 }
0x101e   :  { %1052 = vrot.lane.b32.xlu1 %v5255_v19, %s5788_s22  ;;  %4650 = vmatprep.subr.bf16.mxu0 %v4649_v18 }
0x101f   :  { %4652 = vmatpush3.bf16.msra.mxu0 %v4649_v18 }
0x1084   :  { %v1733_v21 = vpop.permute.xlu0 %1732 }
0x1085   :  { %v1743_v23 = vsel %vm379_vm7, %v1229_v7, %v1733_v21  ;;  %v2001_v21 = vld [vmem:[%s5775_s18 + $0x30] sm:$0xff] }
0x1088   :  { %v1737_v22 = vpop.permute.xlu1 %1736  ;;  %v1049_v25 = vpop.permute.xlu0 %1048 }
0x1089   :  { %v1744_v49 = vsel %vm1056_vm11, %v1743_v23, %v1737_v22  ;;  %v1057_v28 = vsel %vm1056_vm11, %v1055_v27, %v1049_v25  ;;  %v2002_v22 = vld [vmem:[%s5775_s18 + $0x38] sm:$0xff] }
0x108a   :  { %v4653_v23 = vpack.c.bf16 %v2002_v22, %v2001_v21  ;;  %v2006_v27 = vld [vmem:[%s5775_s18 + $0x58] sm:$0xff]  ;;  %v4065_v22 = vld [vmem:[%s5765_s8 + $0x1] ss:$0 sm:$0xff] }
0x108c   :  { %v1741_v24 = vpop.permute.xlu1 %1740  ;;  %4654 = vmatprep.subr.bf16.mxu0 %v4653_v23 }
0x108d   :  { %v1745_v26 = vsel %vm1058_vm12, %v1744_v49, %v1741_v24  ;;  %4656 = vmatpush3.bf16.msra.mxu0 %v4653_v23  ;;  %v2003_v49 = vld [vmem:[%s5775_s18 + $0x40] sm:$0xff]  ;;  %v2004_v24 = vld [vmem:[%s5775_s18 + $0x48] sm:$0xff] }
0x108e   :  { %v1747_v29 = vrot.slane %v1745_v26, 3  ;;  %v4657_v25 = vpack.c.bf16 %v2004_v24, %v2003_v49  ;;  %v2005_v26 = vld [vmem:[%s5775_s18 + $0x50] sm:$0xff] }
0x1090   :  { %v1053_v19 = vpop.permute.xlu1 %1052  ;;  %4658 = vmatprep.subr.bf16.mxu0 %v4657_v25 }
0x1091   :  { %v1059_v31 = vsel %vm1058_vm12, %v1057_v28, %v1053_v19  ;;  %4660 = vmatpush3.bf16.msra.mxu0 %v4657_v25  ;;  %v4661_v28 = vpack.c.bf16 %v2006_v27, %v2005_v26  ;;  %v2008_v19 = vld [vmem:[%s5775_s18 + $0x68] sm:$0xff]  ;;  %v4066_v25 = vld [vmem:[%s5766_s9 + $0x1] ss:$0 sm:$0xff]  ;;  %s5802_s9 = smov 112  }
0x1092   :  { %v1749_v32 = vsel %vm181_vm2, %v1059_v31, %v1747_v29 }
0x1093   :  { %4384 = vmatprep.mubr.msk.f32.mxu1 %vm193_vm4, %v1749_v32  ;;  %4662 = vmatprep.subr.bf16.mxu0 %v4661_v28  ;;  %v2009_v32 = vld [vmem:[%s5775_s18 + $0x70] sm:$0xff] }
0x1094   :  { %4385 = vmatmul.mubr.msk.f32.vlgmr.msra.gmra.mrb[28].mxu1 %vm193_vm4, %v1747_v29  ;;  %v2007_v29 = vld [vmem:[%s5775_s18 + $0x60] sm:$0xff] }
0x1095   :  { %4636 = vmatpush3.bf16.msra.mxu1 %v4633_v53  ;;  %4664 = vmatpush3.bf16.msra.mxu0 %v4661_v28  ;;  %v4665_v31 = vpack.c.bf16 %v2008_v19, %v2007_v29  ;;  %v4062_v53 = vld [vmem:[%s5776_s19] ss:$0 sm:$0xff]  ;;  %v4072_v19 = vld [vmem:[%s5770_s13 + $0x1] ss:$0 sm:$0xff]  ;;  %s5803_s13 = smov 104  }
0x1096   :  { %4638 = vmatprep.subr.bf16.mxu1 %v4637_v58 }
0x1097   :  { %4666 = vmatprep.subr.bf16.mxu0 %v4665_v31 }
0x1099   :  { %4640 = vmatpush3.bf16.msra.mxu1 %v4637_v58  ;;  %4668 = vmatpush3.bf16.msra.mxu0 %v4665_v31 }
0x1167   :  { %v4386_v34 = vpop.f32.mrb[28].mxu1 }
0x1168   :  { %v1838_v35 = vadd.f32 %v4386_v34, %v4052_v33  ;;  %v1832_v36 = vpop.f32.mrb[29].mxu1 }
0x1169   :  { %v1833_v12 = vadd.f32 %v4052_v33, %v1832_v36  ;;  %v2010_v33 = vld [vmem:[%s5775_s18 + $0x78] sm:$0xff] }
0x116a   :  { %v5324_v38 = vadd.f32 %v1838_v35, %v5097_v20  ;;  %v4669_v34 = vpack.c.bf16 %v2010_v33, %v2009_v32  ;;  %v4057_v35 = vld [vmem:[%s5774_s17] ss:$0 sm:$0xff] }
0x116b   :  { %v5327_v39 = vadd.f32 %v1833_v12, %v5093_v16 }
0x116c   :  { %v1848_v40 = vsel %vm197_vm5, %v5324_v38, 0.0  ;;  %4670 = vmatprep.subr.bf16.mxu0 %v4669_v34 }
0x116d   :  { %1849 = vadd.xlane.f32.xlu1 %v1848_v40  ;;  %v1845_v41 = vsel %vm193_vm4, %v5327_v39, 0.0  ;;  %4672 = vmatpush3.bf16.msra.mxu0 %v4669_v34 }
0x116e   :  { %1846 = vadd.xlane.f32.xlu0 %v1845_v41  ;;  %4474 = vmatprep.subr.mxu0 %v4874_v54 }
0x11fa   :  { %v1850_v42 = vpop.xlane.xlu1 %1849 }
0x11fb   :  { %v1852_v43 = vmul.f32 0.03125, %v1850_v42  ;;  %v1847_v44 = vpop.xlane.xlu0 %1846 }
0x11fc   :  { %v1851_v45 = vmul.f32 0.03125, %v1847_v44 }
0x11fd   :  { %v1854_v46 = vsub.f32 %v5324_v38, %v1852_v43 }
0x11fe   :  { %v1853_v20 = vsub.f32 %v5327_v39, %v1851_v45 }
0x11ff   :  { %v1856_v48 = vmul.f32 %v1854_v46, %v1854_v46 }
0x1200   :  { %v1855_v47 = vmul.f32 %v1853_v20, %v1853_v20 }
0x1201   :  { %v1860_v50 = vsel %vm197_vm5, %v1856_v48, 0.0 }
0x1202   :  { %v1857_v16 = vsel %vm193_vm4, %v1855_v47, 0.0 }
0x1203   :  { %1858 = vadd.xlane.f32.xlu0 %v1857_v16 }
0x1207   :  { %1861 = vadd.xlane.f32.xlu0 %v1860_v50 }
0x1290   :  { %v1859_v60 = vpop.xlane.xlu0 %1858 }
0x1291   :  { %v1863_v37 = vmul.f32 0.03125, %v1859_v60 }
0x1293   :  { %v1865_v62 = vadd.f32 1e-05, %v1863_v37 }
0x1294   :  { %v1862_v30 = vpop.xlane.xlu0 %1861 }
0x1295   :  { %4787 = vrsqrt.f32 %v1865_v62  ;;  %v1864_v59 = vmul.f32 0.03125, %v1862_v30 }
0x1297   :  { %v1866_v63 = vadd.f32 1e-05, %v1864_v59 }
0x1299   :  { %4789 = vrsqrt.f32 %v1866_v63 }
0x129f   :  { %v4788_v0 = vpop.eup %4787 }
0x12a0   :  { %v1869_v2 = vmul.f32 %v4788_v0, %v1853_v20 }
0x12a2   :  { %v1877_v4 = vmul.f32 %v4055_v1, %v1869_v2 }
0x12a3   :  { %v4790_v5 = vpop.eup %4789 }
0x12a4   :  { %v1870_v6 = vmul.f32 %v4790_v5, %v1854_v46  ;;  %v1885_v7 = vadd.f32 %v4056_v3, %v1877_v4 }
0x12a6   :  { %v1878_v57 = vmul.f32 %v4055_v1, %v1870_v6  ;;  %4395 = vmatprep.mubr.msk.f32.mxu1 %vm193_vm4, %v1885_v7  ;;  %v4067_v7 = vld [vmem:[%s5769_s12 + $0x20] sm:$0xff] }
0x12a8   :  { %v1886_v61 = vadd.f32 %v4056_v3, %v1878_v57  ;;  %v4068_v57 = vld [vmem:[%s5769_s12 + $0x28] sm:$0xff] }
0x12aa   :  { %4396 = vmatmul.mubr.msk.f32.vlgmr.msra.gmra.mrb[30].mxu1 %vm193_vm4, %v1886_v61  ;;  %v4673_v61 = vpack.c.bf16 %v4068_v57, %v4067_v7 }
0x12ac   :  { %4674 = vmatprep.subr.bf16.mxu1 %v4673_v61 }
0x12ad   :  { %4676 = vmatpush3.bf16.msra.mxu1 %v4673_v61 }
0x12ae   :  { %4678 = vmatprep.subr.bf16.mxu1 %v4677_v10 }
0x12b1   :  { %4680 = vmatpush3.bf16.msra.mxu1 %v4677_v10 }
0x12b2   :  { %4444 = vmatprep.subr.mxu1 %v4874_v54 }
0x137d   :  { %v4397_v36 = vpop.f32.mrb[30].mxu1 }
0x137e   :  { %v1976_v12 = vadd.f32 %v4397_v36, %v4057_v35  ;;  %v1970_v40 = vpop.f32.mrb[31].mxu1 }
0x137f   :  { %v1971_v41 = vadd.f32 %v4057_v35, %v1970_v40 }
0x1380   :  { %v4061_v42 = vmul.f32 -1.702, %v1976_v12 }
0x1381   :  { %v4060_v43 = vmul.f32 -1.702, %v1971_v41 }
0x1382   :  { %v1985_v44 = vmul.f32 1.442695, %v4061_v42 }
0x1383   :  { %v1983_v45 = vmul.f32 1.442695, %v4060_v43 }
0x1384   :  { %4791 = vpow2.f32 %v1985_v44 }
0x1385   :  { %4793 = vpow2.f32 %v1983_v45 }
0x138e   :  { %v4792_v46 = vpop.eup %4791 }
0x138f   :  { %v4794_v20 = vpop.eup %4793  ;;  %v1988_v47 = vadd.f32 1.0, %v4792_v46 }
0x1390   :  { %v1987_v16 = vadd.f32 1.0, %v4794_v20 }
0x1391   :  { %4795 = vrcp.f32 %v1988_v47 }
0x1392   :  { %4797 = vrcp.f32 %v1987_v16 }
0x139b   :  { %v4796_v48 = vpop.eup %4795 }
0x139c   :  { %v4798_v50 = vpop.eup %4797  ;;  %v1994_v52 = vmul.f32 %v4796_v48, %v1976_v12 }
0x139d   :  { %v1993_v51 = vmul.f32 %v4798_v50, %v1971_v41 }
0x139f   :  { %4430 = vmatprep.mubr.f32.mxu0 %v1993_v51 }
0x13a0   :  { %4431 = vmatmul.mubr.f32.vlgmr.msra.gmra.mrb[8].mxu0 %v1994_v52 }
0x13a1   :  { %4476 = vmatprep.mubr.msk.f32.mxu0 %vm4875_vm6, %v4874_v54 }
0x1473   :  { %v4432_v55 = vpop.f32.mrb[8].mxu0 }
0x1474   :  { %v2090_v56 = vadd.f32 %v4432_v55, %v4062_v53  ;;  %v2084_v58 = vpop.f32.mrb[9].mxu0 }
0x1475   :  { %v2085_v60 = vadd.f32 %v4062_v53, %v2084_v58 }
0x1476   :  { %v5415_v37 = vadd.f32 %v2090_v56, %v5324_v38 }
0x1477   :  { %v5418_v62 = vadd.f32 %v2085_v60, %v5327_v39 }
0x1478   :  { %v2102_v30 = vsel %vm197_vm5, %v5415_v37, 0.0 }
0x1479   :  { %2103 = vadd.xlane.f32.xlu1 %v2102_v30  ;;  %v2099_v59 = vsel %vm193_vm4, %v5418_v62, 0.0 }
0x147a   :  { %2100 = vadd.xlane.f32.xlu0 %v2099_v59 }
0x1506   :  { %v2104_v63 = vpop.xlane.xlu1 %2103 }
0x1507   :  { %v2106_v0 = vmul.f32 0.03125, %v2104_v63  ;;  %v2101_v1 = vpop.xlane.xlu0 %2100 }
0x1508   :  { %v2105_v2 = vmul.f32 0.03125, %v2101_v1 }
0x1509   :  { %v2108_v3 = vsub.f32 %v5415_v37, %v2106_v0 }
0x150a   :  { %v2107_v38 = vsub.f32 %v5418_v62, %v2105_v2 }
0x150b   :  { %v2110_v4 = vmul.f32 %v2108_v3, %v2108_v3 }
0x150c   :  { %v2109_v5 = vmul.f32 %v2107_v38, %v2107_v38 }
0x150d   :  { %v2114_v39 = vsel %vm197_vm5, %v2110_v4, 0.0 }
0x150e   :  { %2115 = vadd.xlane.f32.xlu1 %v2114_v39  ;;  %v2111_v6 = vsel %vm193_vm4, %v2109_v5, 0.0 }
0x150f   :  { %2112 = vadd.xlane.f32.xlu0 %v2111_v6 }
0x159b   :  { %v2116_v11 = vpop.xlane.xlu1 %2115 }
0x159c   :  { %v2118_v13 = vmul.f32 0.03125, %v2116_v11  ;;  %v2113_v14 = vpop.xlane.xlu0 %2112 }
0x159d   :  { %v2117_v15 = vmul.f32 0.03125, %v2113_v14 }
0x159e   :  { %v2120_v17 = vadd.f32 1e-05, %v2118_v13 }
0x159f   :  { %v2119_v18 = vadd.f32 1e-05, %v2117_v15 }
0x15a0   :  { %4799 = vrsqrt.f32 %v2120_v17 }
0x15a1   :  { %4801 = vrsqrt.f32 %v2119_v18 }
0x15aa   :  { %v4800_v21 = vpop.eup %4799 }
0x15ab   :  { %v4802_v23 = vpop.eup %4801  ;;  %v2124_v49 = vmul.f32 %v4800_v21, %v2108_v3 }
0x15ac   :  { %v2123_v24 = vmul.f32 %v4802_v23, %v2107_v38 }
0x15ad   :  { %v2132_v26 = vmul.f32 %v4065_v22, %v2124_v49 }
0x15ae   :  { %v2131_v27 = vmul.f32 %v4065_v22, %v2123_v24 }
0x15af   :  { %v2140_v29 = vadd.f32 %v4066_v25, %v2132_v26 }
0x15b0   :  { %v2139_v28 = vadd.f32 %v4066_v25, %v2131_v27 }
0x15b2   :  { %4441 = vmatprep.mubr.msk.f32.mxu1 %vm193_vm4, %v2139_v28 }
0x15b3   :  { %4442 = vmatmul.mubr.msk.f32.vlgmr.msra.gmra.mrb[32].mxu1 %vm193_vm4, %v2140_v29 }
0x15b4   :  { %4446 = vmatprep.mubr.msk.f32.mxu1 %vm4875_vm6, %v4874_v54 }
0x1686   :  { %v4443_v31 = vpop.f32.mrb[32].mxu1 }
0x1687   :  { %v5454_v32 = vadd.f32 %v4443_v31, %v4072_v19  ;;  %v2226_v33 = vpop.f32.mrb[33].mxu1 }
0x1688   :  { %v5456_v34 = vadd.f32 %v4072_v19, %v2226_v33 }
0x1689   :  { %v2922_v59 = vrot.slane %v5454_v32, 5  ;;  %v2236_v7 = vmul.f32 0.35355338, %v5454_v32 }
0x168a   :  { %2238 = vrot.lane.b32.xlu0 %v5456_v34, %s4876_s27  ;;  %v5464_v36 = vmul.f32 0.35355338, %v5456_v34  ;;  %v2921_v63 = vrot.slane %v5456_v34, 5 }
0x168b   :  { %v2918_v57 = vrot.slane %v2236_v7, 5 }
0x168c   :  { %v5507_v0 = vsel %vm1061_vm10, %v2921_v63, %v2922_v59  ;;  %v2917_v61 = vrot.slane %v5464_v36, 5 }
0x168e   :  { %2405 = vrot.lane.b32.xlu0 %v5456_v34, %s4877_s28  ;;  %v2919_v8 = vsel %vm1061_vm10, %v2917_v61, %v2918_v57 }
0x16fc   :  { %v2239_v35 = vpop.permute.xlu0 %2238 }
0x16fd   :  { %4445 = vmatpush3.xpose.msk.msra.mxu1 %vm379_vm7, %v2239_v35 }
0x16fe   :  { %4449 = vmatprep.subr.mxu1 %v4874_v54 }
0x1700   :  { %4447 = vmatmul.mubr.msk.f32.vlgmr.msra.gmra.mrb[34].mxu1 %vm379_vm7, %v5464_v36  ;;  %v2406_v53 = vpop.permute.xlu0 %2405 }
0x1701   :  { %4451 = vmatprep.mubr.msk.f32.mxu1 %vm4875_vm6, %v4874_v54 }
0x17d3   :  { %v2311_v12 = vpop.f32.mrb[34].mxu1 }
0x17d4   :  { %v4448_v40 = vpop.f32.mrb[35].mxu1  ;;  %v2315_v41 = vsel %vm455_vm8, %v2311_v12, -inf }
0x17d5   :  { %2316 = vmax.xlane.f32.xlu1 %v2315_v41 }
0x17e6   :  { %2326 = vrot.lane.b32.xlu1 %v5456_v34, %s4878_s5 }
0x1862   :  { %v2317_v42 = vpop.xlane.xlu1 %2316 }
0x1863   :  { %v2318_v43 = vsub.f32 %v2311_v12, %v2317_v42 }
0x1865   :  { %v2319_v44 = vmul.f32 1.442695, %v2318_v43 }
0x1866   :  { %v2327_v45 = vpop.permute.xlu1 %2326 }
0x1867   :  { %4803 = vpow2.f32 %v2319_v44  ;;  %4450 = vmatpush3.msk.msra.mxu1 %vm181_vm2, %v2327_v45 }
0x1868   :  { %4454 = vmatprep.subr.mxu1 %v4874_v54 }
0x1871   :  { %v4804_v46 = vpop.eup %4803 }
0x1872   :  { %v2321_v20 = vsel %vm455_vm8, %v4804_v46, 0.0 }
0x1873   :  { %2322 = vadd.xlane.f32.xlu1 %v2321_v20 }
0x1884   :  { %2403 = vrot.lane.b32.xlu1 %v5464_v36, %s4879_s4 }
0x1888   :  { %2571 = vrot.lane.b32.xlu1 %v5456_v34, %s4882_s0 }
0x188c   :  { %2737 = vrot.lane.b32.xlu1 %v5456_v34, %s4883_s21 }
0x1900   :  { %v2323_v47 = vpop.xlane.xlu1 %2322 }
0x1901   :  { %4805 = vrcp.f32 %v2323_v47 }
0x1904   :  { %v2404_v16 = vpop.permute.xlu1 %2403 }
0x1908   :  { %v5483_v48 = vpop.permute.xlu1 %2571 }
0x190b   :  { %v4806_v50 = vpop.eup %4805 }
0x190c   :  { %v2325_v51 = vmul.f32 %v4806_v50, %v4804_v46  ;;  %v2738_v52 = vpop.permute.xlu1 %2737 }
0x190d   :  { %4475 = vmatpush3.xpose.msk.msra.mxu0 %vm379_vm7, %v2738_v52 }
0x190e   :  { %4452 = vmatmul.mubr.msk.f32.vlgmr.msra.gmra.mrb[36].mxu1 %vm469_vm9, %v2325_v51  ;;  %4484 = vmatprep.subr.mxu0 %v4874_v54 }
0x190f   :  { %4455 = vmatpush3.xpose.msk.msra.mxu1 %vm379_vm7, %v2406_v53  ;;  %4456 = vmatprep.mubr.msk.f32.mxu1 %vm4875_vm6, %v4874_v54 }
0x1910   :  { %4459 = vmatprep.subr.mxu1 %v4874_v54 }
0x1912   :  { %4457 = vmatmul.mubr.msk.f32.vlgmr.msra.gmra.mrb[38].mxu1 %vm379_vm7, %v2404_v16 }
0x1913   :  { %4461 = vmatprep.mubr.msk.f32.mxu1 %vm4875_vm6, %v4874_v54 }
0x19e1   :  { %v5495_v55 = vpop.f32.mrb[36].mxu1 }
0x19e2   :  { %v4453_v56 = vpop.f32.mrb[37].mxu1 }
0x19e5   :  { %v2477_v58 = vpop.f32.mrb[38].mxu1 }
0x19e6   :  { %v4458_v60 = vpop.f32.mrb[39].mxu1  ;;  %v2481_v30 = vsel %vm455_vm8, %v2477_v58, -inf }
0x19e7   :  { %2482 = vmax.xlane.f32.xlu0 %v2481_v30 }
0x19fd   :  { %2492 = vrot.lane.b32.xlu0 %v5456_v34, %s4880_s29 }
0x1a01   :  { %2569 = vrot.lane.b32.xlu0 %v5464_v36, %s5802_s9 }
0x1a05   :  { %2735 = vrot.lane.b32.xlu0 %v5464_v36, %s5803_s13 }
0x1a09   :  { %3090 = vrot.lane.b32.xlu0 %v5507_v0, %s4877_s28  ;;  %s5805_s28 = smov 48  }
0x1a0d   :  { %3256 = vrot.lane.b32.xlu0 %v5507_v0, %s4882_s0 }
0x1a11   :  { %3422 = vrot.lane.b32.xlu0 %v5507_v0, %s4883_s21 }
0x1a74   :  { %v2483_v1 = vpop.xlane.xlu0 %2482 }
0x1a75   :  { %v2484_v2 = vsub.f32 %v2477_v58, %v2483_v1 }
0x1a77   :  { %v2485_v3 = vmul.f32 1.442695, %v2484_v2 }
0x1a78   :  { %v2493_v38 = vpop.permute.xlu0 %2492 }
0x1a79   :  { %4807 = vpow2.f32 %v2485_v3  ;;  %4460 = vmatpush3.msk.msra.mxu1 %vm181_vm2, %v2493_v38 }
0x1a7a   :  { %4464 = vmatprep.subr.mxu1 %v4874_v54 }
0x1a7c   :  { %v2570_v4 = vpop.permute.xlu0 %2569 }
0x1a80   :  { %v2736_v5 = vpop.permute.xlu0 %2735 }
0x1a81   :  { %4477 = vmatmul.mubr.msk.f32.vlgmr.msra.gmra.mrb[10].mxu0 %vm379_vm7, %v2736_v5 }
0x1a82   :  { %4486 = vmatprep.mubr.msk.f32.mxu0 %vm4875_vm6, %v4874_v54 }
0x1a83   :  { %v4808_v39 = vpop.eup %4807 }
0x1a84   :  { %v2487_v6 = vsel %vm455_vm8, %v4808_v39, 0.0  ;;  %v3091_v10 = vpop.permute.xlu0 %3090 }
0x1a85   :  { %2488 = vadd.xlane.f32.xlu1 %v2487_v6 }
0x1a88   :  { %v3257_v14 = vpop.permute.xlu0 %3256 }
0x1a8c   :  { %v3423_v21 = vpop.permute.xlu0 %3422 }
0x1a96   :  { %2924 = vrot.lane.b32.xlu1 %v5507_v0, %s4876_s27  ;;  %s5804_s27 = smov 40  }
0x1a9a   :  { %3088 = vrot.lane.b32.xlu1 %v2919_v8, %s4879_s4 }
0x1a9e   :  { %3254 = vrot.lane.b32.xlu1 %v2919_v8, %s5802_s9 }
0x1aa2   :  { %3420 = vrot.lane.b32.xlu1 %v2919_v8, %s5803_s13 }
0x1b12   :  { %v2489_v9 = vpop.xlane.xlu1 %2488 }
0x1b13   :  { %4809 = vrcp.f32 %v2489_v9 }
0x1b16   :  { %v2925_v11 = vpop.permute.xlu1 %2924 }
0x1b17   :  { %4485 = vmatpush3.xpose.msk.msra.mxu0 %vm379_vm7, %v2925_v11 }
0x1b18   :  { %4494 = vmatprep.subr.mxu0 %v4874_v54 }
0x1b1a   :  { %v3089_v13 = vpop.permute.xlu1 %3088  ;;  %4487 = vmatmul.mubr.msk.f32.vlgmr.msra.gmra.mrb[12].mxu0 %vm379_vm7, %v2919_v8 }
0x1b1b   :  { %4495 = vmatpush3.xpose.msk.msra.mxu0 %vm379_vm7, %v3091_v10  ;;  %4496 = vmatprep.mubr.msk.f32.mxu0 %vm4875_vm6, %v4874_v54 }
0x1b1c   :  { %4504 = vmatprep.subr.mxu0 %v4874_v54 }
0x1b1d   :  { %v4810_v15 = vpop.eup %4809 }
0x1b1e   :  { %v2491_v17 = vmul.f32 %v4810_v15, %v4808_v39  ;;  %4497 = vmatmul.mubr.msk.f32.vlgmr.msra.gmra.mrb[14].mxu0 %vm379_vm7, %v3089_v13  ;;  %v3255_v18 = vpop.permute.xlu1 %3254 }
0x1b1f   :  { %4505 = vmatpush3.xpose.msk.msra.mxu0 %vm379_vm7, %v3257_v14  ;;  %4506 = vmatprep.mubr.msk.f32.mxu0 %vm4875_vm6, %v4874_v54 }
0x1b20   :  { %4462 = vmatmul.mubr.msk.f32.vlgmr.msra.gmra.mrb[40].mxu1 %vm469_vm9, %v2491_v17  ;;  %4514 = vmatprep.subr.mxu0 %v4874_v54 }
0x1b21   :  { %4465 = vmatpush3.xpose.msk.msra.mxu1 %vm379_vm7, %v5483_v48  ;;  %4466 = vmatprep.mubr.msk.f32.mxu1 %vm4875_vm6, %v4874_v54 }
0x1b22   :  { %4507 = vmatmul.mubr.msk.f32.vlgmr.msra.gmra.mrb[16].mxu0 %vm379_vm7, %v3255_v18  ;;  %4469 = vmatprep.subr.mxu1 %v4874_v54  ;;  %v3421_v22 = vpop.permute.xlu1 %3420 }
0x1b23   :  { %4515 = vmatpush3.xpose.msk.msra.mxu0 %vm379_vm7, %v3423_v21  ;;  %4516 = vmatprep.mubr.msk.f32.mxu0 %vm4875_vm6, %v4874_v54 }
0x1b24   :  { %4467 = vmatmul.mubr.msk.f32.vlgmr.msra.gmra.mrb[42].mxu1 %vm379_vm7, %v2570_v4 }
0x1b25   :  { %4471 = vmatprep.mubr.msk.f32.mxu1 %vm4875_vm6, %v4874_v54 }
0x1b26   :  { %4517 = vmatmul.mubr.msk.f32.vlgmr.msra.gmra.mrb[18].mxu0 %vm379_vm7, %v3421_v22 }
0x1b54   :  { %v2809_v23 = vpop.f32.mrb[10].mxu0 }
0x1b55   :  { %v4478_v49 = vpop.f32.mrb[11].mxu0  ;;  %v2813_v24 = vsel %vm455_vm8, %v2809_v23, -inf }
0x1b56   :  { %2814 = vmax.xlane.f32.xlu1 %v2813_v24 }
0x1be3   :  { %v2815_v25 = vpop.xlane.xlu1 %2814 }
0x1be4   :  { %v2816_v26 = vsub.f32 %v2809_v23, %v2815_v25 }
0x1be6   :  { %v2817_v27 = vmul.f32 1.442695, %v2816_v26 }
0x1be8   :  { %4811 = vpow2.f32 %v2817_v27 }
0x1bed   :  { %v2996_v28 = vpop.f32.mrb[12].mxu0 }
0x1bee   :  { %v4488_v29 = vpop.f32.mrb[13].mxu0  ;;  %v3000_v46 = vsel %vm455_vm8, %v2996_v28, -inf }
0x1bf1   :  { %v3162_v19 = vpop.f32.mrb[14].mxu0 }
0x1bf2   :  { %v4498_v31 = vpop.f32.mrb[15].mxu0  ;;  %v5558_v45 = vpop.eup %4811  ;;  %v3166_v47 = vsel %vm455_vm8, %v3162_v19, -inf }
0x1bf3   :  { %v2565_v32 = vpop.f32.mrb[40].mxu1  ;;  %v2819_v20 = vsel %vm455_vm8, %v5558_v45, 0.0 }
0x1bf4   :  { %v4463_v33 = vpop.f32.mrb[41].mxu1 }
0x1bf5   :  { %v3328_v35 = vpop.f32.mrb[16].mxu0 }
0x1bf6   :  { %v4508_v36 = vpop.f32.mrb[17].mxu0  ;;  %v3332_v16 = vsel %vm455_vm8, %v3328_v35, -inf }
0x1bf7   :  { %v2643_v12 = vpop.f32.mrb[42].mxu1 }
0x1bf8   :  { %v4468_v40 = vpop.f32.mrb[43].mxu1  ;;  %v2647_v41 = vsel %vm455_vm8, %v2643_v12, -inf }
0x1bf9   :  { %v3494_v42 = vpop.f32.mrb[18].mxu0  ;;  %2648 = vmax.xlane.f32.xlu0 %v2647_v41 }
0x1bfa   :  { %v4518_v43 = vpop.f32.mrb[19].mxu0  ;;  %v3498_v44 = vsel %vm455_vm8, %v3494_v42, -inf }
0x1bfb   :  { %3499 = vmax.xlane.f32.xlu1 %v3498_v44  ;;  %v4108_v43 = vld [vmem:[%s5771_s14 + $0x28] sm:$0xff] }
0x1bfd   :  { %3001 = vmax.xlane.f32.xlu0 %v3000_v46 }
0x1bff   :  { %2820 = vadd.xlane.f32.xlu1 %v2819_v20  ;;  %v4109_v20 = vld [vmem:[%s5771_s14 + $0x30] sm:$0xff] }
0x1c01   :  { %3167 = vmax.xlane.f32.xlu0 %v3166_v47  ;;  %v4110_v47 = vld [vmem:[%s5771_s14 + $0x38] sm:$0xff] }
0x1c05   :  { %3333 = vmax.xlane.f32.xlu0 %v3332_v16  ;;  %v4685_v16 = vpack.c.bf16 %v4110_v47, %v4109_v20  ;;  %v4129_v20 = vld [vmem:[%s5775_s18 + $0x80] sm:$0xff]  ;;  %v4130_v47 = vld [vmem:[%s5775_s18 + $0x88] sm:$0xff] }
0x1c86   :  { %v2649_v48 = vpop.xlane.xlu0 %2648 }
0x1c87   :  { %v2650_v30 = vsub.f32 %v2643_v12, %v2649_v48 }
0x1c88   :  { %v3500_v50 = vpop.xlane.xlu1 %3499 }
0x1c89   :  { %v3501_v53 = vsub.f32 %v3494_v42, %v3500_v50  ;;  %v2651_v3 = vmul.f32 1.442695, %v2650_v30  ;;  %v4107_v42 = vld [vmem:[%s5771_s14 + $0x20] sm:$0xff] }
0x1c8a   :  { %v3002_v51 = vpop.xlane.xlu0 %3001 }
0x1c8b   :  { %v3003_v52 = vsub.f32 %v2996_v28, %v3002_v51  ;;  %v3502_v59 = vmul.f32 1.442695, %v3501_v53 }
0x1c8c   :  { %v2821_v13 = vpop.xlane.xlu1 %2820 }
0x1c8d   :  { %v3004_v56 = vmul.f32 1.442695, %v3003_v52 }
0x1c8e   :  { %v3168_v58 = vpop.xlane.xlu0 %3167 }
0x1c8f   :  { %4813 = vpow2.f32 %v3004_v56  ;;  %v3169_v60 = vsub.f32 %v3162_v19, %v3168_v58 }
0x1c91   :  { %v3170_v63 = vmul.f32 1.442695, %v3169_v60 }
0x1c92   :  { %v3334_v1 = vpop.xlane.xlu0 %3333 }
0x1c93   :  { %4815 = vpow2.f32 %v3170_v63  ;;  %v3335_v2 = vsub.f32 %v3328_v35, %v3334_v1 }
0x1c94   :  { %4817 = vpow2.f32 %v3502_v59 }
0x1c95   :  { %v3336_v38 = vmul.f32 1.442695, %v3335_v2 }
0x1c97   :  { %4819 = vpow2.f32 %v3336_v38 }
0x1c98   :  { %4821 = vpow2.f32 %v2651_v3 }
0x1c99   :  { %v4814_v4 = vpop.eup %4813 }
0x1c9a   :  { %v3006_v5 = vsel %vm455_vm8, %v4814_v4, 0.0 }
0x1c9b   :  { %3007 = vadd.xlane.f32.xlu0 %v3006_v5 }
0x1c9d   :  { %v4816_v39 = vpop.eup %4815 }
0x1c9e   :  { %v3172_v6 = vsel %vm455_vm8, %v4816_v39, 0.0  ;;  %v5567_v7 = vpop.eup %4817 }
0x1c9f   :  { %3173 = vadd.xlane.f32.xlu1 %v3172_v6  ;;  %v3504_v61 = vsel %vm455_vm8, %v5567_v7, 0.0 }
0x1ca1   :  { %v4820_v57 = vpop.eup %4819 }
0x1ca2   :  { %v3338_v8 = vsel %vm455_vm8, %v4820_v57, 0.0  ;;  %v4822_v9 = vpop.eup %4821 }
0x1ca3   :  { %3505 = vadd.xlane.f32.xlu1 %v3504_v61  ;;  %3339 = vadd.xlane.f32.xlu0 %v3338_v8  ;;  %v2653_v10 = vsel %vm455_vm8, %v4822_v9, 0.0 }
0x1ca7   :  { %2654 = vadd.xlane.f32.xlu0 %v2653_v10 }
0x1cb4   :  { %2824 = vrot.lane.b32.xlu1 %v5456_v34, %s5804_s27 }
0x1cb8   :  { %3011 = vrot.lane.b32.xlu1 %v5507_v0, %s4878_s5 }
0x1cbc   :  { %3177 = vrot.lane.b32.xlu1 %v5507_v0, %s4880_s29 }
0x1cbd   :  { %2658 = vrot.lane.b32.xlu0 %v5456_v34, %s5805_s28 }
0x1cc0   :  { %3509 = vrot.lane.b32.xlu1 %v5507_v0, %s5804_s27 }
0x1cc1   :  { %3343 = vrot.lane.b32.xlu0 %v5507_v0, %s5805_s28 }
0x1cc5   :  { %2902 = vrot.lane.b32.xlu0 %v2565_v32, %s4887_s2 }
0x1d28   :  { %v3008_v11 = vpop.xlane.xlu0 %3007 }
0x1d2c   :  { %v3174_v15 = vpop.xlane.xlu1 %3173 }
0x1d30   :  { %v3340_v14 = vpop.xlane.xlu0 %3339  ;;  %v3506_v18 = vpop.xlane.xlu1 %3505 }
0x1d34   :  { %v2655_v17 = vpop.xlane.xlu0 %2654  ;;  %v2825_v34 = vpop.permute.xlu1 %2824 }
0x1d35   :  { %4823 = vrcp.f32 %v2655_v17 }
0x1d36   :  { %4825 = vrcp.f32 %v2821_v13 }
0x1d37   :  { %4827 = vrcp.f32 %v3008_v11 }
0x1d38   :  { %v2659_v21 = vpop.permute.xlu0 %2658  ;;  %4829 = vrcp.f32 %v3174_v15  ;;  %v3012_v24 = vpop.permute.xlu1 %3011 }
0x1d39   :  { %4470 = vmatpush3.msk.msra.mxu1 %vm181_vm2, %v2659_v21  ;;  %4831 = vrcp.f32 %v3340_v14 }
0x1d3a   :  { %4479 = vmatprep.subr.mxu1 %v4874_v54  ;;  %4833 = vrcp.f32 %v3506_v18 }
0x1d3c   :  { %v3178_v28 = vpop.permute.xlu1 %3177  ;;  %v3344_v31 = vpop.permute.xlu0 %3343 }
0x1d3f   :  { %v4824_v22 = vpop.eup %4823 }
0x1d40   :  { %v2657_v0 = vmul.f32 %v4824_v22, %v4822_v9  ;;  %v4826_v23 = vpop.eup %4825  ;;  %v3510_v35 = vpop.permute.xlu1 %3509 }
0x1d41   :  { %v2823_v49 = vmul.f32 %v4826_v23, %v5558_v45  ;;  %v4828_v25 = vpop.eup %4827  ;;  %v4681_v45 = vpack.c.bf16 %v4108_v43, %v4107_v42  ;;  %v2903_v58 = vpop.permute.xlu0 %2902 }
0x1d42   :  { %4472 = vmatmul.mubr.msk.f32.vlgmr.msra.gmra.mrb[44].mxu1 %vm469_vm9, %v2657_v0  ;;  %v3010_v26 = vmul.f32 %v4828_v25, %v4814_v4  ;;  %v4830_v27 = vpop.eup %4829  ;;  %v2913_v38 = vsel %vm379_vm7, %v5495_v55, %v2903_v58  ;;  %v4135_v58 = vld [vmem:[%s5775_s18 + $0xb0] sm:$0xff] }
0x1d43   :  { %4480 = vmatpush3.msk.msra.mxu1 %vm181_vm2, %v2825_v34  ;;  %4481 = vmatprep.mubr.msk.f32.mxu1 %vm4875_vm6, %v4874_v54  ;;  %v3176_v29 = vmul.f32 %v4830_v27, %v4816_v39  ;;  %v4832_v19 = vpop.eup %4831  ;;  %v4122_v27 = vld [vmem:[%s5773_s16 + $0x38] sm:$0xff] }
0x1d44   :  { %4489 = vmatprep.subr.mxu1 %v4874_v54  ;;  %v3342_v32 = vmul.f32 %v4832_v19, %v4820_v57  ;;  %v4834_v33 = vpop.eup %4833  ;;  %v4112_v57 = vld [vmem:[%s5772_s15 + $0x1] ss:$0 sm:$0xff] }
0x1d45   :  { %v3508_v36 = vmul.f32 %v4834_v33, %v5567_v7 }
0x1d46   :  { %4482 = vmatmul.mubr.msk.f32.vlgmr.msra.gmra.mrb[46].mxu1 %vm469_vm9, %v2823_v49  ;;  %v4119_v49 = vld [vmem:[%s5773_s16 + $0x20] sm:$0xff] }
0x1d47   :  { %4490 = vmatpush3.msk.msra.mxu1 %vm181_vm2, %v3012_v24  ;;  %4491 = vmatprep.mubr.msk.f32.mxu1 %vm4875_vm6, %v4874_v54  ;;  %v4120_v24 = vld [vmem:[%s5773_s16 + $0x28] sm:$0xff] }
0x1d48   :  { %4499 = vmatprep.subr.mxu1 %v4874_v54  ;;  %v4689_v25 = vpack.c.bf16 %v4120_v24, %v4119_v49  ;;  %v4146_v24 = vld [vmem:[%s5776_s19 + $0x1] ss:$0 sm:$0xff] }
0x1d4a   :  { %4492 = vmatmul.mubr.msk.f32.vlgmr.msra.gmra.mrb[48].mxu1 %vm469_vm9, %v3010_v26  ;;  %v4121_v26 = vld [vmem:[%s5773_s16 + $0x30] sm:$0xff] }
0x1d4b   :  { %4500 = vmatpush3.msk.msra.mxu1 %vm181_vm2, %v3178_v28  ;;  %4501 = vmatprep.mubr.msk.f32.mxu1 %vm4875_vm6, %v4874_v54  ;;  %v4693_v28 = vpack.c.bf16 %v4122_v27, %v4121_v26 }
0x1d4c   :  { %4509 = vmatprep.subr.mxu1 %v4874_v54 }
0x1d4e   :  { %4502 = vmatmul.mubr.msk.f32.vlgmr.msra.gmra.mrb[50].mxu1 %vm469_vm9, %v3176_v29 }
0x1d4f   :  { %4510 = vmatpush3.msk.msra.mxu1 %vm181_vm2, %v3344_v31  ;;  %4511 = vmatprep.mubr.msk.f32.mxu1 %vm4875_vm6, %v4874_v54 }
0x1d50   :  { %4519 = vmatprep.subr.mxu1 %v4874_v54 }
0x1d52   :  { %4512 = vmatmul.mubr.msk.f32.vlgmr.msra.gmra.mrb[52].mxu1 %vm469_vm9, %v3342_v32 }
0x1d53   :  { %4520 = vmatpush3.msk.msra.mxu1 %vm181_vm2, %v3510_v35  ;;  %4521 = vmatprep.mubr.msk.f32.mxu1 %vm4875_vm6, %v4874_v54 }
0x1d54   :  { %4682 = vmatprep.subr.bf16.mxu1 %v4681_v45 }
0x1d56   :  { %4522 = vmatmul.mubr.msk.f32.vlgmr.msra.gmra.mrb[54].mxu1 %vm469_vm9, %v3508_v36 }
0x1d57   :  { %4684 = vmatpush3.bf16.msra.mxu1 %v4681_v45 }
0x1d58   :  { %4686 = vmatprep.subr.bf16.mxu1 %v4685_v16 }
0x1d5b   :  { %4688 = vmatpush3.bf16.msra.mxu1 %v4685_v16  ;;  %v4697_v16 = vpack.c.bf16 %v4130_v47, %v4129_v20  ;;  %v4148_v47 = vld [vmem:[%s5764_s7] ss:$0 sm:$0xff] }
0x1d5c   :  { %4690 = vmatprep.subr.bf16.mxu1 %v4689_v25 }
0x1d5d   :  { %4698 = vmatprep.subr.bf16.mxu0 %v4697_v16 }
0x1d5e   :  { %4700 = vmatpush3.bf16.msra.mxu0 %v4697_v16 }
0x1e15   :  { %v2731_v12 = vpop.f32.mrb[44].mxu1 }
0x1e16   :  { %v4473_v40 = vpop.f32.mrb[45].mxu1 }
0x1e19   :  { %v2897_v41 = vpop.f32.mrb[46].mxu1 }
0x1e1a   :  { %v4483_v44 = vpop.f32.mrb[47].mxu1 }
0x1e1d   :  { %v3084_v46 = vpop.f32.mrb[48].mxu1 }
0x1e1e   :  { %v4493_v54 = vpop.f32.mrb[49].mxu1 }
0x1e21   :  { %v3250_v48 = vpop.f32.mrb[50].mxu1 }
0x1e22   :  { %3587 = vrot.lane.b32.xlu0 %v3250_v48, %s4887_s2  ;;  %v4503_v50 = vpop.f32.mrb[51].mxu1  ;;  %v4131_v48 = vld [vmem:[%s5775_s18 + $0x90] sm:$0xff]  ;;  %s4890_s2 = smov [#allocation2]  }
0x1e23   :  { %v4132_v50 = vld [vmem:[%s5775_s18 + $0x98] sm:$0xff]  ;;  %s4004_s15 = sshll.u32 %s4890_s2, 4  ;;  %s4005_s15 = int_to_ptr.vmem [resolvable:$true] %s4004_s15 }
0x1e24   :  { %s4849_s23 = scalar_lea.vmem %s4005_s15, 128  ;;  %p4854_p1 = scmp.lt.s32.totalorder %s4005_s15, %s4005_s15 }
0x1e25   :  { %v3416_v51 = vpop.f32.mrb[52].mxu1  ;;  %p4850_p0 = scmp.ne.s32.totalorder %s4005_s15, %s4849_s23  ;;  %p4855_p2 = scmp.lt.s32.totalorder %s4849_s23, %s4849_s23 }
0x1e26   :  { %2906 = vrot.lane.b32.xlu0 %v2731_v12, %s5806_s1  ;;  %3591 = vrot.lane.b32.xlu1 %v3416_v51, %s5806_s1  ;;  %v4513_v52 = vpop.f32.mrb[53].mxu1  ;;  %v4117_v12 = vld [vmem:[%s5767_s10 + $0x1] ss:$0 sm:$0xff]  ;;  %v4701_v51 = vpack.c.bf16 %v4132_v50, %v4131_v48 }
0x1e27   :  { %v4133_v52 = vld [vmem:[%s5775_s18 + $0xa0] sm:$0xff]  ;;  %p4856_p3 = por %p4855_p2, %p4854_p1 }
0x1e28   :  { %4702 = vmatprep.subr.bf16.mxu0 %v4701_v51 }
0x1e29   :  { %v3582_v53 = vpop.f32.mrb[54].mxu1  ;;  %4704 = vmatpush3.bf16.msra.mxu0 %v4701_v51  ;;  %p4857_p4 = pnand %p4856_p3, %p4850_p0 }
0x1e2a   :  { %3595 = vrot.lane.b32.xlu1 %v3582_v53, %s5807_s24  ;;  %v4523_v56 = vpop.f32.mrb[55].mxu1  ;;  %v4134_v53 = vld [vmem:[%s5775_s18 + $0xa8] sm:$0xff] }
0x1e2b   :  { %v4705_v56 = vpack.c.bf16 %v4134_v53, %v4133_v52 }
0x1e2d   :  { %4706 = vmatprep.subr.bf16.mxu0 %v4705_v56 }
0x1e2e   :  { %2910 = vrot.lane.b32.xlu1 %v2897_v41, %s5807_s24  ;;  %v4118_v41 = vld [vmem:[%s5768_s11 + $0x1] ss:$0 sm:$0xff]  ;;  %4708 = vmatpush3.bf16.msra.mxu0 %v4705_v56 }
0x1e94   :  { %v3588_v60 = vpop.permute.xlu0 %3587 }
0x1e95   :  { %v3598_v59 = vsel %vm379_vm7, %v3084_v46, %v3588_v60  ;;  %v4136_v60 = vld [vmem:[%s5775_s18 + $0xb8] sm:$0xff] }
0x1e98   :  { %v3592_v30 = vpop.permute.xlu1 %3591  ;;  %v2907_v2 = vpop.permute.xlu0 %2906 }
0x1e99   :  { %v3599_v63 = vsel %vm1056_vm11, %v3598_v59, %v3592_v30  ;;  %v2914_v4 = vsel %vm1056_vm11, %v2913_v38, %v2907_v2  ;;  %v4709_v30 = vpack.c.bf16 %v4136_v60, %v4135_v58  ;;  %v4137_v59 = vld [vmem:[%s5775_s18 + $0xc0] sm:$0xff]  ;;  %v4139_v2 = vld [vmem:[%s5775_s18 + $0xd0] sm:$0xff] }
0x1e9b   :  { %4710 = vmatprep.subr.bf16.mxu0 %v4709_v30 }
0x1e9c   :  { %v3596_v1 = vpop.permute.xlu1 %3595  ;;  %4712 = vmatpush3.bf16.msra.mxu0 %v4709_v30 }
0x1e9d   :  { %v3600_v3 = vsel %vm1058_vm12, %v3599_v63, %v3596_v1  ;;  %v4138_v63 = vld [vmem:[%s5775_s18 + $0xc8] sm:$0xff] }
0x1e9e   :  { %v3602_v5 = vrot.slane %v3600_v3, 3  ;;  %v4713_v1 = vpack.c.bf16 %v4138_v63, %v4137_v59  ;;  %v4140_v3 = vld [vmem:[%s5775_s18 + $0xd8] sm:$0xff] }
0x1e9f   :  { %v4717_v38 = vpack.c.bf16 %v4140_v3, %v4139_v2 }
0x1ea0   :  { %v2911_v39 = vpop.permute.xlu1 %2910  ;;  %4714 = vmatprep.subr.bf16.mxu0 %v4713_v1 }
0x1ea1   :  { %v2915_v6 = vsel %vm1058_vm12, %v2914_v4, %v2911_v39  ;;  %4716 = vmatpush3.bf16.msra.mxu0 %v4713_v1  ;;  %v4141_v4 = vld [vmem:[%s5775_s18 + $0xe0] sm:$0xff] }
0x1ea2   :  { %v3604_v7 = vsel %vm181_vm2, %v2915_v6, %v3602_v5  ;;  %4718 = vmatprep.subr.bf16.mxu0 %v4717_v38  ;;  %v4143_v6 = vld [vmem:[%s5775_s18 + $0xf0] sm:$0xff] }
0x1ea3   :  { %4532 = vmatprep.mubr.msk.f32.mxu1 %vm193_vm4, %v3604_v7  ;;  %v4144_v7 = vld [vmem:[%s5775_s18 + $0xf8] sm:$0xff] }
0x1ea4   :  { %4533 = vmatmul.mubr.msk.f32.vlgmr.msra.gmra.mrb[56].mxu1 %vm193_vm4, %v3602_v5  ;;  %v4142_v5 = vld [vmem:[%s5775_s18 + $0xe8] sm:$0xff] }
0x1ea5   :  { %4692 = vmatpush3.bf16.msra.mxu1 %v4689_v25  ;;  %4720 = vmatpush3.bf16.msra.mxu0 %v4717_v38  ;;  %v4721_v39 = vpack.c.bf16 %v4142_v5, %v4141_v4 }
0x1ea6   :  { %4694 = vmatprep.subr.bf16.mxu1 %v4693_v28 }
0x1ea7   :  { %4722 = vmatprep.subr.bf16.mxu0 %v4721_v39 }
0x1ea9   :  { %4696 = vmatpush3.bf16.msra.mxu1 %v4693_v28  ;;  %4724 = vmatpush3.bf16.msra.mxu0 %v4721_v39 }
0x1f77   :  { %v4534_v61 = vpop.f32.mrb[56].mxu1 }
0x1f78   :  { %v3695_v8 = vadd.f32 %v4534_v61, %v4112_v57  ;;  %v3689_v9 = vpop.f32.mrb[57].mxu1  ;;  %v4124_v61 = vld [vmem:[%s5774_s17 + $0x1] ss:$0 sm:$0xff] }
0x1f79   :  { %v3690_v55 = vadd.f32 %v4112_v57, %v3689_v9  ;;  %v4725_v57 = vpack.c.bf16 %v4144_v7, %v4143_v6 }
0x1f7a   :  { %v5646_v10 = vadd.f32 %v3695_v8, %v5415_v37 }
0x1f7b   :  { %v5649_v11 = vadd.f32 %v3690_v55, %v5418_v62  ;;  %4726 = vmatprep.subr.bf16.mxu0 %v4725_v57 }
0x1f7c   :  { %v3707_v13 = vsel %vm197_vm5, %v5646_v10, 0.0  ;;  %4728 = vmatpush3.bf16.msra.mxu0 %v4725_v57 }
0x1f7d   :  { %3708 = vadd.xlane.f32.xlu1 %v3707_v13  ;;  %v3704_v14 = vsel %vm193_vm4, %v5649_v11, 0.0 }
0x1f7e   :  { %3705 = vadd.xlane.f32.xlu0 %v3704_v14 }
0x200a   :  { %v3709_v15 = vpop.xlane.xlu1 %3708 }
0x200b   :  { %v3711_v17 = vmul.f32 0.03125, %v3709_v15  ;;  %v3706_v18 = vpop.xlane.xlu0 %3705 }
0x200c   :  { %v3710_v21 = vmul.f32 0.03125, %v3706_v18 }
0x200d   :  { %v3713_v34 = vsub.f32 %v5646_v10, %v3711_v17 }
0x200e   :  { %v3712_v37 = vsub.f32 %v5649_v11, %v3710_v21 }
0x200f   :  { %v3715_v0 = vmul.f32 %v3713_v34, %v3713_v34 }
0x2010   :  { %v3714_v22 = vmul.f32 %v3712_v37, %v3712_v37 }
0x2011   :  { %v3719_v23 = vsel %vm197_vm5, %v3715_v0, 0.0 }
0x2012   :  { %v3716_v62 = vsel %vm193_vm4, %v3714_v22, 0.0 }
0x2013   :  { %3717 = vadd.xlane.f32.xlu0 %v3716_v62 }
0x2017   :  { %3720 = vadd.xlane.f32.xlu0 %v3719_v23 }
0x20a0   :  { %v3718_v29 = vpop.xlane.xlu0 %3717 }
0x20a1   :  { %v3722_v19 = vmul.f32 0.03125, %v3718_v29 }
0x20a3   :  { %v3724_v31 = vadd.f32 1e-05, %v3722_v19 }
0x20a4   :  { %v3721_v32 = vpop.xlane.xlu0 %3720 }
0x20a5   :  { %4835 = vrsqrt.f32 %v3724_v31  ;;  %v3723_v33 = vmul.f32 0.03125, %v3721_v32 }
0x20a7   :  { %v3725_v35 = vadd.f32 1e-05, %v3723_v33 }
0x20a9   :  { %4837 = vrsqrt.f32 %v3725_v35 }
0x20af   :  { %v4836_v36 = vpop.eup %4835 }
0x20b0   :  { %v3728_v40 = vmul.f32 %v4836_v36, %v3712_v37 }
0x20b2   :  { %v3736_v42 = vmul.f32 %v4117_v12, %v3728_v40 }
0x20b3   :  { %v4838_v43 = vpop.eup %4837 }
0x20b4   :  { %v3729_v44 = vmul.f32 %v4838_v43, %v3713_v34  ;;  %v3744_v45 = vadd.f32 %v4118_v41, %v3736_v42 }
0x20b6   :  { %v3737_v46 = vmul.f32 %v4117_v12, %v3729_v44  ;;  %4543 = vmatprep.mubr.msk.f32.mxu1 %vm193_vm4, %v3744_v45 }
0x20b8   :  { %v3745_v54 = vadd.f32 %v4118_v41, %v3737_v46 }
0x20ba   :  { %4544 = vmatmul.mubr.msk.f32.vlgmr.msra.gmra.mrb[58].mxu1 %vm193_vm4, %v3745_v54  ;;  %v4147_v54 = vld [vmem:[%s5763_s6] ss:$0 sm:$0xff] }
0x218d   :  { %v4545_v8 = vpop.f32.mrb[58].mxu1 }
0x218e   :  { %v3837_v9 = vadd.f32 %v4545_v8, %v4124_v61  ;;  %v3831_v55 = vpop.f32.mrb[59].mxu1 }
0x218f   :  { %v3832_v13 = vadd.f32 %v4124_v61, %v3831_v55 }
0x2190   :  { %v4128_v14 = vmul.f32 -1.702, %v3837_v9 }
0x2191   :  { %v4127_v15 = vmul.f32 -1.702, %v3832_v13 }
0x2192   :  { %v3846_v17 = vmul.f32 1.442695, %v4128_v14 }
0x2193   :  { %v3844_v18 = vmul.f32 1.442695, %v4127_v15 }
0x2194   :  { %4839 = vpow2.f32 %v3846_v17 }
0x2195   :  { %4841 = vpow2.f32 %v3844_v18 }
0x219e   :  { %v4840_v21 = vpop.eup %4839 }
0x219f   :  { %v4842_v34 = vpop.eup %4841  ;;  %v3849_v37 = vadd.f32 1.0, %v4840_v21 }
0x21a0   :  { %v3848_v22 = vadd.f32 1.0, %v4842_v34 }
0x21a1   :  { %4843 = vrcp.f32 %v3849_v37 }
0x21a2   :  { %4845 = vrcp.f32 %v3848_v22 }
0x21ab   :  { %v4844_v62 = vpop.eup %4843 }
0x21ac   :  { %v4846_v0 = vpop.eup %4845  ;;  %v3855_v49 = vmul.f32 %v4844_v62, %v3837_v9 }
0x21ad   :  { %v3854_v23 = vmul.f32 %v4846_v0, %v3832_v13 }
0x21af   :  { %4578 = vmatprep.mubr.f32.mxu0 %v3854_v23 }
0x21b0   :  { %4579 = vmatmul.mubr.f32.vlgmr.msra.gmra.mrb[20].mxu0 %v3855_v49 }
0x2283   :  { %v4580_v25 = vpop.f32.mrb[20].mxu0 }
0x2284   :  { %v3953_v26 = vadd.f32 %v4580_v25, %v4146_v24  ;;  %v3947_v27 = vpop.f32.mrb[21].mxu0 }
0x2285   :  { %v3948_v28 = vadd.f32 %v4146_v24, %v3947_v27 }
0x2286   :  { %v3957_v29 = vadd.f32 %v3953_v26, %v5646_v10 }
0x2287   :  { %v3956_v19 = vadd.f32 %v3948_v28, %v5649_v11 }
0x2288   :  { %v3963_v31 = vrot.slane %v3957_v29, 2 }
0x2289   :  { %v3959_v32 = vrot.slane %v3956_v19, 1  ;;  %v3962_v33 = vrot.slane %v3956_v19, 2 }
0x228b   :  { %v3964_v35 = vsel %vm183_vm3, %v3962_v33, %v3963_v31 }
0x228c   :  { %v3967_v36 = vsel %vm3966_vm13, %v3959_v32, %v3964_v35 }
0x228d   :  { %v3970_v12 = vsel %vm193_vm4, %v3967_v36, 0.0 }
0x228e   :  { %3971 = vadd.xlane.f32.xlu0 %v3970_v12 }
0x231b   :  { %v3972_v40 = vpop.xlane.xlu0 %3971 }
0x231c   :  { %v3973_v41 = vmul.f32 0.03125, %v3972_v40 }
0x231e   :  { %v3974_v42 = vsub.f32 %v3967_v36, %v3973_v41 }
0x2320   :  { %v3975_v43 = vmul.f32 %v3974_v42, %v3974_v42 }
0x2322   :  { %v3976_v44 = vsel %vm193_vm4, %v3975_v43, 0.0 }
0x2323   :  { %3977 = vadd.xlane.f32.xlu1 %v3976_v44 }
0x23b0   :  { %v3978_v10 = vpop.xlane.xlu1 %3977 }
0x23b1   :  { %v3979_v45 = vmul.f32 0.03125, %v3978_v10 }
0x23b3   :  { %v3980_v11 = vadd.f32 1e-05, %v3979_v45 }
0x23b5   :  { %4847 = vrsqrt.f32 %v3980_v11 }
0x23bf   :  { %v4848_v46 = vpop.eup %4847 }
0x23c0   :  { %v3982_v20 = vmul.f32 %v4848_v46, %v3974_v42 }
0x23c2   :  { %v3989_v16 = vmul.f32 %v4147_v54, %v3982_v20 }
0x23c4   :  { %v3996_v48 = vadd.f32 %v4148_v47, %v3989_v16 }
0x23c6   :  { %3997 = vst.msk [vmem:[#allocation2] sm:$0xff] %vm193_vm4, %v3996_v48 }
0x23c7   :  { %4860 = shalt.err (!%p4857_p4)
}
0x23c8   :  { %s4861_s25 = scalar_lea.hbm %s5777_s20, 128 }
0x23c9   :  { %p4862_p5 = scmp.ne.s32.totalorder %s5777_s20, %s4861_s25  ;;  %p4865_p6 = scmp.lt.u32.totalorder %s4861_s25, %s5777_s20 }
0x23cb   :  { %p4867_p7 = pnand %p4865_p6, %p4862_p5 }
0x23cd   :  { %4870 = shalt.err (!%p4867_p7)
}
0x23ce   :  { %4007 = dma.vmem_to_hbm [thread:$0]  %s4005_s15, 128, %s5777_s20, [#allocation3]  }
0x23cf   :  { %4871 = dma.done.wait [#allocation3], 128  }
0x23d0   :  { %4872 = vsyncadd [#allocation3], 4294967168 }
0x23d1   :  { %4011 = vsyncpa [#allocation3], 1 }

</bundles_post_ra>
